<compile_context>
chip_gen: v7x
topology: tpu7x:2x2x1
jax: 0.10.0
libtpu: 0.0.40
codegen_flags: <defaults>
</compile_context>

<pallas_src>
import functools

import jax
import jax.numpy as jnp
from jax.experimental import pallas as pl
from jax.experimental.pallas import tpu as pltpu

# ----------------------------- configuration -----------------------------
C = 4
N_LAYERS = 1
STEPS = 2
MULTIPLIER = 2
STEM_MULT = 3
NUM_CLASSES = 10
SEARCH_SPACE = ("none", "skip_connect", "nor_conv_1x1", "nor_conv_3x3", "avg_pool_3x3")
BN_EPS = 1e-5

EDGE_KEYS = sorted("{:}<-{:}".format(i, j) for i in range(STEPS) for j in range(2 + i))
EDGE2INDEX = {k: idx for idx, k in enumerate(EDGE_KEYS)}
NUM_EDGES = len(EDGE_KEYS)


# ----------------------------- Pallas kernels -----------------------------
def _bn_rows(y):
    """Per-row (= per-channel) batch-statistic BatchNorm over the lane axis."""
    mean = jnp.mean(y, axis=1, keepdims=True)
    var = jnp.mean(jnp.square(y - mean), axis=1, keepdims=True)
    return (y - mean) * jax.lax.rsqrt(var + BN_EPS)


def _conv_bn_kernel(x_ref, w_ref, o_ref, *, relu_in):
    """[ReLU] -> W[Cout,K] @ X[K,M] -> batch-stat BN.  Output is lane-dense [Cout, M]."""
    x = x_ref[...]
    if relu_in:
        x = jnp.maximum(x, 0.0)
    y = jnp.dot(w_ref[...], x, preferred_element_type=jnp.float32)
    o_ref[...] = _bn_rows(y)


def _fact_reduce_kernel(x0_ref, x1_ref, w0_ref, w1_ref, o_ref, *, c0):
    """FactorizedReduce: ReLU -> two stride-2 1x1 convs -> concat -> BN (per-channel stats)."""
    y0 = jnp.dot(w0_ref[...], jnp.maximum(x0_ref[...], 0.0),
                 preferred_element_type=jnp.float32)
    y1 = jnp.dot(w1_ref[...], jnp.maximum(x1_ref[...], 0.0),
                 preferred_element_type=jnp.float32)
    o_ref[:c0, :] = _bn_rows(y0)
    o_ref[c0:, :] = _bn_rows(y1)


def _edge_kernel(*refs, n_groups, has_skip):
    """Fused DARTS mixed-op for one edge.

    refs (has_skip=True,  stride 1): w, x3, pool, wcat, skip, out
    refs (has_skip=False, stride 2): w, x3, pool, wcat, out
    w    : SMEM (5,)  softmaxed op weights, order = SEARCH_SPACE
    x3   : [9C, M]    raw 3x3 im2col patches of h (ReLU fused here; relu(0)=0)
    pool : [C, M]     avg_pool_3x3 output (count_include_pad=False), precomputed
    wcat : [G, C, 9C] group 0 = nor_conv_3x3, group 1 = nor_conv_1x1 (center
                      patch columns), group 2 = FactorizedReduce (center+corner)
    """
    if has_skip:
        w_ref, x3_ref, pool_ref, wcat_ref, skip_ref, o_ref = refs
    else:
        w_ref, x3_ref, pool_ref, wcat_ref, o_ref = refs
    x3 = jnp.maximum(x3_ref[...], 0.0)
    # nor_conv_3x3 (weight index 3) and nor_conv_1x1 (weight index 2)
    acc = w_ref[3] * _bn_rows(jnp.dot(wcat_ref[0], x3, preferred_element_type=jnp.float32))
    acc = acc + w_ref[2] * _bn_rows(jnp.dot(wcat_ref[1], x3, preferred_element_type=jnp.float32))
    if n_groups == 3:  # skip_connect == FactorizedReduce on stride-2 edges
        acc = acc + w_ref[1] * _bn_rows(jnp.dot(wcat_ref[2], x3, preferred_element_type=jnp.float32))
    if has_skip:       # skip_connect == identity on stride-1 edges
        acc = acc + w_ref[1] * skip_ref[...]
    acc = acc + w_ref[4] * pool_ref[...]
    # 'none' (weight index 0) contributes w*0 == 0 exactly.
    o_ref[...] = acc


def _bn_relu_kernel(x_ref, g_ref, b_ref, o_ref):
    """lastact: batch-stat BN (affine) followed by ReLU."""
    y = _bn_rows(x_ref[...])
    o_ref[...] = jnp.maximum(y * g_ref[...] + b_ref[...], 0.0)


# ----------------------------- Pallas wrappers -----------------------------
def pallas_conv_bn(W, x, k, stride, pad, relu_in):
    """[ReLU ->] Conv(k,stride,pad, bias=False) -> BN.  x: [Cin,N,H,W], W: [Cout, k*k*Cin]."""
    patches, (Nb, Ho, Wo) = im2col_cmajor(x, k, stride, pad)
    K, M = patches.shape
    Cout = W.shape[0]
    out = pl.pallas_call(
        functools.partial(_conv_bn_kernel, relu_in=relu_in),
        out_shape=jax.ShapeDtypeStruct((Cout, M), jnp.float32),
        grid=(1,),
        in_specs=[pl.BlockSpec((K, M), lambda i: (0, 0)),
                  pl.BlockSpec((Cout, K), lambda i: (0, 0))],
        out_specs=pl.BlockSpec((Cout, M), lambda i: (0, 0)),
    )(patches, W)
    return out.reshape(Cout, Nb, Ho, Wo)


def pallas_factorized_reduce(p, x):
    """FactorizedReduce preprocess0.  x: [Cin, N, H, W] with even H, W."""
    Cin, Nb, H, W = x.shape
    Ho, Wo = H // 2, W // 2
    M = Nb * Ho * Wo
    x0 = x[:, :, ::2, ::2].reshape(Cin, M)
    # PyTorch pads right/bottom then slices [1:,1:]; identical to x[1::2,1::2] for even H,W.
    x1 = x[:, :, 1::2, 1::2].reshape(Cin, M)
    c0 = p["W0"].shape[0]
    Cout = c0 + p["W1"].shape[0]
    out = pl.pallas_call(
        functools.partial(_fact_reduce_kernel, c0=c0),
        out_shape=jax.ShapeDtypeStruct((Cout, M), jnp.float32),
        grid=(1,),
        in_specs=[pl.BlockSpec((Cin, M), lambda i: (0, 0)),
                  pl.BlockSpec((Cin, M), lambda i: (0, 0)),
                  pl.BlockSpec((c0, Cin), lambda i: (0, 0)),
                  pl.BlockSpec((Cout - c0, Cin), lambda i: (0, 0))],
        out_specs=pl.BlockSpec((Cout, M), lambda i: (0, 0)),
    )(x0, x1, p["W0"], p["W1"])
    return out.reshape(Cout, Nb, Ho, Wo)


def pallas_bn_relu(x2d, gamma, beta):
    Cc, M = x2d.shape
    return pl.pallas_call(
        _bn_relu_kernel,
        out_shape=jax.ShapeDtypeStruct((Cc, M), jnp.float32),
        grid=(1,),
        in_specs=[pl.BlockSpec((Cc, M), lambda i: (0, 0)),
                  pl.BlockSpec((Cc, 1), lambda i: (0, 0)),
                  pl.BlockSpec((Cc, 1), lambda i: (0, 0))],
        out_specs=pl.BlockSpec((Cc, M), lambda i: (0, 0)),
    )(x2d, gamma, beta)


def edge_forward(edge_p, h, w_row, stride):
    """One fused DARTS edge: all 5 candidate ops + weighted sum in one pallas_call."""
    Cc = edge_p["C"]
    x3, (Nb, Ho, Wo) = im2col_cmajor(h, 3, stride, 1)       # [9C, M] raw patches
    pool = avg_pool_3x3_cmajor(h, stride)                    # [C, M]
    M = x3.shape[1]
    G = edge_p["Wcat"].shape[0]
    has_skip = (stride == 1)

    in_specs = [pl.BlockSpec(memory_space=pltpu.MemorySpace.SMEM),      # op weights
                pl.BlockSpec((9 * Cc, M), lambda i: (0, 0)),            # x3
                pl.BlockSpec((Cc, M), lambda i: (0, 0)),                # pool
                pl.BlockSpec((G, Cc, 9 * Cc), lambda i: (0, 0, 0))]     # Wcat
    args = [w_row, x3, pool, edge_p["Wcat"]]
    if has_skip:
        in_specs.append(pl.BlockSpec((Cc, M), lambda i: (0, 0)))        # identity skip
        args.append(h.reshape(Cc, M))

    out = pl.pallas_call(
        functools.partial(_edge_kernel, n_groups=G, has_skip=has_skip),
        out_shape=jax.ShapeDtypeStruct((Cc, M), jnp.float32),
        grid=(1,),
        in_specs=in_specs,
        out_specs=pl.BlockSpec((Cc, M), lambda i: (0, 0)),
    )(*args)
    return out.reshape(Cc, Nb, Ho, Wo)


# ----------------------------- JAX glue (layout / im2col / pool) -----------------------------
def im2col_cmajor(x, k, stride, pad):
    """x: [C, N, H, W] -> patches [k*k*C, N*Ho*Wo], row blocks ordered (kh, kw), channel inner."""
    Cc, Nb, H, W = x.shape
    xp = jnp.pad(x, ((0, 0), (0, 0), (pad, pad), (pad, pad)))
    Ho = (H + 2 * pad - k) // stride + 1
    Wo = (W + 2 * pad - k) // stride + 1
    slabs = []
    for kh in range(k):
        for kw in range(k):
            slabs.append(xp[:, :, kh:kh + stride * (Ho - 1) + 1:stride,
                            kw:kw + stride * (Wo - 1) + 1:stride])
    patches = jnp.concatenate(slabs, axis=0)                  # [k*k*C, N, Ho, Wo]
    return patches.reshape(k * k * Cc, Nb * Ho * Wo), (Nb, Ho, Wo)


def avg_pool_3x3_cmajor(x, stride):
    """AvgPool2d(3, stride, padding=1, count_include_pad=False).  x: [C,N,H,W] -> [C, M]."""
    Cc, Nb, H, W = x.shape
    Ho = (H + 2 - 3) // stride + 1
    Wo = (W + 2 - 3) // stride + 1
    xp = jnp.pad(x, ((0, 0), (0, 0), (1, 1), (1, 1)))
    op = jnp.pad(jnp.ones((1, 1, H, W), jnp.float32), ((0, 0), (0, 0), (1, 1), (1, 1)))
    acc, cnt = None, None
    for kh in range(3):
        for kw in range(3):
            sl = xp[:, :, kh:kh + stride * (Ho - 1) + 1:stride,
                    kw:kw + stride * (Wo - 1) + 1:stride]
            cs = op[:, :, kh:kh + stride * (Ho - 1) + 1:stride,
                    kw:kw + stride * (Wo - 1) + 1:stride]
            acc = sl if acc is None else acc + sl
            cnt = cs if cnt is None else cnt + cs
    return (acc / cnt).reshape(Cc, Nb * Ho * Wo)


# ----------------------------- cell / model forward -----------------------------
def cell_forward(cell, s0, s1, ww):
    if cell["pre0"][0] == "fact":
        s0p = pallas_factorized_reduce(cell["pre0"][1], s0)
    else:
        s0p = pallas_conv_bn(cell["pre0"][1]["W"], s0, 1, 1, 0, relu_in=True)
    s1p = pallas_conv_bn(cell["pre1"]["W"], s1, 1, 1, 0, relu_in=True)
    states = [s0p, s1p]
    for i in range(STEPS):
        node = None
        for j, h in enumerate(states):
            node_str = "{:}<-{:}".format(i, j)
            stride = 2 if (cell["reduction"] and j < 2) else 1
            w_row = ww[EDGE2INDEX[node_str]]
            y = edge_forward(cell["edges"][node_str], h, w_row, stride)
            node = y if node is None else node + y
        states.append(node)
    return jnp.concatenate(states[-MULTIPLIER:], axis=0)      # channel concat (axis 0)


def model_forward(params, x_nchw):
    x = jnp.transpose(x_nchw, (1, 0, 2, 3)).astype(jnp.float32)       # NCHW -> [C, N, H, W]
    normal_w = jax.nn.softmax(params["arch_normal"], axis=-1)         # tiny: plain JAX
    reduce_w = jax.nn.softmax(params["arch_reduce"], axis=-1)
    # stem: conv3x3 (no relu, bias=False) + BN, fused
    s = pallas_conv_bn(params["stem_W"], x, 3, 1, 1, relu_in=False)
    s0 = s1 = s
    for cell in params["cells"]:
        ww = reduce_w if cell["reduction"] else normal_w
        s0, s1 = s1, cell_forward(cell, s0, s1, ww)
    Cc, Nb, H, W = s1.shape
    y = pallas_bn_relu(s1.reshape(Cc, Nb * H * W),
                       params["lastact_gamma"], params["lastact_beta"])
    # global average pool + classifier: tiny, plain JAX (per perf review)
    pooled = y.reshape(Cc, Nb, H * W).mean(axis=2).T                  # [N, C_prev]
    logits = pooled @ params["cls_W"] + params["cls_b"]               # [N, num_classes]
    return pooled, logits


# ----------------------------- deterministic parameters -----------------------------
class ParamGen:
    def __init__(self, seed=0):
        self.key = jax.random.PRNGKey(seed)

    def normal(self, shape, scale=0.1):
        self.key, sub = jax.random.split(self.key)
        return scale * jax.random.normal(sub, shape, dtype=jnp.float32)


def make_edge_params(gen, Cc, stride):
    """Concatenated per-edge weights [G, C, 9C]; convs are bias-free (bias cancels in BN)."""
    G = 3 if stride == 2 else 2
    Wcat = jnp.zeros((G, Cc, 9 * Cc), jnp.float32)
    Wcat = Wcat.at[0].set(gen.normal((Cc, 9 * Cc)))                         # nor_conv_3x3
    Wcat = Wcat.at[1, :, 4 * Cc:5 * Cc].set(gen.normal((Cc, Cc)))           # nor_conv_1x1 (center)
    if stride == 2:                                                         # FactorizedReduce skip
        c0 = Cc // 2
        Wcat = Wcat.at[2, :c0, 4 * Cc:5 * Cc].set(gen.normal((c0, Cc)))     # conv_1 on x[::2,::2]
        Wcat = Wcat.at[2, c0:, 8 * Cc:9 * Cc].set(gen.normal((Cc - c0, Cc)))  # conv_2 on x[1::2,1::2]
    return {"C": Cc, "Wcat": Wcat}


def build_cell_params(gen, C_pp, C_p, Cc, reduction, reduction_prev):
    cell = {"reduction": reduction, "C": Cc}
    if reduction_prev:
        c0 = Cc // 2
        cell["pre0"] = ("fact", {"W0": gen.normal((c0, C_pp)),
                                 "W1": gen.normal((Cc - c0, C_pp))})
    else:
        cell["pre0"] = ("conv", {"W": gen.normal((Cc, C_pp))})
    cell["pre1"] = {"W": gen.normal((Cc, C_p))}
    edges = {}
    for i in range(STEPS):
        for j in range(2 + i):
            node_str = "{:}<-{:}".format(i, j)
            stride = 2 if (reduction and j < 2) else 1
            edges[node_str] = make_edge_params(gen, Cc, stride)
    cell["edges"] = edges
    return cell


def build_params(seed=0):
    gen = ParamGen(seed)
    params = {"stem_W": gen.normal((C * STEM_MULT, 9 * 3))}
    layer_channels = [C] * N_LAYERS + [C * 2] + [C * 2] * (N_LAYERS - 1) + \
                     [C * 4] + [C * 4] * (N_LAYERS - 1)
    layer_reductions = [False] * N_LAYERS + [True] + [False] * (N_LAYERS - 1) + \
                       [True] + [False] * (N_LAYERS - 1)
    C_pp, C_p, reduction_prev = C * STEM_MULT, C * STEM_MULT, False
    cells = []
    for C_curr, reduction in zip(layer_channels, layer_reductions):
        cells.append(build_cell_params(gen, C_pp, C_p, C_curr, reduction, reduction_prev))
        C_pp, C_p, reduction_prev = C_p, MULTIPLIER * C_curr, reduction
    params["cells"] = cells
    params["lastact_gamma"] = jnp.ones((C_p, 1), jnp.float32)
    params["lastact_beta"] = jnp.zeros((C_p, 1), jnp.float32)
    params["cls_W"] = gen.normal((C_p, NUM_CLASSES))
    params["cls_b"] = gen.normal((NUM_CLASSES,), 0.05)
    params["arch_normal"] = 0.001 * gen.normal((NUM_EDGES, len(SEARCH_SPACE)), 1.0)
    params["arch_reduce"] = 0.001 * gen.normal((NUM_EDGES, len(SEARCH_SPACE)), 1.0)
    params["final_C"] = C_p
    return params


# TODO(synk): genotype()/show_alphas()/get_message() are host-side string utilities (not part
#             of forward) and BN running-stat (momentum buffer) updates are not reproduced;
#             forward uses batch statistics, matching affine=False / track_running_stats=False
#             train-mode semantics.
# TODO(synk): megacore (v7x) grid split is not applied because every fused kernel needs
#             full-batch BN statistics over its (tiny) tile; at these sizes launch-count
#             reduction dominates.

if __name__ == "__main__":
    key = jax.random.PRNGKey(0)
    x = jax.random.normal(key, (2, 3, 16, 16), dtype=jnp.float32)

    params = build_params(seed=0)
    fwd = jax.jit(lambda inp: model_forward(params, inp))
    pooled, logits = fwd(x)
    jax.block_until_ready((pooled, logits))

    assert pooled.shape == (2, params["final_C"])
    assert logits.shape == (2, NUM_CLASSES)
    assert bool(jnp.all(jnp.isfinite(pooled))) and bool(jnp.all(jnp.isfinite(logits)))
    print("KERNEL_OK")
</pallas_src>

<mosaic_0001>
module attributes {stable_mosaic.version = 11 : i64} {
  func.func @_conv_bn_kernel(%arg0: i32, %arg1: memref<27x512xf32, #tpu.memory_space<vmem>>, %arg2: memref<12x27xf32, #tpu.memory_space<vmem>>, %arg3: memref<12x512xf32, #tpu.memory_space<vmem>>) attributes {dimension_semantics = [#tpu.dimension_semantics<arbitrary>], iteration_bounds = array<i64: 1>, scalar_prefetch = 0 : i64, scratch_operands = 0 : i64, tpu.core_type = #tpu.core_type<tc>, window_params = [{pipeline_mode = #tpu.pipeline_mode<synchronous>, transform_indices = @transform_0, window_bounds = array<i64: 27, 512>}, {pipeline_mode = #tpu.pipeline_mode<synchronous>, transform_indices = @transform_1, window_bounds = array<i64: 12, 27>}, {pipeline_mode = #tpu.pipeline_mode<synchronous>, transform_indices = @transform_2, window_bounds = array<i64: 12, 512>}]} {
    %c0 = arith.constant 0 : index
    %c0_0 = arith.constant 0 : index
    %0 = vector.load %arg1[%c0, %c0_0] : memref<27x512xf32, #tpu.memory_space<vmem>>, vector<27x512xf32>
    %c0_1 = arith.constant 0 : index
    %c0_2 = arith.constant 0 : index
    %1 = vector.load %arg2[%c0_1, %c0_2] : memref<12x27xf32, #tpu.memory_space<vmem>>, vector<12x27xf32>
    %cst = arith.constant dense<0.000000e+00> : vector<12x512xf32>
    %2 = tpu.matmul %1, %0, %cst {dimension_numbers = #tpu.dot_dimension_numbers<[1], [0], [0], [1], [0, 0, 1, 1], [], []>} : vector<12x27xf32>, vector<27x512xf32>, vector<12x512xf32> -> vector<12x512xf32>
    %cst_3 = arith.constant dense<0.000000e+00> : vector<12xf32>
    %3 = vector.multi_reduction <add>, %2, %cst_3 [1] : vector<12x512xf32> to vector<12xf32>
    %4 = vector.shape_cast %3 : vector<12xf32> to vector<12x1xf32>
    %cst_4 = arith.constant 5.120000e+02 : f32
    %5 = vector.broadcast %cst_4 : f32 to vector<12x1xf32>
    %6 = arith.divf %4, %5 : vector<12x1xf32>
    %7 = vector.broadcast %6 : vector<12x1xf32> to vector<12x512xf32>
    %8 = arith.subf %2, %7 : vector<12x512xf32>
    %9 = arith.mulf %8, %8 : vector<12x512xf32>
    %cst_5 = arith.constant dense<0.000000e+00> : vector<12xf32>
    %10 = vector.multi_reduction <add>, %9, %cst_5 [1] : vector<12x512xf32> to vector<12xf32>
    %11 = vector.shape_cast %10 : vector<12xf32> to vector<12x1xf32>
    %cst_6 = arith.constant 5.120000e+02 : f32
    %12 = vector.broadcast %cst_6 : f32 to vector<12x1xf32>
    %13 = arith.divf %11, %12 : vector<12x1xf32>
    %14 = vector.broadcast %6 : vector<12x1xf32> to vector<12x512xf32>
    %15 = arith.subf %2, %14 : vector<12x512xf32>
    %cst_7 = arith.constant 9.99999974E-6 : f32
    %16 = vector.broadcast %cst_7 : f32 to vector<12x1xf32>
    %17 = arith.addf %13, %16 : vector<12x1xf32>
    %18 = math.rsqrt %17 : vector<12x1xf32>
    %19 = vector.broadcast %18 : vector<12x1xf32> to vector<12x512xf32>
    %20 = arith.mulf %15, %19 : vector<12x512xf32>
    %c0_8 = arith.constant 0 : index
    %c0_9 = arith.constant 0 : index
    %21 = vector.load %arg3[%c0_8, %c0_9] : memref<12x512xf32, #tpu.memory_space<vmem>>, vector<12x512xf32>
    tpu.vector_store %arg3[%c0_8, %c0_9], %20 {strides = array<i32>} : memref<12x512xf32, #tpu.memory_space<vmem>>, vector<12x512xf32>,
    return
  }
  func.func @transform_0(%arg0: i32) -> (i32, i32) {
    %c0_i32 = arith.constant 0 : i32
    %c0_i32_0 = arith.constant 0 : i32
    %c0_i32_1 = arith.constant 0 : i32
    return %c0_i32, %c0_i32_0 : i32, i32
  }
  func.func @transform_1(%arg0: i32) -> (i32, i32) {
    %c0_i32 = arith.constant 0 : i32
    %c0_i32_0 = arith.constant 0 : i32
    %c0_i32_1 = arith.constant 0 : i32
    return %c0_i32, %c0_i32_0 : i32, i32
  }
  func.func @transform_2(%arg0: i32) -> (i32, i32) {
    %c0_i32 = arith.constant 0 : i32
    %c0_i32_0 = arith.constant 0 : i32
    %c0_i32_1 = arith.constant 0 : i32
    return %c0_i32, %c0_i32_0 : i32, i32
  }
}

module attributes {stable_mosaic.version = 11 : i64} {
  func.func @_conv_bn_kernel(%arg0: i32, %arg1: memref<12x512xf32, #tpu.memory_space<vmem>>, %arg2: memref<4x12xf32, #tpu.memory_space<vmem>>, %arg3: memref<4x512xf32, #tpu.memory_space<vmem>>) attributes {dimension_semantics = [#tpu.dimension_semantics<arbitrary>], iteration_bounds = array<i64: 1>, scalar_prefetch = 0 : i64, scratch_operands = 0 : i64, tpu.core_type = #tpu.core_type<tc>, window_params = [{pipeline_mode = #tpu.pipeline_mode<synchronous>, transform_indices = @transform_0, window_bounds = array<i64: 12, 512>}, {pipeline_mode = #tpu.pipeline_mode<synchronous>, transform_indices = @transform_1, window_bounds = array<i64: 4, 12>}, {pipeline_mode = #tpu.pipeline_mode<synchronous>, transform_indices = @transform_2, window_bounds = array<i64: 4, 512>}]} {
    %c0 = arith.constant 0 : index
    %c0_0 = arith.constant 0 : index
    %0 = vector.load %arg1[%c0, %c0_0] : memref<12x512xf32, #tpu.memory_space<vmem>>, vector<12x512xf32>
    %cst = arith.constant 0.000000e+00 : f32
    %1 = vector.broadcast %cst : f32 to vector<12x512xf32>
    %2 = arith.maximumf %0, %1 : vector<12x512xf32>
    %c0_1 = arith.constant 0 : index
    %c0_2 = arith.constant 0 : index
    %3 = vector.load %arg2[%c0_1, %c0_2] : memref<4x12xf32, #tpu.memory_space<vmem>>, vector<4x12xf32>
    %cst_3 = arith.constant dense<0.000000e+00> : vector<4x512xf32>
    %4 = tpu.matmul %3, %2, %cst_3 {dimension_numbers = #tpu.dot_dimension_numbers<[1], [0], [0], [1], [0, 0, 1, 1], [], []>} : vector<4x12xf32>, vector<12x512xf32>, vector<4x512xf32> -> vector<4x512xf32>
    %cst_4 = arith.constant dense<0.000000e+00> : vector<4xf32>
    %5 = vector.multi_reduction <add>, %4, %cst_4 [1] : vector<4x512xf32> to vector<4xf32>
    %6 = vector.shape_cast %5 : vector<4xf32> to vector<4x1xf32>
    %cst_5 = arith.constant 5.120000e+02 : f32
    %7 = vector.broadcast %cst_5 : f32 to vector<4x1xf32>
    %8 = arith.divf %6, %7 : vector<4x1xf32>
    %9 = vector.broadcast %8 : vector<4x1xf32> to vector<4x512xf32>
    %10 = arith.subf %4, %9 : vector<4x512xf32>
    %11 = arith.mulf %10, %10 : vector<4x512xf32>
    %cst_6 = arith.constant dense<0.000000e+00> : vector<4xf32>
    %12 = vector.multi_reduction <add>, %11, %cst_6 [1] : vector<4x512xf32> to vector<4xf32>
    %13 = vector.shape_cast %12 : vector<4xf32> to vector<4x1xf32>
    %cst_7 = arith.constant 5.120000e+02 : f32
    %14 = vector.broadcast %cst_7 : f32 to vector<4x1xf32>
    %15 = arith.divf %13, %14 : vector<4x1xf32>
    %16 = vector.broadcast %8 : vector<4x1xf32> to vector<4x512xf32>
    %17 = arith.subf %4, %16 : vector<4x512xf32>
    %cst_8 = arith.constant 9.99999974E-6 : f32
    %18 = vector.broadcast %cst_8 : f32 to vector<4x1xf32>
    %19 = arith.addf %15, %18 : vector<4x1xf32>
    %20 = math.rsqrt %19 : vector<4x1xf32>
    %21 = vector.broadcast %20 : vector<4x1xf32> to vector<4x512xf32>
    %22 = arith.mulf %17, %21 : vector<4x512xf32>
    %c0_9 = arith.constant 0 : index
    %c0_10 = arith.constant 0 : index
    %23 = vector.load %arg3[%c0_9, %c0_10] : memref<4x512xf32, #tpu.memory_space<vmem>>, vector<4x512xf32>
    tpu.vector_store %arg3[%c0_9, %c0_10], %22 {strides = array<i32>} : memref<4x512xf32, #tpu.memory_space<vmem>>, vector<4x512xf32>,
    return
  }
  func.func @transform_0(%arg0: i32) -> (i32, i32) {
    %c0_i32 = arith.constant 0 : i32
    %c0_i32_0 = arith.constant 0 : i32
    %c0_i32_1 = arith.constant 0 : i32
    return %c0_i32, %c0_i32_0 : i32, i32
  }
  func.func @transform_1(%arg0: i32) -> (i32, i32) {
    %c0_i32 = arith.constant 0 : i32
    %c0_i32_0 = arith.constant 0 : i32
    %c0_i32_1 = arith.constant 0 : i32
    return %c0_i32, %c0_i32_0 : i32, i32
  }
  func.func @transform_2(%arg0: i32) -> (i32, i32) {
    %c0_i32 = arith.constant 0 : i32
    %c0_i32_0 = arith.constant 0 : i32
    %c0_i32_1 = arith.constant 0 : i32
    return %c0_i32, %c0_i32_0 : i32, i32
  }
}

module attributes {stable_mosaic.version = 11 : i64} {
  func.func @_edge_kernel(%arg0: i32, %arg1: memref<5xf32, #tpu.memory_space<smem>>, %arg2: memref<36x512xf32, #tpu.memory_space<vmem>>, %arg3: memref<4x512xf32, #tpu.memory_space<vmem>>, %arg4: memref<2x4x36xf32, #tpu.memory_space<vmem>>, %arg5: memref<4x512xf32, #tpu.memory_space<vmem>>, %arg6: memref<4x512xf32, #tpu.memory_space<vmem>>) attributes {dimension_semantics = [#tpu.dimension_semantics<arbitrary>], iteration_bounds = array<i64: 1>, scalar_prefetch = 0 : i64, scratch_operands = 0 : i64, tpu.core_type = #tpu.core_type<tc>, window_params = [{transform_indices = @transform_0, window_bounds = array<i64: 5>}, {pipeline_mode = #tpu.pipeline_mode<synchronous>, transform_indices = @transform_1, window_bounds = array<i64: 36, 512>}, {pipeline_mode = #tpu.pipeline_mode<synchronous>, transform_indices = @transform_2, window_bounds = array<i64: 4, 512>}, {pipeline_mode = #tpu.pipeline_mode<synchronous>, transform_indices = @transform_3, window_bounds = array<i64: 2, 4, 36>}, {pipeline_mode = #tpu.pipeline_mode<synchronous>, transform_indices = @transform_4, window_bounds = array<i64: 4, 512>}, {pipeline_mode = #tpu.pipeline_mode<synchronous>, transform_indices = @transform_5, window_bounds = array<i64: 4, 512>}]} {
    %c0 = arith.constant 0 : index
    %c0_0 = arith.constant 0 : index
    %0 = vector.load %arg2[%c0, %c0_0] : memref<36x512xf32, #tpu.memory_space<vmem>>, vector<36x512xf32>
    %cst = arith.constant 0.000000e+00 : f32
    %1 = vector.broadcast %cst : f32 to vector<36x512xf32>
    %2 = arith.maximumf %0, %1 : vector<36x512xf32>
    %c3 = arith.constant 3 : index
    %3 = memref.load %arg1[%c3] : memref<5xf32, #tpu.memory_space<smem>>
    %c0_1 = arith.constant 0 : index
    %c0_2 = arith.constant 0 : index
    %c0_3 = arith.constant 0 : index
    %4 = vector.load %arg4[%c0_1, %c0_2, %c0_3] : memref<2x4x36xf32, #tpu.memory_space<vmem>>, vector<1x4x36xf32>
    %5 = vector.shape_cast %4 : vector<1x4x36xf32> to vector<4x36xf32>
    %cst_4 = arith.constant dense<0.000000e+00> : vector<4x512xf32>
    %6 = tpu.matmul %5, %2, %cst_4 {dimension_numbers = #tpu.dot_dimension_numbers<[1], [0], [0], [1], [0, 0, 1, 1], [], []>} : vector<4x36xf32>, vector<36x512xf32>, vector<4x512xf32> -> vector<4x512xf32>
    %cst_5 = arith.constant dense<0.000000e+00> : vector<4xf32>
    %7 = vector.multi_reduction <add>, %6, %cst_5 [1] : vector<4x512xf32> to vector<4xf32>
    %8 = vector.shape_cast %7 : vector<4xf32> to vector<4x1xf32>
    %cst_6 = arith.constant 5.120000e+02 : f32
    %9 = vector.broadcast %cst_6 : f32 to vector<4x1xf32>
    %10 = arith.divf %8, %9 : vector<4x1xf32>
    %11 = vector.broadcast %10 : vector<4x1xf32> to vector<4x512xf32>
    %12 = arith.subf %6, %11 : vector<4x512xf32>
    %13 = arith.mulf %12, %12 : vector<4x512xf32>
    %cst_7 = arith.constant dense<0.000000e+00> : vector<4xf32>
    %14 = vector.multi_reduction <add>, %13, %cst_7 [1] : vector<4x512xf32> to vector<4xf32>
    %15 = vector.shape_cast %14 : vector<4xf32> to vector<4x1xf32>
    %cst_8 = arith.constant 5.120000e+02 : f32
    %16 = vector.broadcast %cst_8 : f32 to vector<4x1xf32>
    %17 = arith.divf %15, %16 : vector<4x1xf32>
    %18 = vector.broadcast %10 : vector<4x1xf32> to vector<4x512xf32>
    %19 = arith.subf %6, %18 : vector<4x512xf32>
    %cst_9 = arith.constant 9.99999974E-6 : f32
    %20 = vector.broadcast %cst_9 : f32 to vector<4x1xf32>
    %21 = arith.addf %17, %20 : vector<4x1xf32>
    %22 = math.rsqrt %21 : vector<4x1xf32>
    %23 = vector.broadcast %22 : vector<4x1xf32> to vector<4x512xf32>
    %24 = arith.mulf %19, %23 : vector<4x512xf32>
    %25 = vector.broadcast %3 : f32 to vector<4x512xf32>
    %26 = arith.mulf %25, %24 : vector<4x512xf32>
    %c2 = arith.constant 2 : index
    %27 = memref.load %arg1[%c2] : memref<5xf32, #tpu.memory_space<smem>>
    %c1 = arith.constant 1 : index
    %c0_10 = arith.constant 0 : index
    %c0_11 = arith.constant 0 : index
    %28 = vector.load %arg4[%c1, %c0_10, %c0_11] : memref<2x4x36xf32, #tpu.memory_space<vmem>>, vector<1x4x36xf32>
    %29 = vector.shape_cast %28 : vector<1x4x36xf32> to vector<4x36xf32>
    %cst_12 = arith.constant dense<0.000000e+00> : vector<4x512xf32>
    %30 = tpu.matmul %29, %2, %cst_12 {dimension_numbers = #tpu.dot_dimension_numbers<[1], [0], [0], [1], [0, 0, 1, 1], [], []>} : vector<4x36xf32>, vector<36x512xf32>, vector<4x512xf32> -> vector<4x512xf32>
    %cst_13 = arith.constant dense<0.000000e+00> : vector<4xf32>
    %31 = vector.multi_reduction <add>, %30, %cst_13 [1] : vector<4x512xf32> to vector<4xf32>
    %32 = vector.shape_cast %31 : vector<4xf32> to vector<4x1xf32>
    %cst_14 = arith.constant 5.120000e+02 : f32
    %33 = vector.broadcast %cst_14 : f32 to vector<4x1xf32>
    %34 = arith.divf %32, %33 : vector<4x1xf32>
    %35 = vector.broadcast %34 : vector<4x1xf32> to vector<4x512xf32>
    %36 = arith.subf %30, %35 : vector<4x512xf32>
    %37 = arith.mulf %36, %36 : vector<4x512xf32>
    %cst_15 = arith.constant dense<0.000000e+00> : vector<4xf32>
    %38 = vector.multi_reduction <add>, %37, %cst_15 [1] : vector<4x512xf32> to vector<4xf32>
    %39 = vector.shape_cast %38 : vector<4xf32> to vector<4x1xf32>
    %cst_16 = arith.constant 5.120000e+02 : f32
    %40 = vector.broadcast %cst_16 : f32 to vector<4x1xf32>
    %41 = arith.divf %39, %40 : vector<4x1xf32>
    %42 = vector.broadcast %34 : vector<4x1xf32> to vector<4x512xf32>
    %43 = arith.subf %30, %42 : vector<4x512xf32>
    %cst_17 = arith.constant 9.99999974E-6 : f32
    %44 = vector.broadcast %cst_17 : f32 to vector<4x1xf32>
    %45 = arith.addf %41, %44 : vector<4x1xf32>
    %46 = math.rsqrt %45 : vector<4x1xf32>
    %47 = vector.broadcast %46 : vector<4x1xf32> to vector<4x512xf32>
    %48 = arith.mulf %43, %47 : vector<4x512xf32>
    %49 = vector.broadcast %27 : f32 to vector<4x512xf32>
    %50 = arith.mulf %49, %48 : vector<4x512xf32>
    %51 = arith.addf %26, %50 : vector<4x512xf32>
    %c1_18 = arith.constant 1 : index
    %52 = memref.load %arg1[%c1_18] : memref<5xf32, #tpu.memory_space<smem>>
    %c0_19 = arith.constant 0 : index
    %c0_20 = arith.constant 0 : index
    %53 = vector.load %arg5[%c0_19, %c0_20] : memref<4x512xf32, #tpu.memory_space<vmem>>, vector<4x512xf32>
    %54 = vector.broadcast %52 : f32 to vector<4x512xf32>
    %55 = arith.mulf %54, %53 : vector<4x512xf32>
    %56 = arith.addf %51, %55 : vector<4x512xf32>
    %c4 = arith.constant 4 : index
    %57 = memref.load %arg1[%c4] : memref<5xf32, #tpu.memory_space<smem>>
    %c0_21 = arith.constant 0 : index
    %c0_22 = arith.constant 0 : index
    %58 = vector.load %arg3[%c0_21, %c0_22] : memref<4x512xf32, #tpu.memory_space<vmem>>, vector<4x512xf32>
    %59 = vector.broadcast %57 : f32 to vector<4x512xf32>
    %60 = arith.mulf %59, %58 : vector<4x512xf32>
    %61 = arith.addf %56, %60 : vector<4x512xf32>
    %c0_23 = arith.constant 0 : index
    %c0_24 = arith.constant 0 : index
    %62 = vector.load %arg6[%c0_23, %c0_24] : memref<4x512xf32, #tpu.memory_space<vmem>>, vector<4x512xf32>
    tpu.vector_store %arg6[%c0_23, %c0_24], %61 {strides = array<i32>} : memref<4x512xf32, #tpu.memory_space<vmem>>, vector<4x512xf32>,
    return
  }
  func.func @transform_0(%arg0: i32) -> i32 {
    %c0_i32 = arith.constant 0 : i32
    %c0_i32_0 = arith.constant 0 : i32
    return %c0_i32 : i32
  }
  func.func @transform_1(%arg0: i32) -> (i32, i32) {
    %c0_i32 = arith.constant 0 : i32
    %c0_i32_0 = arith.constant 0 : i32
    %c0_i32_1 = arith.constant 0 : i32
    return %c0_i32, %c0_i32_0 : i32, i32
  }
  func.func @transform_2(%arg0: i32) -> (i32, i32) {
    %c0_i32 = arith.constant 0 : i32
    %c0_i32_0 = arith.constant 0 : i32
    %c0_i32_1 = arith.constant 0 : i32
    return %c0_i32, %c0_i32_0 : i32, i32
  }
  func.func @transform_3(%arg0: i32) -> (i32, i32, i32) {
    %c0_i32 = arith.constant 0 : i32
    %c0_i32_0 = arith.constant 0 : i32
    %c0_i32_1 = arith.constant 0 : i32
    %c0_i32_2 = arith.constant 0 : i32
    return %c0_i32, %c0_i32_0, %c0_i32_1 : i32, i32, i32
  }
  func.func @transform_4(%arg0: i32) -> (i32, i32) {
    %c0_i32 = arith.constant 0 : i32
    %c0_i32_0 = arith.constant 0 : i32
    %c0_i32_1 = arith.constant 0 : i32
    return %c0_i32, %c0_i32_0 : i32, i32
  }
  func.func @transform_5(%arg0: i32) -> (i32, i32) {
    %c0_i32 = arith.constant 0 : i32
    %c0_i32_0 = arith.constant 0 : i32
    %c0_i32_1 = arith.constant 0 : i32
    return %c0_i32, %c0_i32_0 : i32, i32
  }
}

module attributes {stable_mosaic.version = 11 : i64} {
  func.func @_conv_bn_kernel(%arg0: i32, %arg1: memref<8x512xf32, #tpu.memory_space<vmem>>, %arg2: memref<8x8xf32, #tpu.memory_space<vmem>>, %arg3: memref<8x512xf32, #tpu.memory_space<vmem>>) attributes {dimension_semantics = [#tpu.dimension_semantics<arbitrary>], iteration_bounds = array<i64: 1>, scalar_prefetch = 0 : i64, scratch_operands = 0 : i64, tpu.core_type = #tpu.core_type<tc>, window_params = [{pipeline_mode = #tpu.pipeline_mode<synchronous>, transform_indices = @transform_0, window_bounds = array<i64: 8, 512>}, {pipeline_mode = #tpu.pipeline_mode<synchronous>, transform_indices = @transform_1, window_bounds = array<i64: 8, 8>}, {pipeline_mode = #tpu.pipeline_mode<synchronous>, transform_indices = @transform_2, window_bounds = array<i64: 8, 512>}]} {
    %c0 = arith.constant 0 : index
    %c0_0 = arith.constant 0 : index
    %0 = vector.load %arg1[%c0, %c0_0] : memref<8x512xf32, #tpu.memory_space<vmem>>, vector<8x512xf32>
    %cst = arith.constant 0.000000e+00 : f32
    %1 = vector.broadcast %cst : f32 to vector<8x512xf32>
    %2 = arith.maximumf %0, %1 : vector<8x512xf32>
    %c0_1 = arith.constant 0 : index
    %c0_2 = arith.constant 0 : index
    %3 = vector.load %arg2[%c0_1, %c0_2] : memref<8x8xf32, #tpu.memory_space<vmem>>, vector<8x8xf32>
    %cst_3 = arith.constant dense<0.000000e+00> : vector<8x512xf32>
    %4 = tpu.matmul %3, %2, %cst_3 {dimension_numbers = #tpu.dot_dimension_numbers<[1], [0], [0], [1], [0, 0, 1, 1], [], []>} : vector<8x8xf32>, vector<8x512xf32>, vector<8x512xf32> -> vector<8x512xf32>
    %cst_4 = arith.constant dense<0.000000e+00> : vector<8xf32>
    %5 = vector.multi_reduction <add>, %4, %cst_4 [1] : vector<8x512xf32> to vector<8xf32>
    %6 = vector.shape_cast %5 : vector<8xf32> to vector<8x1xf32>
    %cst_5 = arith.constant 5.120000e+02 : f32
    %7 = vector.broadcast %cst_5 : f32 to vector<8x1xf32>
    %8 = arith.divf %6, %7 : vector<8x1xf32>
    %9 = vector.broadcast %8 : vector<8x1xf32> to vector<8x512xf32>
    %10 = arith.subf %4, %9 : vector<8x512xf32>
    %11 = arith.mulf %10, %10 : vector<8x512xf32>
    %cst_6 = arith.constant dense<0.000000e+00> : vector<8xf32>
    %12 = vector.multi_reduction <add>, %11, %cst_6 [1] : vector<8x512xf32> to vector<8xf32>
    %13 = vector.shape_cast %12 : vector<8xf32> to vector<8x1xf32>
    %cst_7 = arith.constant 5.120000e+02 : f32
    %14 = vector.broadcast %cst_7 : f32 to vector<8x1xf32>
    %15 = arith.divf %13, %14 : vector<8x1xf32>
    %16 = vector.broadcast %8 : vector<8x1xf32> to vector<8x512xf32>
    %17 = arith.subf %4, %16 : vector<8x512xf32>
    %cst_8 = arith.constant 9.99999974E-6 : f32
    %18 = vector.broadcast %cst_8 : f32 to vector<8x1xf32>
    %19 = arith.addf %15, %18 : vector<8x1xf32>
    %20 = math.rsqrt %19 : vector<8x1xf32>
    %21 = vector.broadcast %20 : vector<8x1xf32> to vector<8x512xf32>
    %22 = arith.mulf %17, %21 : vector<8x512xf32>
    %c0_9 = arith.constant 0 : index
    %c0_10 = arith.constant 0 : index
    %23 = vector.load %arg3[%c0_9, %c0_10] : memref<8x512xf32, #tpu.memory_space<vmem>>, vector<8x512xf32>
    tpu.vector_store %arg3[%c0_9, %c0_10], %22 {strides = array<i32>} : memref<8x512xf32, #tpu.memory_space<vmem>>, vector<8x512xf32>,
    return
  }
  func.func @transform_0(%arg0: i32) -> (i32, i32) {
    %c0_i32 = arith.constant 0 : i32
    %c0_i32_0 = arith.constant 0 : i32
    %c0_i32_1 = arith.constant 0 : i32
    return %c0_i32, %c0_i32_0 : i32, i32
  }
  func.func @transform_1(%arg0: i32) -> (i32, i32) {
    %c0_i32 = arith.constant 0 : i32
    %c0_i32_0 = arith.constant 0 : i32
    %c0_i32_1 = arith.constant 0 : i32
    return %c0_i32, %c0_i32_0 : i32, i32
  }
  func.func @transform_2(%arg0: i32) -> (i32, i32) {
    %c0_i32 = arith.constant 0 : i32
    %c0_i32_0 = arith.constant 0 : i32
    %c0_i32_1 = arith.constant 0 : i32
    return %c0_i32, %c0_i32_0 : i32, i32
  }
}

module attributes {stable_mosaic.version = 11 : i64} {
  func.func @_conv_bn_kernel(%arg0: i32, %arg1: memref<12x512xf32, #tpu.memory_space<vmem>>, %arg2: memref<8x12xf32, #tpu.memory_space<vmem>>, %arg3: memref<8x512xf32, #tpu.memory_space<vmem>>) attributes {dimension_semantics = [#tpu.dimension_semantics<arbitrary>], iteration_bounds = array<i64: 1>, scalar_prefetch = 0 : i64, scratch_operands = 0 : i64, tpu.core_type = #tpu.core_type<tc>, window_params = [{pipeline_mode = #tpu.pipeline_mode<synchronous>, transform_indices = @transform_0, window_bounds = array<i64: 12, 512>}, {pipeline_mode = #tpu.pipeline_mode<synchronous>, transform_indices = @transform_1, window_bounds = array<i64: 8, 12>}, {pipeline_mode = #tpu.pipeline_mode<synchronous>, transform_indices = @transform_2, window_bounds = array<i64: 8, 512>}]} {
    %c0 = arith.constant 0 : index
    %c0_0 = arith.constant 0 : index
    %0 = vector.load %arg1[%c0, %c0_0] : memref<12x512xf32, #tpu.memory_space<vmem>>, vector<12x512xf32>
    %cst = arith.constant 0.000000e+00 : f32
    %1 = vector.broadcast %cst : f32 to vector<12x512xf32>
    %2 = arith.maximumf %0, %1 : vector<12x512xf32>
    %c0_1 = arith.constant 0 : index
    %c0_2 = arith.constant 0 : index
    %3 = vector.load %arg2[%c0_1, %c0_2] : memref<8x12xf32, #tpu.memory_space<vmem>>, vector<8x12xf32>
    %cst_3 = arith.constant dense<0.000000e+00> : vector<8x512xf32>
    %4 = tpu.matmul %3, %2, %cst_3 {dimension_numbers = #tpu.dot_dimension_numbers<[1], [0], [0], [1], [0, 0, 1, 1], [], []>} : vector<8x12xf32>, vector<12x512xf32>, vector<8x512xf32> -> vector<8x512xf32>
    %cst_4 = arith.constant dense<0.000000e+00> : vector<8xf32>
    %5 = vector.multi_reduction <add>, %4, %cst_4 [1] : vector<8x512xf32> to vector<8xf32>
    %6 = vector.shape_cast %5 : vector<8xf32> to vector<8x1xf32>
    %cst_5 = arith.constant 5.120000e+02 : f32
    %7 = vector.broadcast %cst_5 : f32 to vector<8x1xf32>
    %8 = arith.divf %6, %7 : vector<8x1xf32>
    %9 = vector.broadcast %8 : vector<8x1xf32> to vector<8x512xf32>
    %10 = arith.subf %4, %9 : vector<8x512xf32>
    %11 = arith.mulf %10, %10 : vector<8x512xf32>
    %cst_6 = arith.constant dense<0.000000e+00> : vector<8xf32>
    %12 = vector.multi_reduction <add>, %11, %cst_6 [1] : vector<8x512xf32> to vector<8xf32>
    %13 = vector.shape_cast %12 : vector<8xf32> to vector<8x1xf32>
    %cst_7 = arith.constant 5.120000e+02 : f32
    %14 = vector.broadcast %cst_7 : f32 to vector<8x1xf32>
    %15 = arith.divf %13, %14 : vector<8x1xf32>
    %16 = vector.broadcast %8 : vector<8x1xf32> to vector<8x512xf32>
    %17 = arith.subf %4, %16 : vector<8x512xf32>
    %cst_8 = arith.constant 9.99999974E-6 : f32
    %18 = vector.broadcast %cst_8 : f32 to vector<8x1xf32>
    %19 = arith.addf %15, %18 : vector<8x1xf32>
    %20 = math.rsqrt %19 : vector<8x1xf32>
    %21 = vector.broadcast %20 : vector<8x1xf32> to vector<8x512xf32>
    %22 = arith.mulf %17, %21 : vector<8x512xf32>
    %c0_9 = arith.constant 0 : index
    %c0_10 = arith.constant 0 : index
    %23 = vector.load %arg3[%c0_9, %c0_10] : memref<8x512xf32, #tpu.memory_space<vmem>>, vector<8x512xf32>
    tpu.vector_store %arg3[%c0_9, %c0_10], %22 {strides = array<i32>} : memref<8x512xf32, #tpu.memory_space<vmem>>, vector<8x512xf32>,
    return
  }
  func.func @transform_0(%arg0: i32) -> (i32, i32) {
    %c0_i32 = arith.constant 0 : i32
    %c0_i32_0 = arith.constant 0 : i32
    %c0_i32_1 = arith.constant 0 : i32
    return %c0_i32, %c0_i32_0 : i32, i32
  }
  func.func @transform_1(%arg0: i32) -> (i32, i32) {
    %c0_i32 = arith.constant 0 : i32
    %c0_i32_0 = arith.constant 0 : i32
    %c0_i32_1 = arith.constant 0 : i32
    return %c0_i32, %c0_i32_0 : i32, i32
  }
  func.func @transform_2(%arg0: i32) -> (i32, i32) {
    %c0_i32 = arith.constant 0 : i32
    %c0_i32_0 = arith.constant 0 : i32
    %c0_i32_1 = arith.constant 0 : i32
    return %c0_i32, %c0_i32_0 : i32, i32
  }
}

module attributes {stable_mosaic.version = 11 : i64} {
  func.func @_edge_kernel(%arg0: i32, %arg1: memref<5xf32, #tpu.memory_space<smem>>, %arg2: memref<72x128xf32, #tpu.memory_space<vmem>>, %arg3: memref<8x128xf32, #tpu.memory_space<vmem>>, %arg4: memref<3x8x72xf32, #tpu.memory_space<vmem>>, %arg5: memref<8x128xf32, #tpu.memory_space<vmem>>) attributes {dimension_semantics = [#tpu.dimension_semantics<arbitrary>], iteration_bounds = array<i64: 1>, scalar_prefetch = 0 : i64, scratch_operands = 0 : i64, tpu.core_type = #tpu.core_type<tc>, window_params = [{transform_indices = @transform_0, window_bounds = array<i64: 5>}, {pipeline_mode = #tpu.pipeline_mode<synchronous>, transform_indices = @transform_1, window_bounds = array<i64: 72, 128>}, {pipeline_mode = #tpu.pipeline_mode<synchronous>, transform_indices = @transform_2, window_bounds = array<i64: 8, 128>}, {pipeline_mode = #tpu.pipeline_mode<synchronous>, transform_indices = @transform_3, window_bounds = array<i64: 3, 8, 72>}, {pipeline_mode = #tpu.pipeline_mode<synchronous>, transform_indices = @transform_4, window_bounds = array<i64: 8, 128>}]} {
    %c0 = arith.constant 0 : index
    %c0_0 = arith.constant 0 : index
    %0 = vector.load %arg2[%c0, %c0_0] : memref<72x128xf32, #tpu.memory_space<vmem>>, vector<72x128xf32>
    %cst = arith.constant 0.000000e+00 : f32
    %1 = vector.broadcast %cst : f32 to vector<72x128xf32>
    %2 = arith.maximumf %0, %1 : vector<72x128xf32>
    %c3 = arith.constant 3 : index
    %3 = memref.load %arg1[%c3] : memref<5xf32, #tpu.memory_space<smem>>
    %c0_1 = arith.constant 0 : index
    %c0_2 = arith.constant 0 : index
    %c0_3 = arith.constant 0 : index
    %4 = vector.load %arg4[%c0_1, %c0_2, %c0_3] : memref<3x8x72xf32, #tpu.memory_space<vmem>>, vector<1x8x72xf32>
    %5 = vector.shape_cast %4 : vector<1x8x72xf32> to vector<8x72xf32>
    %cst_4 = arith.constant dense<0.000000e+00> : vector<8x128xf32>
    %6 = tpu.matmul %5, %2, %cst_4 {dimension_numbers = #tpu.dot_dimension_numbers<[1], [0], [0], [1], [0, 0, 1, 1], [], []>} : vector<8x72xf32>, vector<72x128xf32>, vector<8x128xf32> -> vector<8x128xf32>
    %cst_5 = arith.constant dense<0.000000e+00> : vector<8xf32>
    %7 = vector.multi_reduction <add>, %6, %cst_5 [1] : vector<8x128xf32> to vector<8xf32>
    %8 = vector.shape_cast %7 : vector<8xf32> to vector<8x1xf32>
    %cst_6 = arith.constant 1.280000e+02 : f32
    %9 = vector.broadcast %cst_6 : f32 to vector<8x1xf32>
    %10 = arith.divf %8, %9 : vector<8x1xf32>
    %11 = vector.broadcast %10 : vector<8x1xf32> to vector<8x128xf32>
    %12 = arith.subf %6, %11 : vector<8x128xf32>
    %13 = arith.mulf %12, %12 : vector<8x128xf32>
    %cst_7 = arith.constant dense<0.000000e+00> : vector<8xf32>
    %14 = vector.multi_reduction <add>, %13, %cst_7 [1] : vector<8x128xf32> to vector<8xf32>
    %15 = vector.shape_cast %14 : vector<8xf32> to vector<8x1xf32>
    %cst_8 = arith.constant 1.280000e+02 : f32
    %16 = vector.broadcast %cst_8 : f32 to vector<8x1xf32>
    %17 = arith.divf %15, %16 : vector<8x1xf32>
    %18 = vector.broadcast %10 : vector<8x1xf32> to vector<8x128xf32>
    %19 = arith.subf %6, %18 : vector<8x128xf32>
    %cst_9 = arith.constant 9.99999974E-6 : f32
    %20 = vector.broadcast %cst_9 : f32 to vector<8x1xf32>
    %21 = arith.addf %17, %20 : vector<8x1xf32>
    %22 = math.rsqrt %21 : vector<8x1xf32>
    %23 = vector.broadcast %22 : vector<8x1xf32> to vector<8x128xf32>
    %24 = arith.mulf %19, %23 : vector<8x128xf32>
    %25 = vector.broadcast %3 : f32 to vector<8x128xf32>
    %26 = arith.mulf %25, %24 : vector<8x128xf32>
    %c2 = arith.constant 2 : index
    %27 = memref.load %arg1[%c2] : memref<5xf32, #tpu.memory_space<smem>>
    %c1 = arith.constant 1 : index
    %c0_10 = arith.constant 0 : index
    %c0_11 = arith.constant 0 : index
    %28 = vector.load %arg4[%c1, %c0_10, %c0_11] : memref<3x8x72xf32, #tpu.memory_space<vmem>>, vector<1x8x72xf32>
    %29 = vector.shape_cast %28 : vector<1x8x72xf32> to vector<8x72xf32>
    %cst_12 = arith.constant dense<0.000000e+00> : vector<8x128xf32>
    %30 = tpu.matmul %29, %2, %cst_12 {dimension_numbers = #tpu.dot_dimension_numbers<[1], [0], [0], [1], [0, 0, 1, 1], [], []>} : vector<8x72xf32>, vector<72x128xf32>, vector<8x128xf32> -> vector<8x128xf32>
    %cst_13 = arith.constant dense<0.000000e+00> : vector<8xf32>
    %31 = vector.multi_reduction <add>, %30, %cst_13 [1] : vector<8x128xf32> to vector<8xf32>
    %32 = vector.shape_cast %31 : vector<8xf32> to vector<8x1xf32>
    %cst_14 = arith.constant 1.280000e+02 : f32
    %33 = vector.broadcast %cst_14 : f32 to vector<8x1xf32>
    %34 = arith.divf %32, %33 : vector<8x1xf32>
    %35 = vector.broadcast %34 : vector<8x1xf32> to vector<8x128xf32>
    %36 = arith.subf %30, %35 : vector<8x128xf32>
    %37 = arith.mulf %36, %36 : vector<8x128xf32>
    %cst_15 = arith.constant dense<0.000000e+00> : vector<8xf32>
    %38 = vector.multi_reduction <add>, %37, %cst_15 [1] : vector<8x128xf32> to vector<8xf32>
    %39 = vector.shape_cast %38 : vector<8xf32> to vector<8x1xf32>
    %cst_16 = arith.constant 1.280000e+02 : f32
    %40 = vector.broadcast %cst_16 : f32 to vector<8x1xf32>
    %41 = arith.divf %39, %40 : vector<8x1xf32>
    %42 = vector.broadcast %34 : vector<8x1xf32> to vector<8x128xf32>
    %43 = arith.subf %30, %42 : vector<8x128xf32>
    %cst_17 = arith.constant 9.99999974E-6 : f32
    %44 = vector.broadcast %cst_17 : f32 to vector<8x1xf32>
    %45 = arith.addf %41, %44 : vector<8x1xf32>
    %46 = math.rsqrt %45 : vector<8x1xf32>
    %47 = vector.broadcast %46 : vector<8x1xf32> to vector<8x128xf32>
    %48 = arith.mulf %43, %47 : vector<8x128xf32>
    %49 = vector.broadcast %27 : f32 to vector<8x128xf32>
    %50 = arith.mulf %49, %48 : vector<8x128xf32>
    %51 = arith.addf %26, %50 : vector<8x128xf32>
    %c1_18 = arith.constant 1 : index
    %52 = memref.load %arg1[%c1_18] : memref<5xf32, #tpu.memory_space<smem>>
    %c2_19 = arith.constant 2 : index
    %c0_20 = arith.constant 0 : index
    %c0_21 = arith.constant 0 : index
    %53 = vector.load %arg4[%c2_19, %c0_20, %c0_21] : memref<3x8x72xf32, #tpu.memory_space<vmem>>, vector<1x8x72xf32>
    %54 = vector.shape_cast %53 : vector<1x8x72xf32> to vector<8x72xf32>
    %cst_22 = arith.constant dense<0.000000e+00> : vector<8x128xf32>
    %55 = tpu.matmul %54, %2, %cst_22 {dimension_numbers = #tpu.dot_dimension_numbers<[1], [0], [0], [1], [0, 0, 1, 1], [], []>} : vector<8x72xf32>, vector<72x128xf32>, vector<8x128xf32> -> vector<8x128xf32>
    %cst_23 = arith.constant dense<0.000000e+00> : vector<8xf32>
    %56 = vector.multi_reduction <add>, %55, %cst_23 [1] : vector<8x128xf32> to vector<8xf32>
    %57 = vector.shape_cast %56 : vector<8xf32> to vector<8x1xf32>
    %cst_24 = arith.constant 1.280000e+02 : f32
    %58 = vector.broadcast %cst_24 : f32 to vector<8x1xf32>
    %59 = arith.divf %57, %58 : vector<8x1xf32>
    %60 = vector.broadcast %59 : vector<8x1xf32> to vector<8x128xf32>
    %61 = arith.subf %55, %60 : vector<8x128xf32>
    %62 = arith.mulf %61, %61 : vector<8x128xf32>
    %cst_25 = arith.constant dense<0.000000e+00> : vector<8xf32>
    %63 = vector.multi_reduction <add>, %62, %cst_25 [1] : vector<8x128xf32> to vector<8xf32>
    %64 = vector.shape_cast %63 : vector<8xf32> to vector<8x1xf32>
    %cst_26 = arith.constant 1.280000e+02 : f32
    %65 = vector.broadcast %cst_26 : f32 to vector<8x1xf32>
    %66 = arith.divf %64, %65 : vector<8x1xf32>
    %67 = vector.broadcast %59 : vector<8x1xf32> to vector<8x128xf32>
    %68 = arith.subf %55, %67 : vector<8x128xf32>
    %cst_27 = arith.constant 9.99999974E-6 : f32
    %69 = vector.broadcast %cst_27 : f32 to vector<8x1xf32>
    %70 = arith.addf %66, %69 : vector<8x1xf32>
    %71 = math.rsqrt %70 : vector<8x1xf32>
    %72 = vector.broadcast %71 : vector<8x1xf32> to vector<8x128xf32>
    %73 = arith.mulf %68, %72 : vector<8x128xf32>
    %74 = vector.broadcast %52 : f32 to vector<8x128xf32>
    %75 = arith.mulf %74, %73 : vector<8x128xf32>
    %76 = arith.addf %51, %75 : vector<8x128xf32>
    %c4 = arith.constant 4 : index
    %77 = memref.load %arg1[%c4] : memref<5xf32, #tpu.memory_space<smem>>
    %c0_28 = arith.constant 0 : index
    %c0_29 = arith.constant 0 : index
    %78 = vector.load %arg3[%c0_28, %c0_29] : memref<8x128xf32, #tpu.memory_space<vmem>>, vector<8x128xf32>
    %79 = vector.broadcast %77 : f32 to vector<8x128xf32>
    %80 = arith.mulf %79, %78 : vector<8x128xf32>
    %81 = arith.addf %76, %80 : vector<8x128xf32>
    %c0_30 = arith.constant 0 : index
    %c0_31 = arith.constant 0 : index
    %82 = vector.load %arg5[%c0_30, %c0_31] : memref<8x128xf32, #tpu.memory_space<vmem>>, vector<8x128xf32>
    tpu.vector_store %arg5[%c0_30, %c0_31], %81 {strides = array<i32>} : memref<8x128xf32, #tpu.memory_space<vmem>>, vector<8x128xf32>,
    return
  }
  func.func @transform_0(%arg0: i32) -> i32 {
    %c0_i32 = arith.constant 0 : i32
    %c0_i32_0 = arith.constant 0 : i32
    return %c0_i32 : i32
  }
  func.func @transform_1(%arg0: i32) -> (i32, i32) {
    %c0_i32 = arith.constant 0 : i32
    %c0_i32_0 = arith.constant 0 : i32
    %c0_i32_1 = arith.constant 0 : i32
    return %c0_i32, %c0_i32_0 : i32, i32
  }
  func.func @transform_2(%arg0: i32) -> (i32, i32) {
    %c0_i32 = arith.constant 0 : i32
    %c0_i32_0 = arith.constant 0 : i32
    %c0_i32_1 = arith.constant 0 : i32
    return %c0_i32, %c0_i32_0 : i32, i32
  }
  func.func @transform_3(%arg0: i32) -> (i32, i32, i32) {
    %c0_i32 = arith.constant 0 : i32
    %c0_i32_0 = arith.constant 0 : i32
    %c0_i32_1 = arith.constant 0 : i32
    %c0_i32_2 = arith.constant 0 : i32
    return %c0_i32, %c0_i32_0, %c0_i32_1 : i32, i32, i32
  }
  func.func @transform_4(%arg0: i32) -> (i32, i32) {
    %c0_i32 = arith.constant 0 : i32
    %c0_i32_0 = arith.constant 0 : i32
    %c0_i32_1 = arith.constant 0 : i32
    return %c0_i32, %c0_i32_0 : i32, i32
  }
}

module attributes {stable_mosaic.version = 11 : i64} {
  func.func @_edge_kernel(%arg0: i32, %arg1: memref<5xf32, #tpu.memory_space<smem>>, %arg2: memref<72x128xf32, #tpu.memory_space<vmem>>, %arg3: memref<8x128xf32, #tpu.memory_space<vmem>>, %arg4: memref<2x8x72xf32, #tpu.memory_space<vmem>>, %arg5: memref<8x128xf32, #tpu.memory_space<vmem>>, %arg6: memref<8x128xf32, #tpu.memory_space<vmem>>) attributes {dimension_semantics = [#tpu.dimension_semantics<arbitrary>], iteration_bounds = array<i64: 1>, scalar_prefetch = 0 : i64, scratch_operands = 0 : i64, tpu.core_type = #tpu.core_type<tc>, window_params = [{transform_indices = @transform_0, window_bounds = array<i64: 5>}, {pipeline_mode = #tpu.pipeline_mode<synchronous>, transform_indices = @transform_1, window_bounds = array<i64: 72, 128>}, {pipeline_mode = #tpu.pipeline_mode<synchronous>, transform_indices = @transform_2, window_bounds = array<i64: 8, 128>}, {pipeline_mode = #tpu.pipeline_mode<synchronous>, transform_indices = @transform_3, window_bounds = array<i64: 2, 8, 72>}, {pipeline_mode = #tpu.pipeline_mode<synchronous>, transform_indices = @transform_4, window_bounds = array<i64: 8, 128>}, {pipeline_mode = #tpu.pipeline_mode<synchronous>, transform_indices = @transform_5, window_bounds = array<i64: 8, 128>}]} {
    %c0 = arith.constant 0 : index
    %c0_0 = arith.constant 0 : index
    %0 = vector.load %arg2[%c0, %c0_0] : memref<72x128xf32, #tpu.memory_space<vmem>>, vector<72x128xf32>
    %cst = arith.constant 0.000000e+00 : f32
    %1 = vector.broadcast %cst : f32 to vector<72x128xf32>
    %2 = arith.maximumf %0, %1 : vector<72x128xf32>
    %c3 = arith.constant 3 : index
    %3 = memref.load %arg1[%c3] : memref<5xf32, #tpu.memory_space<smem>>
    %c0_1 = arith.constant 0 : index
    %c0_2 = arith.constant 0 : index
    %c0_3 = arith.constant 0 : index
    %4 = vector.load %arg4[%c0_1, %c0_2, %c0_3] : memref<2x8x72xf32, #tpu.memory_space<vmem>>, vector<1x8x72xf32>
    %5 = vector.shape_cast %4 : vector<1x8x72xf32> to vector<8x72xf32>
    %cst_4 = arith.constant dense<0.000000e+00> : vector<8x128xf32>
    %6 = tpu.matmul %5, %2, %cst_4 {dimension_numbers = #tpu.dot_dimension_numbers<[1], [0], [0], [1], [0, 0, 1, 1], [], []>} : vector<8x72xf32>, vector<72x128xf32>, vector<8x128xf32> -> vector<8x128xf32>
    %cst_5 = arith.constant dense<0.000000e+00> : vector<8xf32>
    %7 = vector.multi_reduction <add>, %6, %cst_5 [1] : vector<8x128xf32> to vector<8xf32>
    %8 = vector.shape_cast %7 : vector<8xf32> to vector<8x1xf32>
    %cst_6 = arith.constant 1.280000e+02 : f32
    %9 = vector.broadcast %cst_6 : f32 to vector<8x1xf32>
    %10 = arith.divf %8, %9 : vector<8x1xf32>
    %11 = vector.broadcast %10 : vector<8x1xf32> to vector<8x128xf32>
    %12 = arith.subf %6, %11 : vector<8x128xf32>
    %13 = arith.mulf %12, %12 : vector<8x128xf32>
    %cst_7 = arith.constant dense<0.000000e+00> : vector<8xf32>
    %14 = vector.multi_reduction <add>, %13, %cst_7 [1] : vector<8x128xf32> to vector<8xf32>
    %15 = vector.shape_cast %14 : vector<8xf32> to vector<8x1xf32>
    %cst_8 = arith.constant 1.280000e+02 : f32
    %16 = vector.broadcast %cst_8 : f32 to vector<8x1xf32>
    %17 = arith.divf %15, %16 : vector<8x1xf32>
    %18 = vector.broadcast %10 : vector<8x1xf32> to vector<8x128xf32>
    %19 = arith.subf %6, %18 : vector<8x128xf32>
    %cst_9 = arith.constant 9.99999974E-6 : f32
    %20 = vector.broadcast %cst_9 : f32 to vector<8x1xf32>
    %21 = arith.addf %17, %20 : vector<8x1xf32>
    %22 = math.rsqrt %21 : vector<8x1xf32>
    %23 = vector.broadcast %22 : vector<8x1xf32> to vector<8x128xf32>
    %24 = arith.mulf %19, %23 : vector<8x128xf32>
    %25 = vector.broadcast %3 : f32 to vector<8x128xf32>
    %26 = arith.mulf %25, %24 : vector<8x128xf32>
    %c2 = arith.constant 2 : index
    %27 = memref.load %arg1[%c2] : memref<5xf32, #tpu.memory_space<smem>>
    %c1 = arith.constant 1 : index
    %c0_10 = arith.constant 0 : index
    %c0_11 = arith.constant 0 : index
    %28 = vector.load %arg4[%c1, %c0_10, %c0_11] : memref<2x8x72xf32, #tpu.memory_space<vmem>>, vector<1x8x72xf32>
    %29 = vector.shape_cast %28 : vector<1x8x72xf32> to vector<8x72xf32>
    %cst_12 = arith.constant dense<0.000000e+00> : vector<8x128xf32>
    %30 = tpu.matmul %29, %2, %cst_12 {dimension_numbers = #tpu.dot_dimension_numbers<[1], [0], [0], [1], [0, 0, 1, 1], [], []>} : vector<8x72xf32>, vector<72x128xf32>, vector<8x128xf32> -> vector<8x128xf32>
    %cst_13 = arith.constant dense<0.000000e+00> : vector<8xf32>
    %31 = vector.multi_reduction <add>, %30, %cst_13 [1] : vector<8x128xf32> to vector<8xf32>
    %32 = vector.shape_cast %31 : vector<8xf32> to vector<8x1xf32>
    %cst_14 = arith.constant 1.280000e+02 : f32
    %33 = vector.broadcast %cst_14 : f32 to vector<8x1xf32>
    %34 = arith.divf %32, %33 : vector<8x1xf32>
    %35 = vector.broadcast %34 : vector<8x1xf32> to vector<8x128xf32>
    %36 = arith.subf %30, %35 : vector<8x128xf32>
    %37 = arith.mulf %36, %36 : vector<8x128xf32>
    %cst_15 = arith.constant dense<0.000000e+00> : vector<8xf32>
    %38 = vector.multi_reduction <add>, %37, %cst_15 [1] : vector<8x128xf32> to vector<8xf32>
    %39 = vector.shape_cast %38 : vector<8xf32> to vector<8x1xf32>
    %cst_16 = arith.constant 1.280000e+02 : f32
    %40 = vector.broadcast %cst_16 : f32 to vector<8x1xf32>
    %41 = arith.divf %39, %40 : vector<8x1xf32>
    %42 = vector.broadcast %34 : vector<8x1xf32> to vector<8x128xf32>
    %43 = arith.subf %30, %42 : vector<8x128xf32>
    %cst_17 = arith.constant 9.99999974E-6 : f32
    %44 = vector.broadcast %cst_17 : f32 to vector<8x1xf32>
    %45 = arith.addf %41, %44 : vector<8x1xf32>
    %46 = math.rsqrt %45 : vector<8x1xf32>
    %47 = vector.broadcast %46 : vector<8x1xf32> to vector<8x128xf32>
    %48 = arith.mulf %43, %47 : vector<8x128xf32>
    %49 = vector.broadcast %27 : f32 to vector<8x128xf32>
    %50 = arith.mulf %49, %48 : vector<8x128xf32>
    %51 = arith.addf %26, %50 : vector<8x128xf32>
    %c1_18 = arith.constant 1 : index
    %52 = memref.load %arg1[%c1_18] : memref<5xf32, #tpu.memory_space<smem>>
    %c0_19 = arith.constant 0 : index
    %c0_20 = arith.constant 0 : index
    %53 = vector.load %arg5[%c0_19, %c0_20] : memref<8x128xf32, #tpu.memory_space<vmem>>, vector<8x128xf32>
    %54 = vector.broadcast %52 : f32 to vector<8x128xf32>
    %55 = arith.mulf %54, %53 : vector<8x128xf32>
    %56 = arith.addf %51, %55 : vector<8x128xf32>
    %c4 = arith.constant 4 : index
    %57 = memref.load %arg1[%c4] : memref<5xf32, #tpu.memory_space<smem>>
    %c0_21 = arith.constant 0 : index
    %c0_22 = arith.constant 0 : index
    %58 = vector.load %arg3[%c0_21, %c0_22] : memref<8x128xf32, #tpu.memory_space<vmem>>, vector<8x128xf32>
    %59 = vector.broadcast %57 : f32 to vector<8x128xf32>
    %60 = arith.mulf %59, %58 : vector<8x128xf32>
    %61 = arith.addf %56, %60 : vector<8x128xf32>
    %c0_23 = arith.constant 0 : index
    %c0_24 = arith.constant 0 : index
    %62 = vector.load %arg6[%c0_23, %c0_24] : memref<8x128xf32, #tpu.memory_space<vmem>>, vector<8x128xf32>
    tpu.vector_store %arg6[%c0_23, %c0_24], %61 {strides = array<i32>} : memref<8x128xf32, #tpu.memory_space<vmem>>, vector<8x128xf32>,
    return
  }
  func.func @transform_0(%arg0: i32) -> i32 {
    %c0_i32 = arith.constant 0 : i32
    %c0_i32_0 = arith.constant 0 : i32
    return %c0_i32 : i32
  }
  func.func @transform_1(%arg0: i32) -> (i32, i32) {
    %c0_i32 = arith.constant 0 : i32
    %c0_i32_0 = arith.constant 0 : i32
    %c0_i32_1 = arith.constant 0 : i32
    return %c0_i32, %c0_i32_0 : i32, i32
  }
  func.func @transform_2(%arg0: i32) -> (i32, i32) {
    %c0_i32 = arith.constant 0 : i32
    %c0_i32_0 = arith.constant 0 : i32
    %c0_i32_1 = arith.constant 0 : i32
    return %c0_i32, %c0_i32_0 : i32, i32
  }
  func.func @transform_3(%arg0: i32) -> (i32, i32, i32) {
    %c0_i32 = arith.constant 0 : i32
    %c0_i32_0 = arith.constant 0 : i32
    %c0_i32_1 = arith.constant 0 : i32
    %c0_i32_2 = arith.constant 0 : i32
    return %c0_i32, %c0_i32_0, %c0_i32_1 : i32, i32, i32
  }
  func.func @transform_4(%arg0: i32) -> (i32, i32) {
    %c0_i32 = arith.constant 0 : i32
    %c0_i32_0 = arith.constant 0 : i32
    %c0_i32_1 = arith.constant 0 : i32
    return %c0_i32, %c0_i32_0 : i32, i32
  }
  func.func @transform_5(%arg0: i32) -> (i32, i32) {
    %c0_i32 = arith.constant 0 : i32
    %c0_i32_0 = arith.constant 0 : i32
    %c0_i32_1 = arith.constant 0 : i32
    return %c0_i32, %c0_i32_0 : i32, i32
  }
}

module attributes {stable_mosaic.version = 11 : i64} {
  func.func @_conv_bn_kernel(%arg0: i32, %arg1: memref<16x128xf32, #tpu.memory_space<vmem>>, %arg2: memref<16x16xf32, #tpu.memory_space<vmem>>, %arg3: memref<16x128xf32, #tpu.memory_space<vmem>>) attributes {dimension_semantics = [#tpu.dimension_semantics<arbitrary>], iteration_bounds = array<i64: 1>, scalar_prefetch = 0 : i64, scratch_operands = 0 : i64, tpu.core_type = #tpu.core_type<tc>, window_params = [{pipeline_mode = #tpu.pipeline_mode<synchronous>, transform_indices = @transform_0, window_bounds = array<i64: 16, 128>}, {pipeline_mode = #tpu.pipeline_mode<synchronous>, transform_indices = @transform_1, window_bounds = array<i64: 16, 16>}, {pipeline_mode = #tpu.pipeline_mode<synchronous>, transform_indices = @transform_2, window_bounds = array<i64: 16, 128>}]} {
    %c0 = arith.constant 0 : index
    %c0_0 = arith.constant 0 : index
    %0 = vector.load %arg1[%c0, %c0_0] : memref<16x128xf32, #tpu.memory_space<vmem>>, vector<16x128xf32>
    %cst = arith.constant 0.000000e+00 : f32
    %1 = vector.broadcast %cst : f32 to vector<16x128xf32>
    %2 = arith.maximumf %0, %1 : vector<16x128xf32>
    %c0_1 = arith.constant 0 : index
    %c0_2 = arith.constant 0 : index
    %3 = vector.load %arg2[%c0_1, %c0_2] : memref<16x16xf32, #tpu.memory_space<vmem>>, vector<16x16xf32>
    %cst_3 = arith.constant dense<0.000000e+00> : vector<16x128xf32>
    %4 = tpu.matmul %3, %2, %cst_3 {dimension_numbers = #tpu.dot_dimension_numbers<[1], [0], [0], [1], [0, 0, 1, 1], [], []>} : vector<16x16xf32>, vector<16x128xf32>, vector<16x128xf32> -> vector<16x128xf32>
    %cst_4 = arith.constant dense<0.000000e+00> : vector<16xf32>
    %5 = vector.multi_reduction <add>, %4, %cst_4 [1] : vector<16x128xf32> to vector<16xf32>
    %6 = vector.shape_cast %5 : vector<16xf32> to vector<16x1xf32>
    %cst_5 = arith.constant 1.280000e+02 : f32
    %7 = vector.broadcast %cst_5 : f32 to vector<16x1xf32>
    %8 = arith.divf %6, %7 : vector<16x1xf32>
    %9 = vector.broadcast %8 : vector<16x1xf32> to vector<16x128xf32>
    %10 = arith.subf %4, %9 : vector<16x128xf32>
    %11 = arith.mulf %10, %10 : vector<16x128xf32>
    %cst_6 = arith.constant dense<0.000000e+00> : vector<16xf32>
    %12 = vector.multi_reduction <add>, %11, %cst_6 [1] : vector<16x128xf32> to vector<16xf32>
    %13 = vector.shape_cast %12 : vector<16xf32> to vector<16x1xf32>
    %cst_7 = arith.constant 1.280000e+02 : f32
    %14 = vector.broadcast %cst_7 : f32 to vector<16x1xf32>
    %15 = arith.divf %13, %14 : vector<16x1xf32>
    %16 = vector.broadcast %8 : vector<16x1xf32> to vector<16x128xf32>
    %17 = arith.subf %4, %16 : vector<16x128xf32>
    %cst_8 = arith.constant 9.99999974E-6 : f32
    %18 = vector.broadcast %cst_8 : f32 to vector<16x1xf32>
    %19 = arith.addf %15, %18 : vector<16x1xf32>
    %20 = math.rsqrt %19 : vector<16x1xf32>
    %21 = vector.broadcast %20 : vector<16x1xf32> to vector<16x128xf32>
    %22 = arith.mulf %17, %21 : vector<16x128xf32>
    %c0_9 = arith.constant 0 : index
    %c0_10 = arith.constant 0 : index
    %23 = vector.load %arg3[%c0_9, %c0_10] : memref<16x128xf32, #tpu.memory_space<vmem>>, vector<16x128xf32>
    tpu.vector_store %arg3[%c0_9, %c0_10], %22 {strides = array<i32>} : memref<16x128xf32, #tpu.memory_space<vmem>>, vector<16x128xf32>,
    return
  }
  func.func @transform_0(%arg0: i32) -> (i32, i32) {
    %c0_i32 = arith.constant 0 : i32
    %c0_i32_0 = arith.constant 0 : i32
    %c0_i32_1 = arith.constant 0 : i32
    return %c0_i32, %c0_i32_0 : i32, i32
  }
  func.func @transform_1(%arg0: i32) -> (i32, i32) {
    %c0_i32 = arith.constant 0 : i32
    %c0_i32_0 = arith.constant 0 : i32
    %c0_i32_1 = arith.constant 0 : i32
    return %c0_i32, %c0_i32_0 : i32, i32
  }
  func.func @transform_2(%arg0: i32) -> (i32, i32) {
    %c0_i32 = arith.constant 0 : i32
    %c0_i32_0 = arith.constant 0 : i32
    %c0_i32_1 = arith.constant 0 : i32
    return %c0_i32, %c0_i32_0 : i32, i32
  }
}

module attributes {stable_mosaic.version = 11 : i64} {
  func.func @_fact_reduce_kernel(%arg0: i32, %arg1: memref<8x128xf32, #tpu.memory_space<vmem>>, %arg2: memref<8x128xf32, #tpu.memory_space<vmem>>, %arg3: memref<8x8xf32, #tpu.memory_space<vmem>>, %arg4: memref<8x8xf32, #tpu.memory_space<vmem>>, %arg5: memref<16x128xf32, #tpu.memory_space<vmem>>) attributes {dimension_semantics = [#tpu.dimension_semantics<arbitrary>], iteration_bounds = array<i64: 1>, scalar_prefetch = 0 : i64, scratch_operands = 0 : i64, tpu.core_type = #tpu.core_type<tc>, window_params = [{pipeline_mode = #tpu.pipeline_mode<synchronous>, transform_indices = @transform_0, window_bounds = array<i64: 8, 128>}, {pipeline_mode = #tpu.pipeline_mode<synchronous>, transform_indices = @transform_1, window_bounds = array<i64: 8, 128>}, {pipeline_mode = #tpu.pipeline_mode<synchronous>, transform_indices = @transform_2, window_bounds = array<i64: 8, 8>}, {pipeline_mode = #tpu.pipeline_mode<synchronous>, transform_indices = @transform_3, window_bounds = array<i64: 8, 8>}, {pipeline_mode = #tpu.pipeline_mode<synchronous>, transform_indices = @transform_4, window_bounds = array<i64: 16, 128>}]} {
    %c0 = arith.constant 0 : index
    %c0_0 = arith.constant 0 : index
    %0 = vector.load %arg3[%c0, %c0_0] : memref<8x8xf32, #tpu.memory_space<vmem>>, vector<8x8xf32>
    %c0_1 = arith.constant 0 : index
    %c0_2 = arith.constant 0 : index
    %1 = vector.load %arg1[%c0_1, %c0_2] : memref<8x128xf32, #tpu.memory_space<vmem>>, vector<8x128xf32>
    %cst = arith.constant 0.000000e+00 : f32
    %2 = vector.broadcast %cst : f32 to vector<8x128xf32>
    %3 = arith.maximumf %1, %2 : vector<8x128xf32>
    %cst_3 = arith.constant dense<0.000000e+00> : vector<8x128xf32>
    %4 = tpu.matmul %0, %3, %cst_3 {dimension_numbers = #tpu.dot_dimension_numbers<[1], [0], [0], [1], [0, 0, 1, 1], [], []>} : vector<8x8xf32>, vector<8x128xf32>, vector<8x128xf32> -> vector<8x128xf32>
    %c0_4 = arith.constant 0 : index
    %c0_5 = arith.constant 0 : index
    %5 = vector.load %arg4[%c0_4, %c0_5] : memref<8x8xf32, #tpu.memory_space<vmem>>, vector<8x8xf32>
    %c0_6 = arith.constant 0 : index
    %c0_7 = arith.constant 0 : index
    %6 = vector.load %arg2[%c0_6, %c0_7] : memref<8x128xf32, #tpu.memory_space<vmem>>, vector<8x128xf32>
    %cst_8 = arith.constant 0.000000e+00 : f32
    %7 = vector.broadcast %cst_8 : f32 to vector<8x128xf32>
    %8 = arith.maximumf %6, %7 : vector<8x128xf32>
    %cst_9 = arith.constant dense<0.000000e+00> : vector<8x128xf32>
    %9 = tpu.matmul %5, %8, %cst_9 {dimension_numbers = #tpu.dot_dimension_numbers<[1], [0], [0], [1], [0, 0, 1, 1], [], []>} : vector<8x8xf32>, vector<8x128xf32>, vector<8x128xf32> -> vector<8x128xf32>
    %cst_10 = arith.constant dense<0.000000e+00> : vector<8xf32>
    %10 = vector.multi_reduction <add>, %4, %cst_10 [1] : vector<8x128xf32> to vector<8xf32>
    %11 = vector.shape_cast %10 : vector<8xf32> to vector<8x1xf32>
    %cst_11 = arith.constant 1.280000e+02 : f32
    %12 = vector.broadcast %cst_11 : f32 to vector<8x1xf32>
    %13 = arith.divf %11, %12 : vector<8x1xf32>
    %14 = vector.broadcast %13 : vector<8x1xf32> to vector<8x128xf32>
    %15 = arith.subf %4, %14 : vector<8x128xf32>
    %16 = arith.mulf %15, %15 : vector<8x128xf32>
    %cst_12 = arith.constant dense<0.000000e+00> : vector<8xf32>
    %17 = vector.multi_reduction <add>, %16, %cst_12 [1] : vector<8x128xf32> to vector<8xf32>
    %18 = vector.shape_cast %17 : vector<8xf32> to vector<8x1xf32>
    %cst_13 = arith.constant 1.280000e+02 : f32
    %19 = vector.broadcast %cst_13 : f32 to vector<8x1xf32>
    %20 = arith.divf %18, %19 : vector<8x1xf32>
    %21 = vector.broadcast %13 : vector<8x1xf32> to vector<8x128xf32>
    %22 = arith.subf %4, %21 : vector<8x128xf32>
    %cst_14 = arith.constant 9.99999974E-6 : f32
    %23 = vector.broadcast %cst_14 : f32 to vector<8x1xf32>
    %24 = arith.addf %20, %23 : vector<8x1xf32>
    %25 = math.rsqrt %24 : vector<8x1xf32>
    %26 = vector.broadcast %25 : vector<8x1xf32> to vector<8x128xf32>
    %27 = arith.mulf %22, %26 : vector<8x128xf32>
    %c0_15 = arith.constant 0 : index
    %c0_16 = arith.constant 0 : index
    %28 = vector.load %arg5[%c0_15, %c0_16] : memref<16x128xf32, #tpu.memory_space<vmem>>, vector<8x128xf32>
    tpu.vector_store %arg5[%c0_15, %c0_16], %27 {strides = array<i32>} : memref<16x128xf32, #tpu.memory_space<vmem>>, vector<8x128xf32>,
    %cst_17 = arith.constant dense<0.000000e+00> : vector<8xf32>
    %29 = vector.multi_reduction <add>, %9, %cst_17 [1] : vector<8x128xf32> to vector<8xf32>
    %30 = vector.shape_cast %29 : vector<8xf32> to vector<8x1xf32>
    %cst_18 = arith.constant 1.280000e+02 : f32
    %31 = vector.broadcast %cst_18 : f32 to vector<8x1xf32>
    %32 = arith.divf %30, %31 : vector<8x1xf32>
    %33 = vector.broadcast %32 : vector<8x1xf32> to vector<8x128xf32>
    %34 = arith.subf %9, %33 : vector<8x128xf32>
    %35 = arith.mulf %34, %34 : vector<8x128xf32>
    %cst_19 = arith.constant dense<0.000000e+00> : vector<8xf32>
    %36 = vector.multi_reduction <add>, %35, %cst_19 [1] : vector<8x128xf32> to vector<8xf32>
    %37 = vector.shape_cast %36 : vector<8xf32> to vector<8x1xf32>
    %cst_20 = arith.constant 1.280000e+02 : f32
    %38 = vector.broadcast %cst_20 : f32 to vector<8x1xf32>
    %39 = arith.divf %37, %38 : vector<8x1xf32>
    %40 = vector.broadcast %32 : vector<8x1xf32> to vector<8x128xf32>
    %41 = arith.subf %9, %40 : vector<8x128xf32>
    %cst_21 = arith.constant 9.99999974E-6 : f32
    %42 = vector.broadcast %cst_21 : f32 to vector<8x1xf32>
    %43 = arith.addf %39, %42 : vector<8x1xf32>
    %44 = math.rsqrt %43 : vector<8x1xf32>
    %45 = vector.broadcast %44 : vector<8x1xf32> to vector<8x128xf32>
    %46 = arith.mulf %41, %45 : vector<8x128xf32>
    %c8 = arith.constant 8 : index
    %c0_22 = arith.constant 0 : index
    %47 = vector.load %arg5[%c8, %c0_22] : memref<16x128xf32, #tpu.memory_space<vmem>>, vector<8x128xf32>
    tpu.vector_store %arg5[%c8, %c0_22], %46 {strides = array<i32>} : memref<16x128xf32, #tpu.memory_space<vmem>>, vector<8x128xf32>,
    return
  }
  func.func @transform_0(%arg0: i32) -> (i32, i32) {
    %c0_i32 = arith.constant 0 : i32
    %c0_i32_0 = arith.constant 0 : i32
    %c0_i32_1 = arith.constant 0 : i32
    return %c0_i32, %c0_i32_0 : i32, i32
  }
  func.func @transform_1(%arg0: i32) -> (i32, i32) {
    %c0_i32 = arith.constant 0 : i32
    %c0_i32_0 = arith.constant 0 : i32
    %c0_i32_1 = arith.constant 0 : i32
    return %c0_i32, %c0_i32_0 : i32, i32
  }
  func.func @transform_2(%arg0: i32) -> (i32, i32) {
    %c0_i32 = arith.constant 0 : i32
    %c0_i32_0 = arith.constant 0 : i32
    %c0_i32_1 = arith.constant 0 : i32
    return %c0_i32, %c0_i32_0 : i32, i32
  }
  func.func @transform_3(%arg0: i32) -> (i32, i32) {
    %c0_i32 = arith.constant 0 : i32
    %c0_i32_0 = arith.constant 0 : i32
    %c0_i32_1 = arith.constant 0 : i32
    return %c0_i32, %c0_i32_0 : i32, i32
  }
  func.func @transform_4(%arg0: i32) -> (i32, i32) {
    %c0_i32 = arith.constant 0 : i32
    %c0_i32_0 = arith.constant 0 : i32
    %c0_i32_1 = arith.constant 0 : i32
    return %c0_i32, %c0_i32_0 : i32, i32
  }
}

module attributes {stable_mosaic.version = 11 : i64} {
  func.func @_edge_kernel(%arg0: i32, %arg1: memref<5xf32, #tpu.memory_space<smem>>, %arg2: memref<144x32xf32, #tpu.memory_space<vmem>>, %arg3: memref<16x32xf32, #tpu.memory_space<vmem>>, %arg4: memref<3x16x144xf32, #tpu.memory_space<vmem>>, %arg5: memref<16x32xf32, #tpu.memory_space<vmem>>) attributes {dimension_semantics = [#tpu.dimension_semantics<arbitrary>], iteration_bounds = array<i64: 1>, scalar_prefetch = 0 : i64, scratch_operands = 0 : i64, tpu.core_type = #tpu.core_type<tc>, window_params = [{transform_indices = @transform_0, window_bounds = array<i64: 5>}, {pipeline_mode = #tpu.pipeline_mode<synchronous>, transform_indices = @transform_1, window_bounds = array<i64: 144, 32>}, {pipeline_mode = #tpu.pipeline_mode<synchronous>, transform_indices = @transform_2, window_bounds = array<i64: 16, 32>}, {pipeline_mode = #tpu.pipeline_mode<synchronous>, transform_indices = @transform_3, window_bounds = array<i64: 3, 16, 144>}, {pipeline_mode = #tpu.pipeline_mode<synchronous>, transform_indices = @transform_4, window_bounds = array<i64: 16, 32>}]} {
    %c0 = arith.constant 0 : index
    %c0_0 = arith.constant 0 : index
    %0 = vector.load %arg2[%c0, %c0_0] : memref<144x32xf32, #tpu.memory_space<vmem>>, vector<144x32xf32>
    %cst = arith.constant 0.000000e+00 : f32
    %1 = vector.broadcast %cst : f32 to vector<144x32xf32>
    %2 = arith.maximumf %0, %1 : vector<144x32xf32>
    %c3 = arith.constant 3 : index
    %3 = memref.load %arg1[%c3] : memref<5xf32, #tpu.memory_space<smem>>
    %c0_1 = arith.constant 0 : index
    %c0_2 = arith.constant 0 : index
    %c0_3 = arith.constant 0 : index
    %4 = vector.load %arg4[%c0_1, %c0_2, %c0_3] : memref<3x16x144xf32, #tpu.memory_space<vmem>>, vector<1x16x144xf32>
    %5 = vector.shape_cast %4 : vector<1x16x144xf32> to vector<16x144xf32>
    %cst_4 = arith.constant dense<0.000000e+00> : vector<16x32xf32>
    %6 = tpu.matmul %5, %2, %cst_4 {dimension_numbers = #tpu.dot_dimension_numbers<[1], [0], [0], [1], [0, 0, 1, 1], [], []>} : vector<16x144xf32>, vector<144x32xf32>, vector<16x32xf32> -> vector<16x32xf32>
    %cst_5 = arith.constant dense<0.000000e+00> : vector<16xf32>
    %7 = vector.multi_reduction <add>, %6, %cst_5 [1] : vector<16x32xf32> to vector<16xf32>
    %8 = vector.shape_cast %7 : vector<16xf32> to vector<16x1xf32>
    %cst_6 = arith.constant 3.200000e+01 : f32
    %9 = vector.broadcast %cst_6 : f32 to vector<16x1xf32>
    %10 = arith.divf %8, %9 : vector<16x1xf32>
    %11 = vector.broadcast %10 : vector<16x1xf32> to vector<16x32xf32>
    %12 = arith.subf %6, %11 : vector<16x32xf32>
    %13 = arith.mulf %12, %12 : vector<16x32xf32>
    %cst_7 = arith.constant dense<0.000000e+00> : vector<16xf32>
    %14 = vector.multi_reduction <add>, %13, %cst_7 [1] : vector<16x32xf32> to vector<16xf32>
    %15 = vector.shape_cast %14 : vector<16xf32> to vector<16x1xf32>
    %cst_8 = arith.constant 3.200000e+01 : f32
    %16 = vector.broadcast %cst_8 : f32 to vector<16x1xf32>
    %17 = arith.divf %15, %16 : vector<16x1xf32>
    %18 = vector.broadcast %10 : vector<16x1xf32> to vector<16x32xf32>
    %19 = arith.subf %6, %18 : vector<16x32xf32>
    %cst_9 = arith.constant 9.99999974E-6 : f32
    %20 = vector.broadcast %cst_9 : f32 to vector<16x1xf32>
    %21 = arith.addf %17, %20 : vector<16x1xf32>
    %22 = math.rsqrt %21 : vector<16x1xf32>
    %23 = vector.broadcast %22 : vector<16x1xf32> to vector<16x32xf32>
    %24 = arith.mulf %19, %23 : vector<16x32xf32>
    %25 = vector.broadcast %3 : f32 to vector<16x32xf32>
    %26 = arith.mulf %25, %24 : vector<16x32xf32>
    %c2 = arith.constant 2 : index
    %27 = memref.load %arg1[%c2] : memref<5xf32, #tpu.memory_space<smem>>
    %c1 = arith.constant 1 : index
    %c0_10 = arith.constant 0 : index
    %c0_11 = arith.constant 0 : index
    %28 = vector.load %arg4[%c1, %c0_10, %c0_11] : memref<3x16x144xf32, #tpu.memory_space<vmem>>, vector<1x16x144xf32>
    %29 = vector.shape_cast %28 : vector<1x16x144xf32> to vector<16x144xf32>
    %cst_12 = arith.constant dense<0.000000e+00> : vector<16x32xf32>
    %30 = tpu.matmul %29, %2, %cst_12 {dimension_numbers = #tpu.dot_dimension_numbers<[1], [0], [0], [1], [0, 0, 1, 1], [], []>} : vector<16x144xf32>, vector<144x32xf32>, vector<16x32xf32> -> vector<16x32xf32>
    %cst_13 = arith.constant dense<0.000000e+00> : vector<16xf32>
    %31 = vector.multi_reduction <add>, %30, %cst_13 [1] : vector<16x32xf32> to vector<16xf32>
    %32 = vector.shape_cast %31 : vector<16xf32> to vector<16x1xf32>
    %cst_14 = arith.constant 3.200000e+01 : f32
    %33 = vector.broadcast %cst_14 : f32 to vector<16x1xf32>
    %34 = arith.divf %32, %33 : vector<16x1xf32>
    %35 = vector.broadcast %34 : vector<16x1xf32> to vector<16x32xf32>
    %36 = arith.subf %30, %35 : vector<16x32xf32>
    %37 = arith.mulf %36, %36 : vector<16x32xf32>
    %cst_15 = arith.constant dense<0.000000e+00> : vector<16xf32>
    %38 = vector.multi_reduction <add>, %37, %cst_15 [1] : vector<16x32xf32> to vector<16xf32>
    %39 = vector.shape_cast %38 : vector<16xf32> to vector<16x1xf32>
    %cst_16 = arith.constant 3.200000e+01 : f32
    %40 = vector.broadcast %cst_16 : f32 to vector<16x1xf32>
    %41 = arith.divf %39, %40 : vector<16x1xf32>
    %42 = vector.broadcast %34 : vector<16x1xf32> to vector<16x32xf32>
    %43 = arith.subf %30, %42 : vector<16x32xf32>
    %cst_17 = arith.constant 9.99999974E-6 : f32
    %44 = vector.broadcast %cst_17 : f32 to vector<16x1xf32>
    %45 = arith.addf %41, %44 : vector<16x1xf32>
    %46 = math.rsqrt %45 : vector<16x1xf32>
    %47 = vector.broadcast %46 : vector<16x1xf32> to vector<16x32xf32>
    %48 = arith.mulf %43, %47 : vector<16x32xf32>
    %49 = vector.broadcast %27 : f32 to vector<16x32xf32>
    %50 = arith.mulf %49, %48 : vector<16x32xf32>
    %51 = arith.addf %26, %50 : vector<16x32xf32>
    %c1_18 = arith.constant 1 : index
    %52 = memref.load %arg1[%c1_18] : memref<5xf32, #tpu.memory_space<smem>>
    %c2_19 = arith.constant 2 : index
    %c0_20 = arith.constant 0 : index
    %c0_21 = arith.constant 0 : index
    %53 = vector.load %arg4[%c2_19, %c0_20, %c0_21] : memref<3x16x144xf32, #tpu.memory_space<vmem>>, vector<1x16x144xf32>
    %54 = vector.shape_cast %53 : vector<1x16x144xf32> to vector<16x144xf32>
    %cst_22 = arith.constant dense<0.000000e+00> : vector<16x32xf32>
    %55 = tpu.matmul %54, %2, %cst_22 {dimension_numbers = #tpu.dot_dimension_numbers<[1], [0], [0], [1], [0, 0, 1, 1], [], []>} : vector<16x144xf32>, vector<144x32xf32>, vector<16x32xf32> -> vector<16x32xf32>
    %cst_23 = arith.constant dense<0.000000e+00> : vector<16xf32>
    %56 = vector.multi_reduction <add>, %55, %cst_23 [1] : vector<16x32xf32> to vector<16xf32>
    %57 = vector.shape_cast %56 : vector<16xf32> to vector<16x1xf32>
    %cst_24 = arith.constant 3.200000e+01 : f32
    %58 = vector.broadcast %cst_24 : f32 to vector<16x1xf32>
    %59 = arith.divf %57, %58 : vector<16x1xf32>
    %60 = vector.broadcast %59 : vector<16x1xf32> to vector<16x32xf32>
    %61 = arith.subf %55, %60 : vector<16x32xf32>
    %62 = arith.mulf %61, %61 : vector<16x32xf32>
    %cst_25 = arith.constant dense<0.000000e+00> : vector<16xf32>
    %63 = vector.multi_reduction <add>, %62, %cst_25 [1] : vector<16x32xf32> to vector<16xf32>
    %64 = vector.shape_cast %63 : vector<16xf32> to vector<16x1xf32>
    %cst_26 = arith.constant 3.200000e+01 : f32
    %65 = vector.broadcast %cst_26 : f32 to vector<16x1xf32>
    %66 = arith.divf %64, %65 : vector<16x1xf32>
    %67 = vector.broadcast %59 : vector<16x1xf32> to vector<16x32xf32>
    %68 = arith.subf %55, %67 : vector<16x32xf32>
    %cst_27 = arith.constant 9.99999974E-6 : f32
    %69 = vector.broadcast %cst_27 : f32 to vector<16x1xf32>
    %70 = arith.addf %66, %69 : vector<16x1xf32>
    %71 = math.rsqrt %70 : vector<16x1xf32>
    %72 = vector.broadcast %71 : vector<16x1xf32> to vector<16x32xf32>
    %73 = arith.mulf %68, %72 : vector<16x32xf32>
    %74 = vector.broadcast %52 : f32 to vector<16x32xf32>
    %75 = arith.mulf %74, %73 : vector<16x32xf32>
    %76 = arith.addf %51, %75 : vector<16x32xf32>
    %c4 = arith.constant 4 : index
    %77 = memref.load %arg1[%c4] : memref<5xf32, #tpu.memory_space<smem>>
    %c0_28 = arith.constant 0 : index
    %c0_29 = arith.constant 0 : index
    %78 = vector.load %arg3[%c0_28, %c0_29] : memref<16x32xf32, #tpu.memory_space<vmem>>, vector<16x32xf32>
    %79 = vector.broadcast %77 : f32 to vector<16x32xf32>
    %80 = arith.mulf %79, %78 : vector<16x32xf32>
    %81 = arith.addf %76, %80 : vector<16x32xf32>
    %c0_30 = arith.constant 0 : index
    %c0_31 = arith.constant 0 : index
    %82 = vector.load %arg5[%c0_30, %c0_31] : memref<16x32xf32, #tpu.memory_space<vmem>>, vector<16x32xf32>
    tpu.vector_store %arg5[%c0_30, %c0_31], %81 {strides = array<i32>} : memref<16x32xf32, #tpu.memory_space<vmem>>, vector<16x32xf32>,
    return
  }
  func.func @transform_0(%arg0: i32) -> i32 {
    %c0_i32 = arith.constant 0 : i32
    %c0_i32_0 = arith.constant 0 : i32
    return %c0_i32 : i32
  }
  func.func @transform_1(%arg0: i32) -> (i32, i32) {
    %c0_i32 = arith.constant 0 : i32
    %c0_i32_0 = arith.constant 0 : i32
    %c0_i32_1 = arith.constant 0 : i32
    return %c0_i32, %c0_i32_0 : i32, i32
  }
  func.func @transform_2(%arg0: i32) -> (i32, i32) {
    %c0_i32 = arith.constant 0 : i32
    %c0_i32_0 = arith.constant 0 : i32
    %c0_i32_1 = arith.constant 0 : i32
    return %c0_i32, %c0_i32_0 : i32, i32
  }
  func.func @transform_3(%arg0: i32) -> (i32, i32, i32) {
    %c0_i32 = arith.constant 0 : i32
    %c0_i32_0 = arith.constant 0 : i32
    %c0_i32_1 = arith.constant 0 : i32
    %c0_i32_2 = arith.constant 0 : i32
    return %c0_i32, %c0_i32_0, %c0_i32_1 : i32, i32, i32
  }
  func.func @transform_4(%arg0: i32) -> (i32, i32) {
    %c0_i32 = arith.constant 0 : i32
    %c0_i32_0 = arith.constant 0 : i32
    %c0_i32_1 = arith.constant 0 : i32
    return %c0_i32, %c0_i32_0 : i32, i32
  }
}

module attributes {stable_mosaic.version = 11 : i64} {
  func.func @_bn_relu_kernel(%arg0: i32, %arg1: memref<32x32xf32, #tpu.memory_space<vmem>>, %arg2: memref<32x1xf32, #tpu.memory_space<vmem>>, %arg3: memref<32x1xf32, #tpu.memory_space<vmem>>, %arg4: memref<32x32xf32, #tpu.memory_space<vmem>>) attributes {dimension_semantics = [#tpu.dimension_semantics<arbitrary>], iteration_bounds = array<i64: 1>, scalar_prefetch = 0 : i64, scratch_operands = 0 : i64, tpu.core_type = #tpu.core_type<tc>, window_params = [{pipeline_mode = #tpu.pipeline_mode<synchronous>, transform_indices = @transform_0, window_bounds = array<i64: 32, 32>}, {pipeline_mode = #tpu.pipeline_mode<synchronous>, transform_indices = @transform_1, window_bounds = array<i64: 32, 1>}, {pipeline_mode = #tpu.pipeline_mode<synchronous>, transform_indices = @transform_2, window_bounds = array<i64: 32, 1>}, {pipeline_mode = #tpu.pipeline_mode<synchronous>, transform_indices = @transform_3, window_bounds = array<i64: 32, 32>}]} {
    %c0 = arith.constant 0 : index
    %c0_0 = arith.constant 0 : index
    %0 = vector.load %arg1[%c0, %c0_0] : memref<32x32xf32, #tpu.memory_space<vmem>>, vector<32x32xf32>
    %cst = arith.constant dense<0.000000e+00> : vector<32xf32>
    %1 = vector.multi_reduction <add>, %0, %cst [1] : vector<32x32xf32> to vector<32xf32>
    %2 = vector.shape_cast %1 : vector<32xf32> to vector<32x1xf32>
    %cst_1 = arith.constant 3.200000e+01 : f32
    %3 = vector.broadcast %cst_1 : f32 to vector<32x1xf32>
    %4 = arith.divf %2, %3 : vector<32x1xf32>
    %5 = vector.broadcast %4 : vector<32x1xf32> to vector<32x32xf32>
    %6 = arith.subf %0, %5 : vector<32x32xf32>
    %7 = arith.mulf %6, %6 : vector<32x32xf32>
    %cst_2 = arith.constant dense<0.000000e+00> : vector<32xf32>
    %8 = vector.multi_reduction <add>, %7, %cst_2 [1] : vector<32x32xf32> to vector<32xf32>
    %9 = vector.shape_cast %8 : vector<32xf32> to vector<32x1xf32>
    %cst_3 = arith.constant 3.200000e+01 : f32
    %10 = vector.broadcast %cst_3 : f32 to vector<32x1xf32>
    %11 = arith.divf %9, %10 : vector<32x1xf32>
    %12 = vector.broadcast %4 : vector<32x1xf32> to vector<32x32xf32>
    %13 = arith.subf %0, %12 : vector<32x32xf32>
    %cst_4 = arith.constant 9.99999974E-6 : f32
    %14 = vector.broadcast %cst_4 : f32 to vector<32x1xf32>
    %15 = arith.addf %11, %14 : vector<32x1xf32>
    %16 = math.rsqrt %15 : vector<32x1xf32>
    %17 = vector.broadcast %16 : vector<32x1xf32> to vector<32x32xf32>
    %18 = arith.mulf %13, %17 : vector<32x32xf32>
    %c0_5 = arith.constant 0 : index
    %c0_6 = arith.constant 0 : index
    %19 = vector.load %arg2[%c0_5, %c0_6] : memref<32x1xf32, #tpu.memory_space<vmem>>, vector<32x1xf32>
    %20 = vector.broadcast %19 : vector<32x1xf32> to vector<32x32xf32>
    %21 = arith.mulf %18, %20 : vector<32x32xf32>
    %c0_7 = arith.constant 0 : index
    %c0_8 = arith.constant 0 : index
    %22 = vector.load %arg3[%c0_7, %c0_8] : memref<32x1xf32, #tpu.memory_space<vmem>>, vector<32x1xf32>
    %23 = vector.broadcast %22 : vector<32x1xf32> to vector<32x32xf32>
    %24 = arith.addf %21, %23 : vector<32x32xf32>
    %cst_9 = arith.constant 0.000000e+00 : f32
    %25 = vector.broadcast %cst_9 : f32 to vector<32x32xf32>
    %26 = arith.maximumf %24, %25 : vector<32x32xf32>
    %c0_10 = arith.constant 0 : index
    %c0_11 = arith.constant 0 : index
    %27 = vector.load %arg4[%c0_10, %c0_11] : memref<32x32xf32, #tpu.memory_space<vmem>>, vector<32x32xf32>
    tpu.vector_store %arg4[%c0_10, %c0_11], %26 {strides = array<i32>} : memref<32x32xf32, #tpu.memory_space<vmem>>, vector<32x32xf32>,
    return
  }
  func.func @transform_0(%arg0: i32) -> (i32, i32) {
    %c0_i32 = arith.constant 0 : i32
    %c0_i32_0 = arith.constant 0 : i32
    %c0_i32_1 = arith.constant 0 : i32
    return %c0_i32, %c0_i32_0 : i32, i32
  }
  func.func @transform_1(%arg0: i32) -> (i32, i32) {
    %c0_i32 = arith.constant 0 : i32
    %c0_i32_0 = arith.constant 0 : i32
    %c0_i32_1 = arith.constant 0 : i32
    return %c0_i32, %c0_i32_0 : i32, i32
  }
  func.func @transform_2(%arg0: i32) -> (i32, i32) {
    %c0_i32 = arith.constant 0 : i32
    %c0_i32_0 = arith.constant 0 : i32
    %c0_i32_1 = arith.constant 0 : i32
    return %c0_i32, %c0_i32_0 : i32, i32
  }
  func.func @transform_3(%arg0: i32) -> (i32, i32) {
    %c0_i32 = arith.constant 0 : i32
    %c0_i32_0 = arith.constant 0 : i32
    %c0_i32_1 = arith.constant 0 : i32
    return %c0_i32, %c0_i32_0 : i32, i32
  }
}

module attributes {stable_mosaic.version = 11 : i64} {
  func.func @_edge_kernel(%arg0: i32, %arg1: memref<5xf32, #tpu.memory_space<smem>>, %arg2: memref<144x32xf32, #tpu.memory_space<vmem>>, %arg3: memref<16x32xf32, #tpu.memory_space<vmem>>, %arg4: memref<2x16x144xf32, #tpu.memory_space<vmem>>, %arg5: memref<16x32xf32, #tpu.memory_space<vmem>>, %arg6: memref<16x32xf32, #tpu.memory_space<vmem>>) attributes {dimension_semantics = [#tpu.dimension_semantics<arbitrary>], iteration_bounds = array<i64: 1>, scalar_prefetch = 0 : i64, scratch_operands = 0 : i64, tpu.core_type = #tpu.core_type<tc>, window_params = [{transform_indices = @transform_0, window_bounds = array<i64: 5>}, {pipeline_mode = #tpu.pipeline_mode<synchronous>, transform_indices = @transform_1, window_bounds = array<i64: 144, 32>}, {pipeline_mode = #tpu.pipeline_mode<synchronous>, transform_indices = @transform_2, window_bounds = array<i64: 16, 32>}, {pipeline_mode = #tpu.pipeline_mode<synchronous>, transform_indices = @transform_3, window_bounds = array<i64: 2, 16, 144>}, {pipeline_mode = #tpu.pipeline_mode<synchronous>, transform_indices = @transform_4, window_bounds = array<i64: 16, 32>}, {pipeline_mode = #tpu.pipeline_mode<synchronous>, transform_indices = @transform_5, window_bounds = array<i64: 16, 32>}]} {
    %c0 = arith.constant 0 : index
    %c0_0 = arith.constant 0 : index
    %0 = vector.load %arg2[%c0, %c0_0] : memref<144x32xf32, #tpu.memory_space<vmem>>, vector<144x32xf32>
    %cst = arith.constant 0.000000e+00 : f32
    %1 = vector.broadcast %cst : f32 to vector<144x32xf32>
    %2 = arith.maximumf %0, %1 : vector<144x32xf32>
    %c3 = arith.constant 3 : index
    %3 = memref.load %arg1[%c3] : memref<5xf32, #tpu.memory_space<smem>>
    %c0_1 = arith.constant 0 : index
    %c0_2 = arith.constant 0 : index
    %c0_3 = arith.constant 0 : index
    %4 = vector.load %arg4[%c0_1, %c0_2, %c0_3] : memref<2x16x144xf32, #tpu.memory_space<vmem>>, vector<1x16x144xf32>
    %5 = vector.shape_cast %4 : vector<1x16x144xf32> to vector<16x144xf32>
    %cst_4 = arith.constant dense<0.000000e+00> : vector<16x32xf32>
    %6 = tpu.matmul %5, %2, %cst_4 {dimension_numbers = #tpu.dot_dimension_numbers<[1], [0], [0], [1], [0, 0, 1, 1], [], []>} : vector<16x144xf32>, vector<144x32xf32>, vector<16x32xf32> -> vector<16x32xf32>
    %cst_5 = arith.constant dense<0.000000e+00> : vector<16xf32>
    %7 = vector.multi_reduction <add>, %6, %cst_5 [1] : vector<16x32xf32> to vector<16xf32>
    %8 = vector.shape_cast %7 : vector<16xf32> to vector<16x1xf32>
    %cst_6 = arith.constant 3.200000e+01 : f32
    %9 = vector.broadcast %cst_6 : f32 to vector<16x1xf32>
    %10 = arith.divf %8, %9 : vector<16x1xf32>
    %11 = vector.broadcast %10 : vector<16x1xf32> to vector<16x32xf32>
    %12 = arith.subf %6, %11 : vector<16x32xf32>
    %13 = arith.mulf %12, %12 : vector<16x32xf32>
    %cst_7 = arith.constant dense<0.000000e+00> : vector<16xf32>
    %14 = vector.multi_reduction <add>, %13, %cst_7 [1] : vector<16x32xf32> to vector<16xf32>
    %15 = vector.shape_cast %14 : vector<16xf32> to vector<16x1xf32>
    %cst_8 = arith.constant 3.200000e+01 : f32
    %16 = vector.broadcast %cst_8 : f32 to vector<16x1xf32>
    %17 = arith.divf %15, %16 : vector<16x1xf32>
    %18 = vector.broadcast %10 : vector<16x1xf32> to vector<16x32xf32>
    %19 = arith.subf %6, %18 : vector<16x32xf32>
    %cst_9 = arith.constant 9.99999974E-6 : f32
    %20 = vector.broadcast %cst_9 : f32 to vector<16x1xf32>
    %21 = arith.addf %17, %20 : vector<16x1xf32>
    %22 = math.rsqrt %21 : vector<16x1xf32>
    %23 = vector.broadcast %22 : vector<16x1xf32> to vector<16x32xf32>
    %24 = arith.mulf %19, %23 : vector<16x32xf32>
    %25 = vector.broadcast %3 : f32 to vector<16x32xf32>
    %26 = arith.mulf %25, %24 : vector<16x32xf32>
    %c2 = arith.constant 2 : index
    %27 = memref.load %arg1[%c2] : memref<5xf32, #tpu.memory_space<smem>>
    %c1 = arith.constant 1 : index
    %c0_10 = arith.constant 0 : index
    %c0_11 = arith.constant 0 : index
    %28 = vector.load %arg4[%c1, %c0_10, %c0_11] : memref<2x16x144xf32, #tpu.memory_space<vmem>>, vector<1x16x144xf32>
    %29 = vector.shape_cast %28 : vector<1x16x144xf32> to vector<16x144xf32>
    %cst_12 = arith.constant dense<0.000000e+00> : vector<16x32xf32>
    %30 = tpu.matmul %29, %2, %cst_12 {dimension_numbers = #tpu.dot_dimension_numbers<[1], [0], [0], [1], [0, 0, 1, 1], [], []>} : vector<16x144xf32>, vector<144x32xf32>, vector<16x32xf32> -> vector<16x32xf32>
    %cst_13 = arith.constant dense<0.000000e+00> : vector<16xf32>
    %31 = vector.multi_reduction <add>, %30, %cst_13 [1] : vector<16x32xf32> to vector<16xf32>
    %32 = vector.shape_cast %31 : vector<16xf32> to vector<16x1xf32>
    %cst_14 = arith.constant 3.200000e+01 : f32
    %33 = vector.broadcast %cst_14 : f32 to vector<16x1xf32>
    %34 = arith.divf %32, %33 : vector<16x1xf32>
    %35 = vector.broadcast %34 : vector<16x1xf32> to vector<16x32xf32>
    %36 = arith.subf %30, %35 : vector<16x32xf32>
    %37 = arith.mulf %36, %36 : vector<16x32xf32>
    %cst_15 = arith.constant dense<0.000000e+00> : vector<16xf32>
    %38 = vector.multi_reduction <add>, %37, %cst_15 [1] : vector<16x32xf32> to vector<16xf32>
    %39 = vector.shape_cast %38 : vector<16xf32> to vector<16x1xf32>
    %cst_16 = arith.constant 3.200000e+01 : f32
    %40 = vector.broadcast %cst_16 : f32 to vector<16x1xf32>
    %41 = arith.divf %39, %40 : vector<16x1xf32>
    %42 = vector.broadcast %34 : vector<16x1xf32> to vector<16x32xf32>
    %43 = arith.subf %30, %42 : vector<16x32xf32>
    %cst_17 = arith.constant 9.99999974E-6 : f32
    %44 = vector.broadcast %cst_17 : f32 to vector<16x1xf32>
    %45 = arith.addf %41, %44 : vector<16x1xf32>
    %46 = math.rsqrt %45 : vector<16x1xf32>
    %47 = vector.broadcast %46 : vector<16x1xf32> to vector<16x32xf32>
    %48 = arith.mulf %43, %47 : vector<16x32xf32>
    %49 = vector.broadcast %27 : f32 to vector<16x32xf32>
    %50 = arith.mulf %49, %48 : vector<16x32xf32>
    %51 = arith.addf %26, %50 : vector<16x32xf32>
    %c1_18 = arith.constant 1 : index
    %52 = memref.load %arg1[%c1_18] : memref<5xf32, #tpu.memory_space<smem>>
    %c0_19 = arith.constant 0 : index
    %c0_20 = arith.constant 0 : index
    %53 = vector.load %arg5[%c0_19, %c0_20] : memref<16x32xf32, #tpu.memory_space<vmem>>, vector<16x32xf32>
    %54 = vector.broadcast %52 : f32 to vector<16x32xf32>
    %55 = arith.mulf %54, %53 : vector<16x32xf32>
    %56 = arith.addf %51, %55 : vector<16x32xf32>
    %c4 = arith.constant 4 : index
    %57 = memref.load %arg1[%c4] : memref<5xf32, #tpu.memory_space<smem>>
    %c0_21 = arith.constant 0 : index
    %c0_22 = arith.constant 0 : index
    %58 = vector.load %arg3[%c0_21, %c0_22] : memref<16x32xf32, #tpu.memory_space<vmem>>, vector<16x32xf32>
    %59 = vector.broadcast %57 : f32 to vector<16x32xf32>
    %60 = arith.mulf %59, %58 : vector<16x32xf32>
    %61 = arith.addf %56, %60 : vector<16x32xf32>
    %c0_23 = arith.constant 0 : index
    %c0_24 = arith.constant 0 : index
    %62 = vector.load %arg6[%c0_23, %c0_24] : memref<16x32xf32, #tpu.memory_space<vmem>>, vector<16x32xf32>
    tpu.vector_store %arg6[%c0_23, %c0_24], %61 {strides = array<i32>} : memref<16x32xf32, #tpu.memory_space<vmem>>, vector<16x32xf32>,
    return
  }
  func.func @transform_0(%arg0: i32) -> i32 {
    %c0_i32 = arith.constant 0 : i32
    %c0_i32_0 = arith.constant 0 : i32
    return %c0_i32 : i32
  }
  func.func @transform_1(%arg0: i32) -> (i32, i32) {
    %c0_i32 = arith.constant 0 : i32
    %c0_i32_0 = arith.constant 0 : i32
    %c0_i32_1 = arith.constant 0 : i32
    return %c0_i32, %c0_i32_0 : i32, i32
  }
  func.func @transform_2(%arg0: i32) -> (i32, i32) {
    %c0_i32 = arith.constant 0 : i32
    %c0_i32_0 = arith.constant 0 : i32
    %c0_i32_1 = arith.constant 0 : i32
    return %c0_i32, %c0_i32_0 : i32, i32
  }
  func.func @transform_3(%arg0: i32) -> (i32, i32, i32) {
    %c0_i32 = arith.constant 0 : i32
    %c0_i32_0 = arith.constant 0 : i32
    %c0_i32_1 = arith.constant 0 : i32
    %c0_i32_2 = arith.constant 0 : i32
    return %c0_i32, %c0_i32_0, %c0_i32_1 : i32, i32, i32
  }
  func.func @transform_4(%arg0: i32) -> (i32, i32) {
    %c0_i32 = arith.constant 0 : i32
    %c0_i32_0 = arith.constant 0 : i32
    %c0_i32_1 = arith.constant 0 : i32
    return %c0_i32, %c0_i32_0 : i32, i32
  }
  func.func @transform_5(%arg0: i32) -> (i32, i32) {
    %c0_i32 = arith.constant 0 : i32
    %c0_i32_0 = arith.constant 0 : i32
    %c0_i32_1 = arith.constant 0 : i32
    return %c0_i32, %c0_i32_0 : i32, i32
  }
}

</mosaic_0001>

<bundles_post_ra>
// kernel: _lambda_.25
= control target key start
LH: loop header
LB: loop body
LE: loop exit
PB: predicated region body
PF: predicated region fallthrough
CT: control target
= control target key end

     0   :  { %vm32_vm0 = vcmask 1043456   ;;  %v258_v2 = vmov 0.0   ;;  %vm259_vm1 = vmmov 1   ;;  %vm28_vm3 = vcmask 97280   ;;  %s329_s0 = inlined_call_operand.vmem [shape: f32[12,512], index: 0, kind: input, shape index: {}]   ;;  %s330_s1 = inlined_call_operand.vmem [shape: f32[4,12], index: 1, kind: input, shape index: {}]   ;;  %s331_s2 = inlined_call_operand.vmem [shape: f32[4,512], index: 2, kind: output, shape index: {}]  }
   0x1   :  { %v12_v0 = vld [vmem:[%s329_s0 + $0x8] sm:$0xff]  ;;  %109 = vmatprep.mubr.f32.mxu0 %v258_v2  ;;  %180 = vmatprep.mubr.f32.mxu1 %v258_v2  ;;  %v11_v5 = vld [vmem:[%s329_s0] sm:$0xff]  ;;  %v14_v7 = vld [vmem:[%s329_s0 + $0x18] sm:$0xff] }
   0x2   :  { %v16_v1 = vld [vmem:[%s329_s0 + $0x28] sm:$0xf]  ;;  %v20_v3 = vmax.f32 %v12_v0, 0.0  ;;  %v15_v6 = vld [vmem:[%s329_s0 + $0x20] sm:$0xf]  ;;  %vm291_vm2 = vmpackc.low %vm32_vm0, %vm259_vm1  ;;  %v19_v9 = vmax.f32 %v11_v5, 0.0 }
   0x3   :  { %v24_v4 = vmax.f32 %v16_v1, 0.0  ;;  %v23_v10 = vmax.f32 %v15_v6, 0.0  ;;  %v18_v11 = vld [vmem:[%s329_s0 + $0x38] sm:$0xf]  ;;  %v22_v12 = vmax.f32 %v14_v7, 0.0  ;;  %v13_v13 = vld [vmem:[%s329_s0 + $0x10] sm:$0xff] }
   0x4   :  { %v26_v15 = vmax.f32 %v18_v11, 0.0  ;;  %v17_v16 = vld [vmem:[%s329_s0 + $0x30] sm:$0xf]  ;;  %v21_v17 = vmax.f32 %v13_v13, 0.0  ;;  %v27_v22 = vld [vmem:[%s330_s1] sm:$0xf] }
   0x5   :  { %v242_v14 = vpack.c.bf16 %v24_v4, %v20_v3  ;;  %v245_v18 = vpack.c.bf16 %v23_v10, %v19_v9  ;;  %v25_v19 = vmax.f32 %v17_v16, 0.0 }
   0x6   :  { %v248_v20 = vpack.c.bf16 %v26_v15, %v22_v12 }
   0x7   :  { %244 = vmatprep.subr.msk.bf16.mxu0 %vm291_vm2, %v242_v14  ;;  %v251_v21 = vpack.c.bf16 %v25_v19, %v21_v17 }
   0x8   :  { %247 = vmatpush1.bf16.msk.msra.mxu0 %vm291_vm2, %v245_v18  ;;  %250 = vmatprep.subr.msk.bf16.mxu1 %vm291_vm2, %v248_v20 }
   0x9   :  { %253 = vmatpush1.bf16.msk.msra.mxu1 %vm291_vm2, %v251_v21 }
   0xb   :  { %238 = vmatmul.mubr.msk.f32.vlgmr.msra.gmra.mrb[0].mxu0 %vm28_vm3, %v27_v22 }
   0xc   :  { %241 = vmatmul.mubr.msk.f32.vlgmr.msra.gmra.mrb[0].mxu1 %vm28_vm3, %v27_v22 }
  0xde   :  { %v111_v23 = vpop.f32.mrb[0].mxu0 }
  0xdf   :  { %v187_v24 = vsel %vm32_vm0, %v111_v23, 0.0  ;;  %v113_v25 = vpop.f32.mrb[1].mxu0  ;;  %v182_v27 = vpop.f32.mrb[0].mxu1 }
  0xe0   :  { %v188_v26 = vsel %vm32_vm0, %v113_v25, 0.0  ;;  %v190_v29 = vsel %vm32_vm0, %v182_v27, 0.0  ;;  %v184_v30 = vpop.f32.mrb[1].mxu1 }
  0xe1   :  { %v189_v28 = vadd.f32 %v188_v26, %v187_v24  ;;  %v192_v32 = vsel %vm32_vm0, %v184_v30, 0.0 }
  0xe3   :  { %v191_v31 = vadd.f32 %v190_v29, %v189_v28 }
  0xe5   :  { %v193_v33 = vadd.f32 %v192_v32, %v191_v31 }
  0xe7   :  { %194 = vadd.xlane.f32.xlu0 %v193_v33 }
 0x174   :  { %v195_v34 = vpop.xlane.xlu0 %194 }
 0x175   :  { %v197_v35 = vmul.f32 0.001953125, %v195_v34 }
 0x177   :  { %v198_v36 = vsub.f32 %v111_v23, %v197_v35  ;;  %v199_v37 = vsub.f32 %v113_v25, %v197_v35  ;;  %v200_v38 = vsub.f32 %v182_v27, %v197_v35  ;;  %v201_v39 = vsub.f32 %v184_v30, %v197_v35 }
 0x179   :  { %v202_v40 = vmul.f32 %v198_v36, %v198_v36  ;;  %v203_v41 = vmul.f32 %v199_v37, %v199_v37  ;;  %v204_v42 = vmul.f32 %v200_v38, %v200_v38  ;;  %v205_v43 = vmul.f32 %v201_v39, %v201_v39 }
 0x17b   :  { %v206_v44 = vsel %vm32_vm0, %v202_v40, 0.0  ;;  %v207_v45 = vsel %vm32_vm0, %v203_v41, 0.0  ;;  %v209_v47 = vsel %vm32_vm0, %v204_v42, 0.0  ;;  %v211_v49 = vsel %vm32_vm0, %v205_v43, 0.0 }
 0x17c   :  { %v208_v46 = vadd.f32 %v207_v45, %v206_v44 }
 0x17e   :  { %v210_v48 = vadd.f32 %v209_v47, %v208_v46 }
 0x180   :  { %v212_v50 = vadd.f32 %v211_v49, %v210_v48 }
 0x182   :  { %213 = vadd.xlane.f32.xlu0 %v212_v50 }
 0x20f   :  { %v214_v51 = vpop.xlane.xlu0 %213 }
 0x210   :  { %v215_v52 = vmul.f32 0.001953125, %v214_v51 }
 0x212   :  { %v216_v53 = vadd.f32 1e-05, %v215_v52 }
 0x214   :  { %256 = vrsqrt.f32 %v216_v53 }
 0x21e   :  { %v257_v54 = vpop.eup %256 }
 0x21f   :  { %v218_v55 = vmul.f32 %v257_v54, %v198_v36  ;;  %v219_v56 = vmul.f32 %v257_v54, %v199_v37  ;;  %v220_v57 = vmul.f32 %v257_v54, %v200_v38  ;;  %v221_v58 = vmul.f32 %v257_v54, %v201_v39 }
 0x221   :  { %v226_v59 = vcombine.low %v218_v55, %v219_v56  ;;  %v227_v60 = vcombine.low %v220_v57, %v221_v58 }
 0x223   :  { %230 = vst [vmem:[%s331_s2] sm:$0xff] %v226_v59  ;;  %231 = vst [vmem:[%s331_s2 + $0x8] sm:$0xff] %v227_v60 }

// kernel: _lambda_.23
= control target key start
LH: loop header
LB: loop body
LE: loop exit
PB: predicated region body
PF: predicated region fallthrough
CT: control target
= control target key end

     0   :  { %vm36_vm0 = vcmask 1042432   ;;  %v311_v3 = vmov 0.0   ;;  %vm312_vm1 = vmmov 1   ;;  %vm29_vm3 = vcmask 220160   ;;  %s427_s0 = inlined_call_operand.vmem [shape: f32[27,512], index: 0, kind: input, shape index: {}]   ;;  %s428_s1 = inlined_call_operand.vmem [shape: f32[12,27], index: 1, kind: input, shape index: {}]   ;;  %s429_s2 = inlined_call_operand.vmem [shape: f32[12,512], index: 2, kind: output, shape index: {}]  }
   0x1   :  { %v12_v0 = vld [vmem:[%s427_s0 + $0x8] sm:$0xff]  ;;  %v11_v2 = vld [vmem:[%s427_s0] sm:$0xff]  ;;  %113 = vmatprep.mubr.f32.mxu0 %v311_v3  ;;  %190 = vmatprep.mubr.f32.mxu1 %v311_v3  ;;  %v14_v6 = vld [vmem:[%s427_s0 + $0x18] sm:$0xff]  ;;  %vm208_vm4 = vcmask 1043456  }
   0x2   :  { %v16_v1 = vld [vmem:[%s427_s0 + $0x28] sm:$0xff]  ;;  %v15_v5 = vld [vmem:[%s427_s0 + $0x20] sm:$0xff]  ;;  %v18_v7 = vld [vmem:[%s427_s0 + $0x38] sm:$0xff] }
   0x3   :  { %v285_v4 = vpack.c.bf16 %v16_v1, %v12_v0  ;;  %v287_v8 = vpack.c.bf16 %v15_v5, %v11_v2  ;;  %v295_v9 = vpack.c.bf16 %v18_v7, %v14_v6  ;;  %v13_v10 = vld [vmem:[%s427_s0 + $0x10] sm:$0xff]  ;;  %v20_v12 = vld [vmem:[%s427_s0 + $0x48] sm:$0xff]  ;;  %vm359_vm2 = vmpackc.low %vm36_vm0, %vm312_vm1 }
   0x4   :  { %v17_v11 = vld [vmem:[%s427_s0 + $0x30] sm:$0xff]  ;;  %v24_v14 = vld [vmem:[%s427_s0 + $0x68] sm:$0x7]  ;;  %v19_v16 = vld [vmem:[%s427_s0 + $0x40] sm:$0xff] }
   0x5   :  { %286 = vmatprep.subr.bf16.mxu0 %v285_v4  ;;  %v297_v13 = vpack.c.bf16 %v17_v11, %v13_v10  ;;  %296 = vmatprep.subr.bf16.mxu1 %v295_v9  ;;  %v289_v17 = vpack.c.bf16 %v24_v14, %v20_v12  ;;  %v23_v18 = vld [vmem:[%s427_s0 + $0x60] sm:$0x7]  ;;  %v22_v19 = vld [vmem:[%s427_s0 + $0x58] sm:$0xff]  ;;  %v21_v23 = vld [vmem:[%s427_s0 + $0x50] sm:$0xff] }
   0x6   :  { %288 = vmatpush1.bf16.msra.mxu0 %v287_v8  ;;  %v26_v20 = vld [vmem:[%s427_s0 + $0x78] sm:$0x7]  ;;  %v292_v21 = vpack.c.bf16 %v23_v18, %v19_v16  ;;  %v25_v24 = vld [vmem:[%s427_s0 + $0x70] sm:$0x7]  ;;  %v27_v26 = vld [vmem:[%s428_s1] sm:$0xff] }
   0x7   :  { %298 = vmatpush1.bf16.msra.mxu1 %v297_v13  ;;  %v299_v22 = vpack.c.bf16 %v26_v20, %v22_v19  ;;  %291 = vmatprep.subr.msk.bf16.mxu0 %vm359_vm2, %v289_v17  ;;  %v302_v25 = vpack.c.bf16 %v25_v24, %v21_v23  ;;  %v28_v27 = vld [vmem:[%s428_s1 + $0x8] sm:$0xf] }
   0x9   :  { %301 = vmatprep.subr.msk.bf16.mxu1 %vm359_vm2, %v299_v22 }
   0xa   :  { %294 = vmatpush1.bf16.msk.msra.mxu0 %vm359_vm2, %v292_v21 }
   0xb   :  { %304 = vmatpush1.bf16.msk.msra.mxu1 %vm359_vm2, %v302_v25 }
   0xd   :  { %279 = vmatmul.mubr.msk.f32.vlgmr.msra.gmra.mrb[0].mxu0 %vm29_vm3, %v27_v26 }
   0xe   :  { %283 = vmatmul.mubr.msk.f32.vlgmr.msra.gmra.mrb[0].mxu1 %vm29_vm3, %v27_v26  ;;  %119 = vmatprep.mubr.f32.mxu0 %v311_v3 }
   0xf   :  { %196 = vmatprep.mubr.f32.mxu1 %v311_v3 }
  0x11   :  { %280 = vmatmul.mubr.msk.f32.gmra.mrb[2].mxu0 %vm29_vm3, %v28_v27 }
  0x12   :  { %284 = vmatmul.mubr.msk.f32.gmra.mrb[2].mxu1 %vm29_vm3, %v28_v27 }
  0xe0   :  { %v115_v28 = vpop.f32.mrb[0].mxu0 }
  0xe1   :  { %v117_v29 = vpop.f32.mrb[1].mxu0  ;;  %v192_v30 = vpop.f32.mrb[0].mxu1 }
  0xe2   :  { %v203_v31 = vadd.f32 %v117_v29, %v115_v28  ;;  %v194_v32 = vpop.f32.mrb[1].mxu1 }
  0xe4   :  { %v204_v33 = vadd.f32 %v203_v31, %v192_v30  ;;  %v121_v34 = vpop.f32.mrb[2].mxu0 }
  0xe5   :  { %v209_v35 = vsel %vm208_vm4, %v121_v34, 0.0  ;;  %v123_v36 = vpop.f32.mrb[3].mxu0  ;;  %v198_v37 = vpop.f32.mrb[2].mxu1 }
  0xe6   :  { %v210_v38 = vsel %vm208_vm4, %v123_v36, 0.0  ;;  %v212_v39 = vsel %vm208_vm4, %v198_v37, 0.0  ;;  %v200_v40 = vpop.f32.mrb[3].mxu1  ;;  %v205_v41 = vadd.f32 %v204_v33, %v194_v32 }
  0xe7   :  { %v211_v42 = vadd.f32 %v210_v38, %v209_v35  ;;  %v214_v44 = vsel %vm208_vm4, %v200_v40, 0.0 }
  0xe9   :  { %v213_v43 = vadd.f32 %v212_v39, %v211_v42 }
  0xeb   :  { %v215_v45 = vadd.f32 %v214_v44, %v213_v43 }
  0xed   :  { %216 = vadd.xlane.f32.xlu0 %v215_v45 }
  0xf1   :  { %206 = vadd.xlane.f32.xlu0 %v205_v41 }
 0x17a   :  { %v217_v46 = vpop.xlane.xlu0 %216 }
 0x17b   :  { %v220_v47 = vmul.f32 0.001953125, %v217_v46 }
 0x17d   :  { %v225_v48 = vsub.f32 %v121_v34, %v220_v47  ;;  %v226_v49 = vsub.f32 %v123_v36, %v220_v47  ;;  %v227_v54 = vsub.f32 %v198_v37, %v220_v47  ;;  %v228_v63 = vsub.f32 %v200_v40, %v220_v47 }
 0x17e   :  { %v207_v50 = vpop.xlane.xlu0 %206 }
 0x17f   :  { %v219_v51 = vmul.f32 0.001953125, %v207_v50  ;;  %v233_v52 = vmul.f32 %v225_v48, %v225_v48  ;;  %v234_v53 = vmul.f32 %v226_v49, %v226_v49  ;;  %v235_v0 = vmul.f32 %v227_v54, %v227_v54 }
 0x180   :  { %v236_v6 = vmul.f32 %v228_v63, %v228_v63 }
 0x181   :  { %v221_v55 = vsub.f32 %v115_v28, %v219_v51  ;;  %v222_v56 = vsub.f32 %v117_v29, %v219_v51  ;;  %v223_v57 = vsub.f32 %v192_v30, %v219_v51  ;;  %v242_v58 = vsel %vm208_vm4, %v233_v52, 0.0 }
 0x182   :  { %v243_v59 = vsel %vm208_vm4, %v234_v53, 0.0  ;;  %v224_v60 = vsub.f32 %v194_v32, %v219_v51  ;;  %v245_v7 = vsel %vm208_vm4, %v235_v0, 0.0  ;;  %v247_v10 = vsel %vm208_vm4, %v236_v6, 0.0 }
 0x183   :  { %v229_v61 = vmul.f32 %v221_v55, %v221_v55  ;;  %v230_v62 = vmul.f32 %v222_v56, %v222_v56  ;;  %v231_v1 = vmul.f32 %v223_v57, %v223_v57  ;;  %v244_v3 = vadd.f32 %v243_v59, %v242_v58 }
 0x184   :  { %v232_v4 = vmul.f32 %v224_v60, %v224_v60 }
 0x185   :  { %v237_v2 = vadd.f32 %v230_v62, %v229_v61  ;;  %v246_v9 = vadd.f32 %v245_v7, %v244_v3 }
 0x187   :  { %v238_v5 = vadd.f32 %v237_v2, %v231_v1  ;;  %v248_v11 = vadd.f32 %v247_v10, %v246_v9 }
 0x189   :  { %v239_v8 = vadd.f32 %v238_v5, %v232_v4 }
 0x18b   :  { %240 = vadd.xlane.f32.xlu1 %v239_v8 }
 0x18f   :  { %249 = vadd.xlane.f32.xlu1 %v248_v11 }
 0x218   :  { %v241_v12 = vpop.xlane.xlu1 %240 }
 0x219   :  { %v251_v13 = vmul.f32 0.001953125, %v241_v12 }
 0x21b   :  { %v253_v14 = vadd.f32 1e-05, %v251_v13 }
 0x21c   :  { %v250_v15 = vpop.xlane.xlu1 %249 }
 0x21d   :  { %307 = vrsqrt.f32 %v253_v14  ;;  %v252_v16 = vmul.f32 0.001953125, %v250_v15 }
 0x21f   :  { %v254_v17 = vadd.f32 1e-05, %v252_v16 }
 0x221   :  { %309 = vrsqrt.f32 %v254_v17 }
 0x227   :  { %v308_v18 = vpop.eup %307 }
 0x228   :  { %v257_v19 = vmul.f32 %v308_v18, %v221_v55  ;;  %v258_v20 = vmul.f32 %v308_v18, %v222_v56  ;;  %v259_v21 = vmul.f32 %v308_v18, %v223_v57  ;;  %v260_v22 = vmul.f32 %v308_v18, %v224_v60 }
 0x22a   :  { %265 = vst [vmem:[%s429_s2] sm:$0xff] %v257_v19  ;;  %266 = vst [vmem:[%s429_s2 + $0x8] sm:$0xff] %v258_v20 }
 0x22b   :  { %267 = vst [vmem:[%s429_s2 + $0x10] sm:$0xff] %v259_v21  ;;  %268 = vst [vmem:[%s429_s2 + $0x18] sm:$0xff] %v260_v22  ;;  %v310_v23 = vpop.eup %309 }
 0x22c   :  { %v261_v24 = vmul.f32 %v310_v23, %v225_v48  ;;  %v262_v25 = vmul.f32 %v310_v23, %v226_v49  ;;  %v263_v26 = vmul.f32 %v310_v23, %v227_v54  ;;  %v264_v27 = vmul.f32 %v310_v23, %v228_v63 }
 0x22e   :  { %269 = vst [vmem:[%s429_s2 + $0x20] sm:$0xf] %v261_v24  ;;  %270 = vst [vmem:[%s429_s2 + $0x28] sm:$0xf] %v262_v25 }
 0x22f   :  { %271 = vst [vmem:[%s429_s2 + $0x30] sm:$0xf] %v263_v26  ;;  %272 = vst [vmem:[%s429_s2 + $0x38] sm:$0xf] %v264_v27 }

// kernel: _lambda_.29
= control target key start
LH: loop header
LB: loop body
LE: loop exit
PB: predicated region body
PF: predicated region fallthrough
CT: control target
= control target key end

     0   :  { %10 = vsyncpa [#allocation3], 0  ;;  %s732_s0 = inlined_call_operand.vmem [shape: f32[5], index: 0, kind: input, shape index: {}]   ;;  %s733_s1 = inlined_call_operand.vmem [shape: f32[36,512], index: 1, kind: input, shape index: {}]   ;;  %s734_s2 = inlined_call_operand.vmem [shape: f32[4,512], index: 2, kind: input, shape index: {}]   ;;  %s735_s3 = inlined_call_operand.vmem [shape: f32[2,4,36], index: 3, kind: input, shape index: {}]   ;;  %s736_s4 = inlined_call_operand.vmem [shape: f32[4,512], index: 4, kind: input, shape index: {}]   ;;  %s737_s5 = inlined_call_operand.vmem [shape: f32[4,512], index: 5, kind: output, shape index: {}]  }
   0x1   :  { %s17_s20 = sshll.u32 %s732_s0, 4  ;;  %s18_s20 = int_to_ptr.vmem [resolvable:$true] %s17_s20 }
   0x2   :  { %s567_s21 = scalar_lea.vmem %s18_s20, 16  ;;  %p572_p1 = scmp.lt.s32.totalorder %s18_s20, %s18_s20 }
   0x3   :  { %p568_p0 = scmp.ne.s32.totalorder %s18_s20, %s567_s21  ;;  %p573_p2 = scmp.lt.s32.totalorder %s567_s21, %s567_s21 }
   0x5   :  { %p574_p3 = por %p573_p2, %p572_p1 }
   0x7   :  { %p575_p4 = pnand %p574_p3, %p568_p0 }
   0x9   :  { %578 = shalt.err (!%p575_p4)
}
   0xa   :  { %s581_s22 = smov [#allocation2]  }
   0xb   :  { %20 = dma.vmem_to_smem %s18_s20, 16, %s581_s22, [#allocation3]  }
   0xc   :  { %579 = dma.done.wait [#allocation3], 16  }
   0xd   :  { %580 = vsyncadd [#allocation3], 4294967280 }
   0xe   :  { %32 = sfence }
   0xf   :  { %v34_v0 = vld [vmem:[%s733_s1 + $0x8] sm:$0xff]  ;;  %v33_v2 = vld [vmem:[%s733_s1] sm:$0xff]  ;;  %v36_v7 = vld [vmem:[%s733_s1 + $0x18] sm:$0xff]  ;;  %v582_v9 = vmov 0.0   ;;  %vm79_vm0 = vcmask 1043456   ;;  %vm75_vm1 = vcmask 293888  }
  0x10   :  { %v38_v1 = vld [vmem:[%s733_s1 + $0x28] sm:$0xff]  ;;  %v54_v3 = vmax.f32 %v34_v0, 0.0  ;;  %v37_v5 = vld [vmem:[%s733_s1 + $0x20] sm:$0xff]  ;;  %v53_v6 = vmax.f32 %v33_v2, 0.0  ;;  %v40_v8 = vld [vmem:[%s733_s1 + $0x38] sm:$0xff]  ;;  %156 = vmatprep.mubr.f32.mxu0 %v582_v9  ;;  %227 = vmatprep.mubr.f32.mxu1 %v582_v9  ;;  %v56_v11 = vmax.f32 %v36_v7, 0.0 }
  0x11   :  { %v58_v4 = vmax.f32 %v38_v1, 0.0  ;;  %v57_v10 = vmax.f32 %v37_v5, 0.0  ;;  %v60_v12 = vmax.f32 %v40_v8, 0.0  ;;  %v35_v13 = vld [vmem:[%s733_s1 + $0x10] sm:$0xff]  ;;  %v42_v15 = vld [vmem:[%s733_s1 + $0x48] sm:$0xff]  ;;  %v41_v21 = vld [vmem:[%s733_s1 + $0x40] sm:$0xff] }
  0x12   :  { %v39_v14 = vld [vmem:[%s733_s1 + $0x30] sm:$0xff]  ;;  %v55_v17 = vmax.f32 %v35_v13, 0.0  ;;  %v46_v19 = vld [vmem:[%s733_s1 + $0x68] sm:$0xff]  ;;  %v62_v20 = vmax.f32 %v42_v15, 0.0  ;;  %v45_v22 = vld [vmem:[%s733_s1 + $0x60] sm:$0xff]  ;;  %v61_v26 = vmax.f32 %v41_v21, 0.0 }
  0x13   :  { %v529_v16 = vpack.c.bf16 %v58_v4, %v54_v3  ;;  %v59_v18 = vmax.f32 %v39_v14, 0.0  ;;  %v531_v23 = vpack.c.bf16 %v57_v10, %v53_v6  ;;  %v537_v24 = vpack.c.bf16 %v60_v12, %v56_v11  ;;  %v44_v27 = vld [vmem:[%s733_s1 + $0x58] sm:$0xff]  ;;  %v43_v29 = vld [vmem:[%s733_s1 + $0x50] sm:$0xff]  ;;  %v50_v35 = vld [vmem:[%s733_s1 + $0x88] sm:$0xf]  ;;  %s528_s14 = sld [smem:[#allocation2 + $0x4]] }
  0x14   :  { %v66_v25 = vmax.f32 %v46_v19, 0.0  ;;  %v48_v28 = vld [vmem:[%s733_s1 + $0x78] sm:$0xff]  ;;  %v65_v31 = vmax.f32 %v45_v22, 0.0  ;;  %v64_v32 = vmax.f32 %v44_v27, 0.0  ;;  %v47_v34 = vld [vmem:[%s733_s1 + $0x70] sm:$0xff]  ;;  %v63_v37 = vmax.f32 %v43_v29, 0.0 }
  0x15   :  { %530 = vmatprep.subr.bf16.mxu0 %v529_v16  ;;  %v539_v30 = vpack.c.bf16 %v59_v18, %v55_v17  ;;  %v68_v33 = vmax.f32 %v48_v28, 0.0  ;;  %538 = vmatprep.subr.bf16.mxu1 %v537_v24  ;;  %v67_v38 = vmax.f32 %v47_v34, 0.0  ;;  %v70_v41 = vmax.f32 %v50_v35, 0.0  ;;  %v49_v42 = vld [vmem:[%s733_s1 + $0x80] sm:$0xf]  ;;  %s512_s15 = sld [smem:[#allocation2 + $0x3]] }
  0x16   :  { %532 = vmatpush1.bf16.msra.mxu0 %v531_v23  ;;  %v533_v36 = vpack.c.bf16 %v66_v25, %v62_v20  ;;  %v535_v39 = vpack.c.bf16 %v65_v31, %v61_v26  ;;  %v52_v43 = vld [vmem:[%s733_s1 + $0x98] sm:$0xf]  ;;  %v51_v46 = vld [vmem:[%s733_s1 + $0x90] sm:$0xf]  ;;  %v69_v47 = vmax.f32 %v49_v42, 0.0  ;;  %s519_s16 = sld [smem:[#allocation2 + $0x2]] }
  0x17   :  { %540 = vmatpush1.bf16.msra.mxu1 %v539_v30  ;;  %v541_v40 = vpack.c.bf16 %v68_v33, %v64_v32  ;;  %v543_v44 = vpack.c.bf16 %v67_v38, %v63_v37  ;;  %v72_v45 = vmax.f32 %v52_v43, 0.0  ;;  %v74_v48 = vld [vmem:[%s735_s3] sm:$0xf]  ;;  %v71_v49 = vmax.f32 %v51_v46, 0.0  ;;  %v520_v50 = vld [vmem:[%s735_s3 + $0x4] sm:$0xf] }
  0x18   :  { %534 = vmatprep.subr.bf16.mxu0 %v533_v36  ;;  %s527_s3 = sld [smem:[#allocation2 + $0x1]] }
  0x19   :  { %542 = vmatprep.subr.bf16.mxu1 %v541_v40 }
  0x1a   :  { %536 = vmatpush1.bf16.msra.mxu0 %v535_v39 }
  0x1b   :  { %544 = vmatpush1.bf16.msra.mxu1 %v543_v44  ;;  %513 = vmatprep.subr.msk.mxu0 %vm79_vm0, %v70_v41 }
  0x1c   :  { %516 = vmatprep.subr.msk.mxu1 %vm79_vm0, %v72_v45 }
  0x1e   :  { %514 = vmatpush1.msk.msra.mxu0 %vm79_vm0, %v69_v47 }
  0x1f   :  { %515 = vmatmul.mubr.msk.f32.vlgmr.msra.gmra.mrb[0].mxu0 %vm75_vm1, %v74_v48  ;;  %546 = vmatprep.subr.bf16.mxu0 %v529_v16 }
  0x20   :  { %517 = vmatpush1.msk.msra.mxu1 %vm79_vm0, %v71_v49  ;;  %548 = vmatpush1.bf16.msra.mxu0 %v531_v23 }
  0x21   :  { %554 = vmatprep.subr.bf16.mxu1 %v537_v24  ;;  %518 = vmatmul.mubr.msk.f32.vlgmr.msra.gmra.mrb[0].mxu1 %vm75_vm1, %v74_v48 }
  0x22   :  { %556 = vmatpush1.bf16.msra.mxu1 %v539_v30  ;;  %550 = vmatprep.subr.bf16.mxu0 %v533_v36 }
  0x23   :  { %558 = vmatprep.subr.bf16.mxu1 %v541_v40  ;;  %344 = vmatprep.mubr.f32.mxu0 %v582_v9 }
  0x24   :  { %552 = vmatpush1.bf16.msra.mxu0 %v535_v39  ;;  %415 = vmatprep.mubr.f32.mxu1 %v582_v9 }
  0x25   :  { %521 = vmatprep.subr.msk.mxu0 %vm79_vm0, %v70_v41 }
  0x26   :  { %560 = vmatpush1.bf16.msra.mxu1 %v543_v44 }
  0x27   :  { %524 = vmatprep.subr.msk.mxu1 %vm79_vm0, %v72_v45 }
  0x28   :  { %522 = vmatpush1.msk.msra.mxu0 %vm79_vm0, %v69_v47 }
  0x29   :  { %523 = vmatmul.mubr.msk.f32.vlgmr.msra.gmra.mrb[2].mxu0 %vm75_vm1, %v520_v50 }
  0x2a   :  { %525 = vmatpush1.msk.msra.mxu1 %vm79_vm0, %v71_v49  ;;  %v466_v49 = vld [vmem:[%s736_s4] sm:$0xff] }
  0x2b   :  { %526 = vmatmul.mubr.msk.f32.vlgmr.msra.gmra.mrb[2].mxu1 %vm75_vm1, %v520_v50  ;;  %v467_v50 = vld [vmem:[%s736_s4 + $0x8] sm:$0xff] }
  0xf2   :  { %v158_v51 = vpop.f32.mrb[0].mxu0 }
  0xf3   :  { %v234_v52 = vsel %vm79_vm0, %v158_v51, 0.0  ;;  %v160_v53 = vpop.f32.mrb[1].mxu0 }
  0xf4   :  { %v235_v54 = vsel %vm79_vm0, %v160_v53, 0.0  ;;  %v229_v55 = vpop.f32.mrb[0].mxu1 }
  0xf5   :  { %v236_v56 = vadd.f32 %v235_v54, %v234_v52  ;;  %v237_v57 = vsel %vm79_vm0, %v229_v55, 0.0  ;;  %v231_v58 = vpop.f32.mrb[1].mxu1 }
  0xf6   :  { %v239_v59 = vsel %vm79_vm0, %v231_v58, 0.0 }
  0xf7   :  { %v238_v60 = vadd.f32 %v237_v57, %v236_v56  ;;  %v483_v56 = vld [vmem:[%s734_s2 + $0x8] sm:$0xff]  ;;  %v484_v57 = vstv %s528_s14 }
  0xf9   :  { %v240_v61 = vadd.f32 %v239_v59, %v238_v60 }
  0xfb   :  { %241 = vadd.xlane.f32.xlu0 %v240_v61 }
  0xfc   :  { %v346_v62 = vpop.f32.mrb[2].mxu0 }
  0xfd   :  { %v422_v63 = vsel %vm79_vm0, %v346_v62, 0.0  ;;  %v348_v0 = vpop.f32.mrb[3].mxu0 }
  0xfe   :  { %v423_v1 = vsel %vm79_vm0, %v348_v0, 0.0  ;;  %v417_v2 = vpop.f32.mrb[2].mxu1 }
  0xff   :  { %v424_v3 = vadd.f32 %v423_v1, %v422_v63  ;;  %v425_v4 = vsel %vm79_vm0, %v417_v2, 0.0  ;;  %v419_v5 = vpop.f32.mrb[3].mxu1  ;;  %v456_v63 = vstv %s519_s16 }
 0x100   :  { %v427_v7 = vsel %vm79_vm0, %v419_v5, 0.0 }
 0x101   :  { %v426_v6 = vadd.f32 %v425_v4, %v424_v3  ;;  %v486_v4 = vmul.f32 %v484_v57, %v483_v56 }
 0x103   :  { %v428_v8 = vadd.f32 %v427_v7, %v426_v6 }
 0x105   :  { %429 = vadd.xlane.f32.xlu0 %v428_v8 }
 0x188   :  { %v242_v9 = vpop.xlane.xlu0 %241 }
 0x189   :  { %v244_v10 = vmul.f32 0.001953125, %v242_v9 }
 0x18b   :  { %v245_v11 = vsub.f32 %v158_v51, %v244_v10  ;;  %v246_v12 = vsub.f32 %v160_v53, %v244_v10  ;;  %v247_v13 = vsub.f32 %v229_v55, %v244_v10  ;;  %v248_v14 = vsub.f32 %v231_v58, %v244_v10  ;;  %v482_v55 = vld [vmem:[%s734_s2] sm:$0xff] }
 0x18c   :  { %v468_v51 = vstv %s527_s3  ;;  %v485_v3 = vmul.f32 %v484_v57, %v482_v55 }
 0x18d   :  { %v249_v15 = vmul.f32 %v245_v11, %v245_v11  ;;  %v250_v16 = vmul.f32 %v246_v12, %v246_v12  ;;  %v251_v17 = vmul.f32 %v247_v13, %v247_v13  ;;  %v252_v18 = vmul.f32 %v248_v14, %v248_v14 }
 0x18e   :  { %v469_v53 = vmul.f32 %v468_v51, %v466_v49  ;;  %v470_v54 = vmul.f32 %v468_v51, %v467_v50 }
 0x18f   :  { %v253_v19 = vsel %vm79_vm0, %v249_v15, 0.0  ;;  %v254_v20 = vsel %vm79_vm0, %v250_v16, 0.0  ;;  %v256_v22 = vsel %vm79_vm0, %v251_v17, 0.0  ;;  %v258_v26 = vsel %vm79_vm0, %v252_v18, 0.0 }
 0x190   :  { %v255_v21 = vadd.f32 %v254_v20, %v253_v19  ;;  %v473_v1 = vcombine.high %v469_v53, %v469_v53  ;;  %v490_v18 = vcombine.high %v486_v4, %v486_v4 }
 0x192   :  { %v430_v23 = vpop.xlane.xlu0 %429  ;;  %v257_v24 = vadd.f32 %v256_v22, %v255_v21 }
 0x193   :  { %v431_v25 = vmul.f32 0.001953125, %v430_v23 }
 0x194   :  { %v259_v27 = vadd.f32 %v258_v26, %v257_v24 }
 0x195   :  { %v432_v28 = vsub.f32 %v346_v62, %v431_v25  ;;  %v433_v29 = vsub.f32 %v348_v0, %v431_v25  ;;  %v434_v30 = vsub.f32 %v417_v2, %v431_v25  ;;  %v435_v31 = vsub.f32 %v419_v5, %v431_v25 }
 0x196   :  { %260 = vadd.xlane.f32.xlu1 %v259_v27  ;;  %v269_v62 = vstv %s512_s15  ;;  %v474_v2 = vcombine.high %v470_v54, %v470_v54 }
 0x197   :  { %v436_v32 = vmul.f32 %v432_v28, %v432_v28  ;;  %v437_v33 = vmul.f32 %v433_v29, %v433_v29  ;;  %v438_v34 = vmul.f32 %v434_v30, %v434_v30  ;;  %v439_v35 = vmul.f32 %v435_v31, %v435_v31 }
 0x199   :  { %v440_v36 = vsel %vm79_vm0, %v436_v32, 0.0  ;;  %v441_v37 = vsel %vm79_vm0, %v437_v33, 0.0  ;;  %v443_v39 = vsel %vm79_vm0, %v438_v34, 0.0  ;;  %v445_v41 = vsel %vm79_vm0, %v439_v35, 0.0 }
 0x19a   :  { %v442_v38 = vadd.f32 %v441_v37, %v440_v36 }
 0x19c   :  { %v444_v40 = vadd.f32 %v443_v39, %v442_v38 }
 0x19e   :  { %v446_v42 = vadd.f32 %v445_v41, %v444_v40 }
 0x1a0   :  { %447 = vadd.xlane.f32.xlu1 %v446_v42 }
 0x223   :  { %v261_v43 = vpop.xlane.xlu1 %260 }
 0x224   :  { %v262_v44 = vmul.f32 0.001953125, %v261_v43 }
 0x226   :  { %v263_v45 = vadd.f32 1e-05, %v262_v44 }
 0x228   :  { %563 = vrsqrt.f32 %v263_v45 }
 0x22d   :  { %v448_v46 = vpop.xlane.xlu1 %447 }
 0x22e   :  { %v449_v47 = vmul.f32 0.001953125, %v448_v46 }
 0x230   :  { %v450_v48 = vadd.f32 1e-05, %v449_v47 }
 0x232   :  { %565 = vrsqrt.f32 %v450_v48  ;;  %v564_v52 = vpop.eup %563 }
 0x233   :  { %v265_v58 = vmul.f32 %v564_v52, %v245_v11  ;;  %v266_v59 = vmul.f32 %v564_v52, %v246_v12  ;;  %v267_v60 = vmul.f32 %v564_v52, %v247_v13  ;;  %v268_v61 = vmul.f32 %v564_v52, %v248_v14 }
 0x234   :  { %v489_v14 = vcombine.high %v485_v3, %v485_v3 }
 0x235   :  { %v270_v9 = vmul.f32 %v269_v62, %v265_v58  ;;  %v271_v10 = vmul.f32 %v269_v62, %v266_v59  ;;  %v272_v15 = vmul.f32 %v269_v62, %v267_v60  ;;  %v273_v16 = vmul.f32 %v269_v62, %v268_v61 }
 0x23c   :  { %v566_v0 = vpop.eup %565 }
 0x23d   :  { %v452_v5 = vmul.f32 %v566_v0, %v432_v28  ;;  %v453_v6 = vmul.f32 %v566_v0, %v433_v29  ;;  %v454_v7 = vmul.f32 %v566_v0, %v434_v30  ;;  %v455_v8 = vmul.f32 %v566_v0, %v435_v31 }
 0x23f   :  { %v457_v17 = vmul.f32 %v456_v63, %v452_v5  ;;  %v458_v11 = vmul.f32 %v456_v63, %v453_v6  ;;  %v459_v12 = vmul.f32 %v456_v63, %v454_v7  ;;  %v460_v13 = vmul.f32 %v456_v63, %v455_v8 }
 0x241   :  { %v461_v19 = vadd.f32 %v457_v17, %v270_v9  ;;  %v462_v20 = vadd.f32 %v458_v11, %v271_v10  ;;  %v463_v21 = vadd.f32 %v459_v12, %v272_v15  ;;  %v464_v22 = vadd.f32 %v460_v13, %v273_v16 }
 0x243   :  { %v477_v23 = vadd.f32 %v469_v53, %v461_v19  ;;  %v478_v24 = vadd.f32 %v473_v1, %v462_v20  ;;  %v479_v25 = vadd.f32 %v470_v54, %v463_v21  ;;  %v480_v26 = vadd.f32 %v474_v2, %v464_v22 }
 0x245   :  { %v493_v27 = vadd.f32 %v485_v3, %v477_v23  ;;  %v494_v28 = vadd.f32 %v489_v14, %v478_v24  ;;  %v495_v29 = vadd.f32 %v486_v4, %v479_v25  ;;  %v496_v30 = vadd.f32 %v490_v18, %v480_v26 }
 0x247   :  { %v501_v31 = vcombine.low %v493_v27, %v494_v28  ;;  %v502_v32 = vcombine.low %v495_v29, %v496_v30 }
 0x249   :  { %505 = vst [vmem:[%s737_s5] sm:$0xff] %v501_v31  ;;  %506 = vst [vmem:[%s737_s5 + $0x8] sm:$0xff] %v502_v32 }
 0x24a   :  { %511 = vsyncpa [#allocation3], 1 }

// kernel: _lambda_.32
= control target key start
LH: loop header
LB: loop body
LE: loop exit
PB: predicated region body
PF: predicated region fallthrough
CT: control target
= control target key end

     0   :  { %v206_v2 = vmov 0.0   ;;  %vm20_vm0 = vcmask 64512   ;;  %s249_s0 = inlined_call_operand.vmem [shape: f32[8,512], index: 0, kind: input, shape index: {}]   ;;  %s250_s1 = inlined_call_operand.vmem [shape: f32[8,8], index: 1, kind: input, shape index: {}]   ;;  %s251_s2 = inlined_call_operand.vmem [shape: f32[8,512], index: 2, kind: output, shape index: {}]  }
   0x1   :  { %v12_v0 = vld [vmem:[%s249_s0 + $0x8] sm:$0xff]  ;;  %v11_v1 = vld [vmem:[%s249_s0] sm:$0xff]  ;;  %88 = vmatprep.mubr.f32.mxu0 %v206_v2  ;;  %159 = vmatprep.mubr.f32.mxu1 %v206_v2  ;;  %v14_v5 = vld [vmem:[%s249_s0 + $0x18] sm:$0xff] }
   0x2   :  { %v16_v3 = vmax.f32 %v12_v0, 0.0  ;;  %v15_v4 = vmax.f32 %v11_v1, 0.0  ;;  %v13_v6 = vld [vmem:[%s249_s0 + $0x10] sm:$0xff]  ;;  %v19_v7 = vld [vmem:[%s250_s1] sm:$0xff]  ;;  %v18_v8 = vmax.f32 %v14_v5, 0.0 }
   0x3   :  { %v17_v9 = vmax.f32 %v13_v6, 0.0 }
   0x4   :  { %24 = vmatprep.subr.mxu0 %v16_v3  ;;  %95 = vmatprep.subr.mxu1 %v18_v8 }
   0x5   :  { %25 = vmatpush1.msra.mxu0 %v15_v4  ;;  %96 = vmatpush1.msra.mxu1 %v17_v9 }
   0x6   :  { %201 = vmatmul.mubr.msk.f32.vlgmr.msra.gmra.mrb[0].mxu0 %vm20_vm0, %v19_v7  ;;  %202 = vmatmul.mubr.msk.f32.vlgmr.msra.gmra.mrb[0].mxu1 %vm20_vm0, %v19_v7 }
  0xd9   :  { %v90_v10 = vpop.f32.mrb[0].mxu0  ;;  %v161_v12 = vpop.f32.mrb[0].mxu1 }
  0xda   :  { %v92_v11 = vpop.f32.mrb[1].mxu0  ;;  %v163_v14 = vpop.f32.mrb[1].mxu1 }
  0xdb   :  { %v166_v13 = vadd.f32 %v92_v11, %v90_v10 }
  0xdd   :  { %v167_v15 = vadd.f32 %v166_v13, %v161_v12 }
  0xdf   :  { %v168_v16 = vadd.f32 %v167_v15, %v163_v14 }
  0xe1   :  { %169 = vadd.xlane.f32.xlu0 %v168_v16 }
 0x16e   :  { %v170_v17 = vpop.xlane.xlu0 %169 }
 0x16f   :  { %v172_v18 = vmul.f32 0.001953125, %v170_v17 }
 0x171   :  { %v173_v19 = vsub.f32 %v90_v10, %v172_v18  ;;  %v174_v20 = vsub.f32 %v92_v11, %v172_v18  ;;  %v175_v21 = vsub.f32 %v161_v12, %v172_v18  ;;  %v176_v22 = vsub.f32 %v163_v14, %v172_v18 }
 0x173   :  { %v177_v23 = vmul.f32 %v173_v19, %v173_v19  ;;  %v178_v24 = vmul.f32 %v174_v20, %v174_v20  ;;  %v179_v25 = vmul.f32 %v175_v21, %v175_v21  ;;  %v180_v27 = vmul.f32 %v176_v22, %v176_v22 }
 0x175   :  { %v181_v26 = vadd.f32 %v178_v24, %v177_v23 }
 0x177   :  { %v182_v28 = vadd.f32 %v181_v26, %v179_v25 }
 0x179   :  { %v183_v29 = vadd.f32 %v182_v28, %v180_v27 }
 0x17b   :  { %184 = vadd.xlane.f32.xlu0 %v183_v29 }
 0x208   :  { %v185_v30 = vpop.xlane.xlu0 %184 }
 0x209   :  { %v186_v31 = vmul.f32 0.001953125, %v185_v30 }
 0x20b   :  { %v187_v32 = vadd.f32 1e-05, %v186_v31 }
 0x20d   :  { %204 = vrsqrt.f32 %v187_v32 }
 0x217   :  { %v205_v33 = vpop.eup %204 }
 0x218   :  { %v189_v34 = vmul.f32 %v205_v33, %v173_v19  ;;  %v190_v35 = vmul.f32 %v205_v33, %v174_v20  ;;  %v191_v36 = vmul.f32 %v205_v33, %v175_v21  ;;  %v192_v37 = vmul.f32 %v205_v33, %v176_v22 }
 0x21a   :  { %193 = vst [vmem:[%s251_s2] sm:$0xff] %v189_v34  ;;  %194 = vst [vmem:[%s251_s2 + $0x8] sm:$0xff] %v190_v35 }
 0x21b   :  { %195 = vst [vmem:[%s251_s2 + $0x10] sm:$0xff] %v191_v36  ;;  %196 = vst [vmem:[%s251_s2 + $0x18] sm:$0xff] %v192_v37 }

// kernel: _lambda_.31
= control target key start
LH: loop header
LB: loop body
LE: loop exit
PB: predicated region body
PF: predicated region fallthrough
CT: control target
= control target key end

     0   :  { %vm32_vm0 = vcmask 1043456   ;;  %v244_v2 = vmov 0.0   ;;  %vm245_vm1 = vmmov 1   ;;  %vm28_vm3 = vcmask 97280   ;;  %s312_s0 = inlined_call_operand.vmem [shape: f32[12,512], index: 0, kind: input, shape index: {}]   ;;  %s313_s1 = inlined_call_operand.vmem [shape: f32[8,12], index: 1, kind: input, shape index: {}]   ;;  %s314_s2 = inlined_call_operand.vmem [shape: f32[8,512], index: 2, kind: output, shape index: {}]  }
   0x1   :  { %v12_v0 = vld [vmem:[%s312_s0 + $0x8] sm:$0xff]  ;;  %109 = vmatprep.mubr.f32.mxu0 %v244_v2  ;;  %180 = vmatprep.mubr.f32.mxu1 %v244_v2  ;;  %v11_v5 = vld [vmem:[%s312_s0] sm:$0xff]  ;;  %v14_v7 = vld [vmem:[%s312_s0 + $0x18] sm:$0xff] }
   0x2   :  { %v16_v1 = vld [vmem:[%s312_s0 + $0x28] sm:$0xf]  ;;  %v20_v3 = vmax.f32 %v12_v0, 0.0  ;;  %v15_v6 = vld [vmem:[%s312_s0 + $0x20] sm:$0xf]  ;;  %vm276_vm2 = vmpackc.low %vm32_vm0, %vm245_vm1  ;;  %v19_v9 = vmax.f32 %v11_v5, 0.0 }
   0x3   :  { %v24_v4 = vmax.f32 %v16_v1, 0.0  ;;  %v23_v10 = vmax.f32 %v15_v6, 0.0  ;;  %v18_v11 = vld [vmem:[%s312_s0 + $0x38] sm:$0xf]  ;;  %v22_v12 = vmax.f32 %v14_v7, 0.0  ;;  %v13_v13 = vld [vmem:[%s312_s0 + $0x10] sm:$0xff] }
   0x4   :  { %v26_v15 = vmax.f32 %v18_v11, 0.0  ;;  %v17_v16 = vld [vmem:[%s312_s0 + $0x30] sm:$0xf]  ;;  %v21_v17 = vmax.f32 %v13_v13, 0.0  ;;  %v27_v22 = vld [vmem:[%s313_s1] sm:$0xff] }
   0x5   :  { %v228_v14 = vpack.c.bf16 %v24_v4, %v20_v3  ;;  %v231_v18 = vpack.c.bf16 %v23_v10, %v19_v9  ;;  %v25_v19 = vmax.f32 %v17_v16, 0.0 }
   0x6   :  { %v234_v20 = vpack.c.bf16 %v26_v15, %v22_v12 }
   0x7   :  { %230 = vmatprep.subr.msk.bf16.mxu0 %vm276_vm2, %v228_v14  ;;  %v237_v21 = vpack.c.bf16 %v25_v19, %v21_v17 }
   0x8   :  { %233 = vmatpush1.bf16.msk.msra.mxu0 %vm276_vm2, %v231_v18  ;;  %236 = vmatprep.subr.msk.bf16.mxu1 %vm276_vm2, %v234_v20 }
   0x9   :  { %239 = vmatpush1.bf16.msk.msra.mxu1 %vm276_vm2, %v237_v21 }
   0xb   :  { %224 = vmatmul.mubr.msk.f32.vlgmr.msra.gmra.mrb[0].mxu0 %vm28_vm3, %v27_v22 }
   0xc   :  { %227 = vmatmul.mubr.msk.f32.vlgmr.msra.gmra.mrb[0].mxu1 %vm28_vm3, %v27_v22 }
  0xde   :  { %v111_v23 = vpop.f32.mrb[0].mxu0 }
  0xdf   :  { %v113_v24 = vpop.f32.mrb[1].mxu0  ;;  %v182_v26 = vpop.f32.mrb[0].mxu1 }
  0xe0   :  { %v187_v25 = vadd.f32 %v113_v24, %v111_v23  ;;  %v184_v27 = vpop.f32.mrb[1].mxu1 }
  0xe2   :  { %v188_v28 = vadd.f32 %v187_v25, %v182_v26 }
  0xe4   :  { %v189_v29 = vadd.f32 %v188_v28, %v184_v27 }
  0xe6   :  { %190 = vadd.xlane.f32.xlu0 %v189_v29 }
 0x173   :  { %v191_v30 = vpop.xlane.xlu0 %190 }
 0x174   :  { %v193_v31 = vmul.f32 0.001953125, %v191_v30 }
 0x176   :  { %v194_v32 = vsub.f32 %v111_v23, %v193_v31  ;;  %v195_v33 = vsub.f32 %v113_v24, %v193_v31  ;;  %v196_v34 = vsub.f32 %v182_v26, %v193_v31  ;;  %v197_v35 = vsub.f32 %v184_v27, %v193_v31 }
 0x178   :  { %v198_v36 = vmul.f32 %v194_v32, %v194_v32  ;;  %v199_v37 = vmul.f32 %v195_v33, %v195_v33  ;;  %v200_v38 = vmul.f32 %v196_v34, %v196_v34  ;;  %v201_v40 = vmul.f32 %v197_v35, %v197_v35 }
 0x17a   :  { %v202_v39 = vadd.f32 %v199_v37, %v198_v36 }
 0x17c   :  { %v203_v41 = vadd.f32 %v202_v39, %v200_v38 }
 0x17e   :  { %v204_v42 = vadd.f32 %v203_v41, %v201_v40 }
 0x180   :  { %205 = vadd.xlane.f32.xlu0 %v204_v42 }
 0x20d   :  { %v206_v43 = vpop.xlane.xlu0 %205 }
 0x20e   :  { %v207_v44 = vmul.f32 0.001953125, %v206_v43 }
 0x210   :  { %v208_v45 = vadd.f32 1e-05, %v207_v44 }
 0x212   :  { %242 = vrsqrt.f32 %v208_v45 }
 0x21c   :  { %v243_v46 = vpop.eup %242 }
 0x21d   :  { %v210_v47 = vmul.f32 %v243_v46, %v194_v32  ;;  %v211_v48 = vmul.f32 %v243_v46, %v195_v33  ;;  %v212_v49 = vmul.f32 %v243_v46, %v196_v34  ;;  %v213_v50 = vmul.f32 %v243_v46, %v197_v35 }
 0x21f   :  { %214 = vst [vmem:[%s314_s2] sm:$0xff] %v210_v47  ;;  %215 = vst [vmem:[%s314_s2 + $0x8] sm:$0xff] %v211_v48 }
 0x220   :  { %216 = vst [vmem:[%s314_s2 + $0x10] sm:$0xff] %v212_v49  ;;  %217 = vst [vmem:[%s314_s2 + $0x18] sm:$0xff] %v213_v50 }

// kernel: _lambda_.36
= control target key start
LH: loop header
LB: loop body
LE: loop exit
PB: predicated region body
PF: predicated region fallthrough
CT: control target
= control target key end

     0   :  { %9 = vsyncpa [#allocation3], 0  ;;  %s571_s0 = inlined_call_operand.vmem [shape: f32[5], index: 0, kind: input, shape index: {}]   ;;  %s572_s1 = inlined_call_operand.vmem [shape: f32[72,128], index: 1, kind: input, shape index: {}]   ;;  %s573_s2 = inlined_call_operand.vmem [shape: f32[8,128], index: 2, kind: input, shape index: {}]   ;;  %s574_s3 = inlined_call_operand.vmem [shape: f32[3,8,72], index: 3, kind: input, shape index: {}]   ;;  %s575_s4 = inlined_call_operand.vmem [shape: f32[8,128], index: 4, kind: output, shape index: {}]  }
   0x1   :  { %s16_s17 = sshll.u32 %s571_s0, 4  ;;  %s17_s17 = int_to_ptr.vmem [resolvable:$true] %s16_s17 }
   0x2   :  { %s477_s18 = scalar_lea.vmem %s17_s17, 16  ;;  %p482_p1 = scmp.lt.s32.totalorder %s17_s17, %s17_s17 }
   0x3   :  { %p478_p0 = scmp.ne.s32.totalorder %s17_s17, %s477_s18  ;;  %p483_p2 = scmp.lt.s32.totalorder %s477_s18, %s477_s18 }
   0x5   :  { %p484_p3 = por %p483_p2, %p482_p1 }
   0x7   :  { %p485_p4 = pnand %p484_p3, %p478_p0 }
   0x9   :  { %488 = shalt.err (!%p485_p4)
}
   0xa   :  { %s491_s19 = smov [#allocation2]  }
   0xb   :  { %19 = dma.vmem_to_smem %s17_s17, 16, %s491_s19, [#allocation3]  }
   0xc   :  { %489 = dma.done.wait [#allocation3], 16  }
   0xd   :  { %490 = vsyncadd [#allocation3], 4294967280 }
   0xe   :  { %29 = sfence }
   0xf   :  { %v30_v0 = vld [vmem:[%s572_s1] sm:$0xff]  ;;  %v31_v1 = vld [vmem:[%s572_s1 + $0x8] sm:$0xff]  ;;  %v32_v2 = vld [vmem:[%s572_s1 + $0x10] sm:$0xff]  ;;  %v492_v3 = vmov 0.0|0.0   ;;  %vm493_vm0 = vmmov 0   ;;  %v494_v11 = vmov 0.0  }
  0x10   :  { %431 = vmatprep.subr.bf16.mxu0 %v492_v3  ;;  %v39_v4 = vmax.f32 %v30_v0, 0.0  ;;  %v40_v5 = vmax.f32 %v31_v1, 0.0  ;;  %443 = vmatprep.subr.bf16.mxu1 %v492_v3  ;;  %v33_v6 = vld [vmem:[%s572_s1 + $0x18] sm:$0xff]  ;;  %v41_v7 = vmax.f32 %v32_v2, 0.0  ;;  %v34_v9 = vld [vmem:[%s572_s1 + $0x20] sm:$0xff]  ;;  %v35_v10 = vld [vmem:[%s572_s1 + $0x28] sm:$0xff] }
  0x11   :  { %v42_v8 = vmax.f32 %v33_v6, 0.0  ;;  %386 = vmatprep.mubr.msk.f32.mxu0 %vm493_vm0, %v494_v11  ;;  %407 = vmatprep.mubr.msk.f32.mxu1 %vm493_vm0, %v494_v11  ;;  %v43_v14 = vmax.f32 %v34_v9, 0.0  ;;  %v44_v15 = vmax.f32 %v35_v10, 0.0  ;;  %v36_v16 = vld [vmem:[%s572_s1 + $0x30] sm:$0xff]  ;;  %v37_v17 = vld [vmem:[%s572_s1 + $0x38] sm:$0xff]  ;;  %v38_v22 = vld [vmem:[%s572_s1 + $0x40] sm:$0xff] }
  0x12   :  { %v432_v12 = vpack.c.bf16 %v40_v5, %v39_v4  ;;  %v45_v19 = vmax.f32 %v36_v16, 0.0  ;;  %v46_v20 = vmax.f32 %v37_v17, 0.0  ;;  %v47_v23 = vmax.f32 %v38_v22, 0.0  ;;  %v49_v24 = vld [vmem:[%s574_s3] sm:$0xff]  ;;  %v332_v25 = vld [vmem:[%s574_s3 + $0x8] sm:$0xff]  ;;  %v335_v26 = vld [vmem:[%s574_s3 + $0x10] sm:$0xff] }
  0x13   :  { %v435_v13 = vpack.c.bf16 %v42_v8, %v41_v7  ;;  %v438_v18 = vpack.c.bf16 %v44_v15, %v43_v14  ;;  %vm50_vm1 = vcmask 588800   ;;  %s331_s3 = sld [smem:[#allocation2 + $0x2]]  ;;  %s329_s16 = sld [smem:[#allocation2 + $0x3]]  ;;  %v319_v63 = vld [vmem:[%s573_s2] sm:$0xff] }
  0x14   :  { %433 = vmatpush3.bf16.msra.mxu0 %v432_v12  ;;  %445 = vmatpush3.bf16.msra.mxu1 %v432_v12  ;;  %v441_v21 = vpack.c.bf16 %v46_v20, %v45_v19  ;;  %s334_s17 = sld [smem:[#allocation2 + $0x1]]  ;;  %s337_s18 = sld [smem:[#allocation2 + $0x4]] }
  0x15   :  { %434 = vmatprep.subr.bf16.mxu0 %v492_v3  ;;  %446 = vmatprep.subr.bf16.mxu1 %v492_v3 }
  0x18   :  { %436 = vmatpush3.bf16.msra.mxu0 %v435_v13  ;;  %448 = vmatpush3.bf16.msra.mxu1 %v435_v13 }
  0x19   :  { %437 = vmatprep.subr.bf16.mxu0 %v492_v3  ;;  %449 = vmatprep.subr.bf16.mxu1 %v492_v3  ;;  %v225_v57 = vstv %s331_s3  ;;  %v136_v59 = vstv %s329_s16 }
  0x1a   :  { %v315_v62 = vstv %s334_s17  ;;  %v320_v0 = vstv %s337_s18 }
  0x1b   :  { %v321_v4 = vmul.f32 %v320_v0, %v319_v63 }
  0x1c   :  { %439 = vmatpush3.bf16.msra.mxu0 %v438_v18  ;;  %451 = vmatpush3.bf16.msra.mxu1 %v438_v18 }
  0x1d   :  { %440 = vmatprep.subr.bf16.mxu0 %v492_v3  ;;  %452 = vmatprep.subr.bf16.mxu1 %v492_v3 }
  0x20   :  { %442 = vmatpush3.bf16.msra.mxu0 %v441_v21  ;;  %454 = vmatpush3.bf16.msra.mxu1 %v441_v21 }
  0x21   :  { %384 = vmatprep.subr.mxu0 %v494_v11  ;;  %405 = vmatprep.subr.mxu1 %v494_v11 }
  0x24   :  { %385 = vmatpush3.msra.mxu0 %v47_v23  ;;  %406 = vmatpush3.msra.mxu1 %v47_v23 }
  0x25   :  { %387 = vmatmul.mubr.msk.f32.vlgmr.msra.gmra.mrb[0].mxu0 %vm50_vm1, %v49_v24  ;;  %455 = vmatprep.subr.bf16.mxu0 %v492_v3 }
  0x26   :  { %457 = vmatpush3.bf16.msra.mxu0 %v432_v12  ;;  %408 = vmatmul.mubr.msk.f32.vlgmr.msra.gmra.mrb[0].mxu1 %vm50_vm1, %v332_v25 }
  0x27   :  { %458 = vmatprep.subr.bf16.mxu0 %v492_v3  ;;  %428 = vmatprep.mubr.msk.f32.mxu0 %vm493_vm0, %v494_v11 }
  0x2a   :  { %460 = vmatpush3.bf16.msra.mxu0 %v435_v13 }
  0x2b   :  { %461 = vmatprep.subr.bf16.mxu0 %v492_v3 }
  0x2e   :  { %463 = vmatpush3.bf16.msra.mxu0 %v438_v18 }
  0x2f   :  { %464 = vmatprep.subr.bf16.mxu0 %v492_v3 }
  0x32   :  { %466 = vmatpush3.bf16.msra.mxu0 %v441_v21 }
  0x33   :  { %426 = vmatprep.subr.mxu0 %v494_v11 }
  0x36   :  { %427 = vmatpush3.msra.mxu0 %v47_v23 }
  0x37   :  { %429 = vmatmul.mubr.msk.f32.vlgmr.msra.gmra.mrb[2].mxu0 %vm50_vm1, %v335_v26 }
  0xf8   :  { %v120_v27 = vpop.f32.mrb[0].mxu0 }
  0xf9   :  { %124 = vadd.xlane.f32.xlu0 %v120_v27  ;;  %v388_v28 = vpop.f32.mrb[1].mxu0  ;;  %v210_v29 = vpop.f32.mrb[0].mxu1 }
  0xfa   :  { %v409_v30 = vpop.f32.mrb[1].mxu1 }
  0xfd   :  { %214 = vadd.xlane.f32.xlu0 %v210_v29 }
 0x10a   :  { %v300_v31 = vpop.f32.mrb[2].mxu0 }
 0x10b   :  { %304 = vadd.xlane.f32.xlu1 %v300_v31  ;;  %v430_v32 = vpop.f32.mrb[3].mxu0 }
 0x186   :  { %v125_v33 = vpop.xlane.xlu0 %124 }
 0x187   :  { %v127_v34 = vmul.f32 0.0078125, %v125_v33 }
 0x189   :  { %v128_v35 = vsub.f32 %v120_v27, %v127_v34 }
 0x18a   :  { %v215_v36 = vpop.xlane.xlu0 %214 }
 0x18b   :  { %v216_v37 = vmul.f32 0.0078125, %v215_v36  ;;  %v129_v38 = vmul.f32 %v128_v35, %v128_v35 }
 0x18d   :  { %v217_v39 = vsub.f32 %v210_v29, %v216_v37  ;;  %130 = vadd.xlane.f32.xlu1 %v129_v38 }
 0x18f   :  { %v218_v40 = vmul.f32 %v217_v39, %v217_v39 }
 0x191   :  { %219 = vadd.xlane.f32.xlu0 %v218_v40 }
 0x198   :  { %v305_v41 = vpop.xlane.xlu1 %304 }
 0x199   :  { %v306_v42 = vmul.f32 0.0078125, %v305_v41 }
 0x19b   :  { %v307_v43 = vsub.f32 %v300_v31, %v306_v42 }
 0x19d   :  { %v308_v44 = vmul.f32 %v307_v43, %v307_v43 }
 0x19f   :  { %309 = vadd.xlane.f32.xlu1 %v308_v44 }
 0x21a   :  { %v131_v46 = vpop.xlane.xlu1 %130 }
 0x21b   :  { %v132_v48 = vmul.f32 0.0078125, %v131_v46 }
 0x21d   :  { %v133_v50 = vadd.f32 1e-05, %v132_v48 }
 0x21e   :  { %v220_v45 = vpop.xlane.xlu0 %219 }
 0x21f   :  { %v221_v47 = vmul.f32 0.0078125, %v220_v45 }
 0x221   :  { %v222_v49 = vadd.f32 1e-05, %v221_v47 }
 0x223   :  { %471 = vrsqrt.f32 %v222_v49 }
 0x224   :  { %473 = vrsqrt.f32 %v133_v50 }
 0x22c   :  { %v310_v51 = vpop.xlane.xlu1 %309 }
 0x22d   :  { %v311_v52 = vmul.f32 0.0078125, %v310_v51  ;;  %v472_v54 = vpop.eup %471 }
 0x22e   :  { %v474_v55 = vpop.eup %473  ;;  %v224_v56 = vmul.f32 %v472_v54, %v217_v39 }
 0x22f   :  { %v312_v53 = vadd.f32 1e-05, %v311_v52  ;;  %v135_v58 = vmul.f32 %v474_v55, %v128_v35 }
 0x230   :  { %v226_v60 = vmul.f32 %v225_v57, %v224_v56 }
 0x231   :  { %475 = vrsqrt.f32 %v312_v53  ;;  %v137_v1 = vmul.f32 %v136_v59, %v135_v58 }
 0x233   :  { %v227_v3 = vadd.f32 %v226_v60, %v137_v1 }
 0x23b   :  { %v476_v61 = vpop.eup %475 }
 0x23c   :  { %v314_v2 = vmul.f32 %v476_v61, %v307_v43 }
 0x23e   :  { %v316_v5 = vmul.f32 %v315_v62, %v314_v2 }
 0x240   :  { %v317_v6 = vadd.f32 %v316_v5, %v227_v3 }
 0x242   :  { %v322_v7 = vadd.f32 %v321_v4, %v317_v6 }
 0x244   :  { %323 = vst [vmem:[%s575_s4] sm:$0xff] %v322_v7 }
 0x245   :  { %328 = vsyncpa [#allocation3], 1 }

// kernel: _lambda_.39
= control target key start
LH: loop header
LB: loop body
LE: loop exit
PB: predicated region body
PF: predicated region fallthrough
CT: control target
= control target key end

     0   :  { %vm17_vm0 = vcmask 130048   ;;  %s182_s0 = inlined_call_operand.vmem [shape: f32[16,128], index: 0, kind: input, shape index: {}]   ;;  %s183_s1 = inlined_call_operand.vmem [shape: f32[16,16], index: 1, kind: input, shape index: {}]   ;;  %s184_s2 = inlined_call_operand.vmem [shape: f32[16,128], index: 2, kind: output, shape index: {}]  }
   0x1   :  { %v11_v0 = vld [vmem:[%s182_s0] sm:$0xff]  ;;  %v12_v1 = vld [vmem:[%s182_s0 + $0x8] sm:$0xff] }
   0x2   :  { %v15_v2 = vld [vmem:[%s183_s1] sm:$0xff]  ;;  %v13_v3 = vmax.f32 %v11_v0, 0.0  ;;  %v14_v4 = vmax.f32 %v12_v1, 0.0  ;;  %v16_v6 = vld [vmem:[%s183_s1 + $0x8] sm:$0xff] }
   0x3   :  { %138 = vmatprep.mubr.msk.f32.mxu0 %vm17_vm0, %v15_v2 }
   0x4   :  { %v141_v5 = vpack.c.bf16 %v14_v4, %v13_v3 }
   0x6   :  { %142 = vmatprep.subr.bf16.mxu0 %v141_v5 }
   0x7   :  { %144 = vmatpush3.bf16.msra.mxu0 %v141_v5 }
   0xa   :  { %139 = vmatmul.mubr.msk.f32.vlgmr.msra.gmra.mrb[0].mxu0 %vm17_vm0, %v16_v6 }
  0xdd   :  { %v140_v7 = vpop.f32.mrb[0].mxu0 }
  0xde   :  { %v90_v8 = vpop.f32.mrb[1].mxu0 }
  0xdf   :  { %99 = vadd.xlane.f32.xlu0 %v90_v8 }
  0xe3   :  { %101 = vadd.xlane.f32.xlu0 %v140_v7 }
 0x16c   :  { %v100_v9 = vpop.xlane.xlu0 %99 }
 0x16d   :  { %v104_v10 = vmul.f32 0.0078125, %v100_v9 }
 0x16f   :  { %v106_v11 = vsub.f32 %v90_v8, %v104_v10 }
 0x170   :  { %v102_v12 = vpop.xlane.xlu0 %101 }
 0x171   :  { %v105_v13 = vmul.f32 0.0078125, %v102_v12  ;;  %v108_v14 = vmul.f32 %v106_v11, %v106_v11 }
 0x173   :  { %v107_v15 = vsub.f32 %v140_v7, %v105_v13  ;;  %110 = vadd.xlane.f32.xlu1 %v108_v14 }
 0x175   :  { %v109_v16 = vmul.f32 %v107_v15, %v107_v15 }
 0x177   :  { %112 = vadd.xlane.f32.xlu1 %v109_v16 }
 0x200   :  { %v111_v17 = vpop.xlane.xlu1 %110 }
 0x201   :  { %v114_v18 = vmul.f32 0.0078125, %v111_v17 }
 0x203   :  { %v116_v19 = vadd.f32 1e-05, %v114_v18 }
 0x204   :  { %v113_v20 = vpop.xlane.xlu1 %112 }
 0x205   :  { %145 = vrsqrt.f32 %v116_v19  ;;  %v115_v21 = vmul.f32 0.0078125, %v113_v20 }
 0x207   :  { %v117_v22 = vadd.f32 1e-05, %v115_v21 }
 0x209   :  { %147 = vrsqrt.f32 %v117_v22 }
 0x20f   :  { %v146_v23 = vpop.eup %145 }
 0x210   :  { %v120_v24 = vmul.f32 %v146_v23, %v106_v11 }
 0x212   :  { %122 = vst [vmem:[%s184_s2] sm:$0xff] %v120_v24 }
 0x213   :  { %v148_v25 = vpop.eup %147 }
 0x214   :  { %v121_v26 = vmul.f32 %v148_v25, %v107_v15 }
 0x216   :  { %123 = vst [vmem:[%s184_s2 + $0x8] sm:$0xff] %v121_v26 }

// kernel: _lambda_.37
= control target key start
LH: loop header
LB: loop body
LE: loop exit
PB: predicated region body
PF: predicated region fallthrough
CT: control target
= control target key end

     0   :  { %10 = vsyncpa [#allocation3], 0  ;;  %s441_s0 = inlined_call_operand.vmem [shape: f32[5], index: 0, kind: input, shape index: {}]   ;;  %s442_s1 = inlined_call_operand.vmem [shape: f32[72,128], index: 1, kind: input, shape index: {}]   ;;  %s443_s2 = inlined_call_operand.vmem [shape: f32[8,128], index: 2, kind: input, shape index: {}]   ;;  %s444_s3 = inlined_call_operand.vmem [shape: f32[2,8,72], index: 3, kind: input, shape index: {}]   ;;  %s445_s4 = inlined_call_operand.vmem [shape: f32[8,128], index: 4, kind: input, shape index: {}]   ;;  %s446_s5 = inlined_call_operand.vmem [shape: f32[8,128], index: 5, kind: output, shape index: {}]  }
   0x1   :  { %s17_s20 = sshll.u32 %s441_s0, 4  ;;  %s18_s20 = int_to_ptr.vmem [resolvable:$true] %s17_s20 }
   0x2   :  { %s348_s21 = scalar_lea.vmem %s18_s20, 16  ;;  %p353_p1 = scmp.lt.s32.totalorder %s18_s20, %s18_s20 }
   0x3   :  { %p349_p0 = scmp.ne.s32.totalorder %s18_s20, %s348_s21  ;;  %p354_p2 = scmp.lt.s32.totalorder %s348_s21, %s348_s21 }
   0x5   :  { %p355_p3 = por %p354_p2, %p353_p1 }
   0x7   :  { %p356_p4 = pnand %p355_p3, %p349_p0 }
   0x9   :  { %359 = shalt.err (!%p356_p4)
}
   0xa   :  { %s362_s22 = smov [#allocation2]  }
   0xb   :  { %20 = dma.vmem_to_smem %s18_s20, 16, %s362_s22, [#allocation3]  }
   0xc   :  { %360 = dma.done.wait [#allocation3], 16  }
   0xd   :  { %361 = vsyncadd [#allocation3], 4294967280 }
   0xe   :  { %32 = sfence }
   0xf   :  { %v33_v0 = vld [vmem:[%s442_s1] sm:$0xff]  ;;  %v34_v1 = vld [vmem:[%s442_s1 + $0x8] sm:$0xff]  ;;  %v35_v2 = vld [vmem:[%s442_s1 + $0x10] sm:$0xff]  ;;  %v363_v3 = vmov 0.0|0.0   ;;  %vm364_vm0 = vmmov 0   ;;  %v365_v11 = vmov 0.0  }
  0x10   :  { %316 = vmatprep.subr.bf16.mxu0 %v363_v3  ;;  %v42_v4 = vmax.f32 %v33_v0, 0.0  ;;  %v43_v5 = vmax.f32 %v34_v1, 0.0  ;;  %328 = vmatprep.subr.bf16.mxu1 %v363_v3  ;;  %v36_v6 = vld [vmem:[%s442_s1 + $0x18] sm:$0xff]  ;;  %v44_v7 = vmax.f32 %v35_v2, 0.0  ;;  %v37_v9 = vld [vmem:[%s442_s1 + $0x20] sm:$0xff]  ;;  %v38_v10 = vld [vmem:[%s442_s1 + $0x28] sm:$0xff] }
  0x11   :  { %v45_v8 = vmax.f32 %v36_v6, 0.0  ;;  %292 = vmatprep.mubr.msk.f32.mxu0 %vm364_vm0, %v365_v11  ;;  %313 = vmatprep.mubr.msk.f32.mxu1 %vm364_vm0, %v365_v11  ;;  %v46_v14 = vmax.f32 %v37_v9, 0.0  ;;  %v47_v15 = vmax.f32 %v38_v10, 0.0  ;;  %v39_v16 = vld [vmem:[%s442_s1 + $0x30] sm:$0xff]  ;;  %v40_v17 = vld [vmem:[%s442_s1 + $0x38] sm:$0xff]  ;;  %v41_v22 = vld [vmem:[%s442_s1 + $0x40] sm:$0xff] }
  0x12   :  { %v317_v12 = vpack.c.bf16 %v43_v5, %v42_v4  ;;  %v48_v19 = vmax.f32 %v39_v16, 0.0  ;;  %v49_v20 = vmax.f32 %v40_v17, 0.0  ;;  %v50_v23 = vmax.f32 %v41_v22, 0.0  ;;  %v52_v24 = vld [vmem:[%s444_s3] sm:$0xff]  ;;  %v250_v25 = vld [vmem:[%s444_s3 + $0x8] sm:$0xff]  ;;  %s247_s1 = sld [smem:[#allocation2 + $0x3]] }
  0x13   :  { %v320_v13 = vpack.c.bf16 %v45_v8, %v44_v7  ;;  %v323_v18 = vpack.c.bf16 %v47_v15, %v46_v14  ;;  %vm53_vm1 = vcmask 588800   ;;  %s249_s3 = sld [smem:[#allocation2 + $0x2]]  ;;  %s252_s19 = sld [smem:[#allocation2 + $0x1]]  ;;  %v232_v49 = vld [vmem:[%s445_s4] sm:$0xff] }
  0x14   :  { %318 = vmatpush3.bf16.msra.mxu0 %v317_v12  ;;  %330 = vmatpush3.bf16.msra.mxu1 %v317_v12  ;;  %v326_v21 = vpack.c.bf16 %v49_v20, %v48_v19  ;;  %s253_s20 = sld [smem:[#allocation2 + $0x4]]  ;;  %v237_v52 = vld [vmem:[%s443_s2] sm:$0xff] }
  0x15   :  { %319 = vmatprep.subr.bf16.mxu0 %v363_v3  ;;  %331 = vmatprep.subr.bf16.mxu1 %v363_v3 }
  0x18   :  { %321 = vmatpush3.bf16.msra.mxu0 %v320_v13  ;;  %333 = vmatpush3.bf16.msra.mxu1 %v320_v13  ;;  %v139_v47 = vstv %s247_s1 }
  0x19   :  { %322 = vmatprep.subr.bf16.mxu0 %v363_v3  ;;  %334 = vmatprep.subr.bf16.mxu1 %v363_v3  ;;  %v228_v48 = vstv %s249_s3  ;;  %v233_v50 = vstv %s252_s19 }
  0x1a   :  { %v238_v53 = vstv %s253_s20  ;;  %v234_v55 = vmul.f32 %v233_v50, %v232_v49 }
  0x1b   :  { %v239_v57 = vmul.f32 %v238_v53, %v237_v52 }
  0x1c   :  { %324 = vmatpush3.bf16.msra.mxu0 %v323_v18  ;;  %336 = vmatpush3.bf16.msra.mxu1 %v323_v18 }
  0x1d   :  { %325 = vmatprep.subr.bf16.mxu0 %v363_v3  ;;  %337 = vmatprep.subr.bf16.mxu1 %v363_v3 }
  0x20   :  { %327 = vmatpush3.bf16.msra.mxu0 %v326_v21  ;;  %339 = vmatpush3.bf16.msra.mxu1 %v326_v21 }
  0x21   :  { %290 = vmatprep.subr.mxu0 %v365_v11  ;;  %311 = vmatprep.subr.mxu1 %v365_v11 }
  0x24   :  { %291 = vmatpush3.msra.mxu0 %v50_v23  ;;  %312 = vmatpush3.msra.mxu1 %v50_v23 }
  0x25   :  { %293 = vmatmul.mubr.msk.f32.vlgmr.msra.gmra.mrb[0].mxu0 %vm53_vm1, %v52_v24  ;;  %314 = vmatmul.mubr.msk.f32.vlgmr.msra.gmra.mrb[0].mxu1 %vm53_vm1, %v250_v25 }
  0xf8   :  { %v123_v26 = vpop.f32.mrb[0].mxu0  ;;  %v213_v27 = vpop.f32.mrb[0].mxu1 }
  0xf9   :  { %127 = vadd.xlane.f32.xlu0 %v123_v26  ;;  %v294_v28 = vpop.f32.mrb[1].mxu0  ;;  %v315_v29 = vpop.f32.mrb[1].mxu1 }
  0xfd   :  { %217 = vadd.xlane.f32.xlu0 %v213_v27 }
 0x186   :  { %v128_v30 = vpop.xlane.xlu0 %127 }
 0x187   :  { %v130_v31 = vmul.f32 0.0078125, %v128_v30 }
 0x189   :  { %v131_v32 = vsub.f32 %v123_v26, %v130_v31 }
 0x18a   :  { %v218_v33 = vpop.xlane.xlu0 %217 }
 0x18b   :  { %v219_v34 = vmul.f32 0.0078125, %v218_v33  ;;  %v132_v35 = vmul.f32 %v131_v32, %v131_v32 }
 0x18d   :  { %v220_v36 = vsub.f32 %v213_v27, %v219_v34  ;;  %133 = vadd.xlane.f32.xlu1 %v132_v35 }
 0x18f   :  { %v221_v37 = vmul.f32 %v220_v36, %v220_v36 }
 0x191   :  { %222 = vadd.xlane.f32.xlu1 %v221_v37 }
 0x21a   :  { %v134_v38 = vpop.xlane.xlu1 %133 }
 0x21b   :  { %v135_v39 = vmul.f32 0.0078125, %v134_v38 }
 0x21d   :  { %v136_v40 = vadd.f32 1e-05, %v135_v39 }
 0x21e   :  { %v223_v41 = vpop.xlane.xlu1 %222 }
 0x21f   :  { %344 = vrsqrt.f32 %v136_v40  ;;  %v224_v42 = vmul.f32 0.0078125, %v223_v41 }
 0x221   :  { %v225_v43 = vadd.f32 1e-05, %v224_v42 }
 0x223   :  { %346 = vrsqrt.f32 %v225_v43 }
 0x229   :  { %v345_v44 = vpop.eup %344 }
 0x22a   :  { %v138_v45 = vmul.f32 %v345_v44, %v131_v32 }
 0x22c   :  { %v140_v54 = vmul.f32 %v139_v47, %v138_v45 }
 0x22d   :  { %v347_v46 = vpop.eup %346 }
 0x22e   :  { %v227_v51 = vmul.f32 %v347_v46, %v220_v36 }
 0x230   :  { %v229_v56 = vmul.f32 %v228_v48, %v227_v51 }
 0x232   :  { %v230_v58 = vadd.f32 %v229_v56, %v140_v54 }
 0x234   :  { %v235_v59 = vadd.f32 %v234_v55, %v230_v58 }
 0x236   :  { %v240_v60 = vadd.f32 %v239_v57, %v235_v59 }
 0x238   :  { %241 = vst [vmem:[%s446_s5] sm:$0xff] %v240_v60 }
 0x239   :  { %246 = vsyncpa [#allocation3], 1 }

// kernel: _lambda_.38
= control target key start
LH: loop header
LB: loop body
LE: loop exit
PB: predicated region body
PF: predicated region fallthrough
CT: control target
= control target key end

     0   :  { %v221_v0 = vmov 0.0   ;;  %vm222_vm0 = vmmov 0   ;;  %vm20_vm1 = vcmask 64512   ;;  %s266_s0 = inlined_call_operand.vmem [shape: f32[8,128], index: 0, kind: input, shape index: {}]   ;;  %s267_s2 = inlined_call_operand.vmem [shape: f32[8,8], index: 2, kind: input, shape index: {}]   ;;  %s268_s1 = inlined_call_operand.vmem [shape: f32[8,128], index: 1, kind: input, shape index: {}]   ;;  %s269_s3 = inlined_call_operand.vmem [shape: f32[8,8], index: 3, kind: input, shape index: {}]   ;;  %s270_s4 = inlined_call_operand.vmem [shape: f32[16,128], index: 4, kind: output, shape index: {}]  }
   0x1   :  { %205 = vmatprep.subr.mxu0 %v221_v0  ;;  %v18_v1 = vld [vmem:[%s266_s0] sm:$0xff]  ;;  %207 = vmatprep.mubr.msk.f32.mxu0 %vm222_vm0, %v221_v0 }
   0x2   :  { %v95_v2 = vld [vmem:[%s268_s1] sm:$0xff]  ;;  %v19_v3 = vmax.f32 %v18_v1, 0.0  ;;  %210 = vmatprep.subr.mxu1 %v221_v0  ;;  %212 = vmatprep.mubr.msk.f32.mxu1 %vm222_vm0, %v221_v0 }
   0x3   :  { %v17_v4 = vld [vmem:[%s267_s2] sm:$0xff]  ;;  %v96_v5 = vmax.f32 %v95_v2, 0.0 }
   0x4   :  { %v94_v6 = vld [vmem:[%s269_s3] sm:$0xff]  ;;  %206 = vmatpush3.msra.mxu0 %v19_v3 }
   0x5   :  { %211 = vmatpush3.msra.mxu1 %v96_v5  ;;  %208 = vmatmul.mubr.msk.f32.vlgmr.msra.gmra.mrb[0].mxu0 %vm20_vm1, %v17_v4 }
   0x6   :  { %213 = vmatmul.mubr.msk.f32.vlgmr.msra.gmra.mrb[0].mxu1 %vm20_vm1, %v94_v6 }
  0xd8   :  { %v90_v7 = vpop.f32.mrb[0].mxu0 }
  0xd9   :  { %v166_v8 = vpop.f32.mrb[0].mxu1  ;;  %170 = vadd.xlane.f32.xlu0 %v90_v7  ;;  %v209_v9 = vpop.f32.mrb[1].mxu0 }
  0xda   :  { %v214_v10 = vpop.f32.mrb[1].mxu1 }
  0xdd   :  { %183 = vadd.xlane.f32.xlu0 %v166_v8 }
 0x166   :  { %v171_v11 = vpop.xlane.xlu0 %170 }
 0x167   :  { %v173_v12 = vmul.f32 0.0078125, %v171_v11 }
 0x169   :  { %v174_v13 = vsub.f32 %v90_v7, %v173_v12 }
 0x16a   :  { %v184_v14 = vpop.xlane.xlu0 %183 }
 0x16b   :  { %v185_v15 = vmul.f32 0.0078125, %v184_v14  ;;  %v175_v16 = vmul.f32 %v174_v13, %v174_v13 }
 0x16d   :  { %v186_v17 = vsub.f32 %v166_v8, %v185_v15  ;;  %176 = vadd.xlane.f32.xlu1 %v175_v16 }
 0x16f   :  { %v187_v18 = vmul.f32 %v186_v17, %v186_v17 }
 0x171   :  { %188 = vadd.xlane.f32.xlu1 %v187_v18 }
 0x1fa   :  { %v177_v19 = vpop.xlane.xlu1 %176 }
 0x1fb   :  { %v178_v20 = vmul.f32 0.0078125, %v177_v19 }
 0x1fd   :  { %v179_v21 = vadd.f32 1e-05, %v178_v20 }
 0x1fe   :  { %v189_v22 = vpop.xlane.xlu1 %188 }
 0x1ff   :  { %217 = vrsqrt.f32 %v179_v21  ;;  %v190_v23 = vmul.f32 0.0078125, %v189_v22 }
 0x201   :  { %v191_v24 = vadd.f32 1e-05, %v190_v23 }
 0x203   :  { %219 = vrsqrt.f32 %v191_v24 }
 0x209   :  { %v218_v25 = vpop.eup %217 }
 0x20a   :  { %v181_v26 = vmul.f32 %v218_v25, %v174_v13 }
 0x20c   :  { %182 = vst [vmem:[%s270_s4] sm:$0xff] %v181_v26 }
 0x20d   :  { %v220_v27 = vpop.eup %219 }
 0x20e   :  { %v193_v28 = vmul.f32 %v220_v27, %v186_v17 }
 0x210   :  { %194 = vst [vmem:[%s270_s4 + $0x8] sm:$0xff] %v193_v28 }

// kernel: _lambda_.43
= control target key start
LH: loop header
LB: loop body
LE: loop exit
PB: predicated region body
PF: predicated region fallthrough
CT: control target
= control target key end

     0   :  { %9 = vsyncpa [#allocation3], 0  ;;  %s820_s0 = inlined_call_operand.vmem [shape: f32[5], index: 0, kind: input, shape index: {}]   ;;  %s821_s1 = inlined_call_operand.vmem [shape: f32[144,32], index: 1, kind: input, shape index: {}]   ;;  %s822_s2 = inlined_call_operand.vmem [shape: f32[16,32], index: 2, kind: input, shape index: {}]   ;;  %s823_s3 = inlined_call_operand.vmem [shape: f32[3,16,144], index: 3, kind: input, shape index: {}]   ;;  %s824_s4 = inlined_call_operand.vmem [shape: f32[16,32], index: 4, kind: output, shape index: {}]  }
   0x1   :  { %s16_s17 = sshll.u32 %s820_s0, 4  ;;  %s17_s17 = int_to_ptr.vmem [resolvable:$true] %s16_s17 }
   0x2   :  { %s566_s18 = scalar_lea.vmem %s17_s17, 16  ;;  %p571_p1 = scmp.lt.s32.totalorder %s17_s17, %s17_s17 }
   0x3   :  { %p567_p0 = scmp.ne.s32.totalorder %s17_s17, %s566_s18  ;;  %p572_p2 = scmp.lt.s32.totalorder %s566_s18, %s566_s18 }
   0x5   :  { %p573_p3 = por %p572_p2, %p571_p1 }
   0x7   :  { %p574_p4 = pnand %p573_p3, %p567_p0 }
   0x9   :  { %577 = shalt.err (!%p574_p4)
}
   0xa   :  { %s580_s19 = smov [#allocation2]  }
   0xb   :  { %19 = dma.vmem_to_smem %s17_s17, 16, %s580_s19, [#allocation3]  }
   0xc   :  { %578 = dma.done.wait [#allocation3], 16  }
   0xd   :  { %579 = vsyncadd [#allocation3], 4294967280 }
   0xe   :  { %29 = sfence }
   0xf   :  { %v30_v0 = vld [vmem:[%s821_s1] sm:$0xff]  ;;  %v31_v1 = vld [vmem:[%s821_s1 + $0x8] sm:$0xff]  ;;  %v32_v2 = vld [vmem:[%s821_s1 + $0x10] sm:$0xff]  ;;  %v581_v3 = vmov 0.0|0.0   ;;  %vm71_vm0 = vcmask 130048   ;;  %vm153_vm1 = vcmask 261120  }
  0x10   :  { %453 = vmatprep.subr.bf16.mxu0 %v581_v3  ;;  %480 = vmatprep.subr.bf16.mxu1 %v581_v3  ;;  %v48_v4 = vmax.f32 %v30_v0, 0.0  ;;  %v49_v5 = vmax.f32 %v31_v1, 0.0  ;;  %v33_v6 = vld [vmem:[%s821_s1 + $0x18] sm:$0xff]  ;;  %v50_v7 = vmax.f32 %v32_v2, 0.0  ;;  %v34_v9 = vld [vmem:[%s821_s1 + $0x20] sm:$0xff]  ;;  %v35_v10 = vld [vmem:[%s821_s1 + $0x28] sm:$0xff] }
  0x11   :  { %v51_v8 = vmax.f32 %v33_v6, 0.0  ;;  %v52_v13 = vmax.f32 %v34_v9, 0.0  ;;  %v53_v14 = vmax.f32 %v35_v10, 0.0  ;;  %v36_v15 = vld [vmem:[%s821_s1 + $0x30] sm:$0xff]  ;;  %v37_v16 = vld [vmem:[%s821_s1 + $0x38] sm:$0xff]  ;;  %v68_v17 = vld [vmem:[%s823_s3 + $0x8] sm:$0xff] }
  0x12   :  { %v630_v11 = vpack.c.bf16 %v49_v5, %v48_v4  ;;  %v440_v18 = vld [vmem:[%s823_s3 + $0x28] sm:$0xff]  ;;  %436 = vmatprep.mubr.msk.f32.mxu0 %vm71_vm0, %v68_v17  ;;  %v54_v20 = vmax.f32 %v36_v15, 0.0  ;;  %v55_v21 = vmax.f32 %v37_v16, 0.0  ;;  %v38_v22 = vld [vmem:[%s821_s1 + $0x40] sm:$0xff]  ;;  %v40_v27 = vld [vmem:[%s821_s1 + $0x50] sm:$0xff]  ;;  %s435_s24 = sld [smem:[#allocation2 + $0x3]] }
  0x13   :  { %v634_v12 = vpack.c.bf16 %v51_v8, %v50_v7  ;;  %443 = vmatprep.mubr.msk.f32.mxu1 %vm71_vm0, %v440_v18  ;;  %v654_v19 = vpack.c.bf16 %v53_v14, %v52_v13  ;;  %v39_v23 = vld [vmem:[%s821_s1 + $0x48] sm:$0xff]  ;;  %v56_v25 = vmax.f32 %v38_v22, 0.0  ;;  %v41_v28 = vld [vmem:[%s821_s1 + $0x58] sm:$0xff]  ;;  %v58_v30 = vmax.f32 %v40_v27, 0.0  ;;  %v42_v32 = vld [vmem:[%s821_s1 + $0x60] sm:$0xff]  ;;  %s445_s25 = sld [smem:[#allocation2 + $0x1]] }
  0x14   :  { %455 = vmatpush1.bf16.msra.mxu0 %v630_v11  ;;  %482 = vmatpush1.bf16.msra.mxu1 %v630_v11  ;;  %v666_v24 = vpack.c.bf16 %v55_v21, %v54_v20  ;;  %v57_v26 = vmax.f32 %v39_v23, 0.0  ;;  %v59_v31 = vmax.f32 %v41_v28, 0.0  ;;  %v43_v33 = vld [vmem:[%s821_s1 + $0x68] sm:$0xff]  ;;  %v60_v35 = vmax.f32 %v42_v32, 0.0  ;;  %v44_v37 = vld [vmem:[%s821_s1 + $0x70] sm:$0xff]  ;;  %v45_v38 = vld [vmem:[%s821_s1 + $0x78] sm:$0xff] }
  0x15   :  { %456 = vmatprep.subr.bf16.mxu0 %v581_v3  ;;  %483 = vmatprep.subr.bf16.mxu1 %v581_v3  ;;  %v61_v36 = vmax.f32 %v43_v33, 0.0  ;;  %v62_v40 = vmax.f32 %v44_v37, 0.0  ;;  %v63_v41 = vmax.f32 %v45_v38, 0.0  ;;  %v46_v42 = vld [vmem:[%s821_s1 + $0x80] sm:$0xff]  ;;  %v47_v43 = vld [vmem:[%s821_s1 + $0x88] sm:$0xff]  ;;  %v70_v50 = vld [vmem:[%s823_s3 + $0x18] sm:$0xff] }
  0x16   :  { %v678_v29 = vpack.c.bf16 %v57_v26, %v56_v25  ;;  %v690_v34 = vpack.c.bf16 %v59_v31, %v58_v30  ;;  %v64_v45 = vmax.f32 %v46_v42, 0.0  ;;  %v65_v46 = vmax.f32 %v47_v43, 0.0  ;;  %v67_v48 = vld [vmem:[%s823_s3] sm:$0xff]  ;;  %v442_v51 = vld [vmem:[%s823_s3 + $0x38] sm:$0xff]  ;;  %v69_v52 = vld [vmem:[%s823_s3 + $0x10] sm:$0xff]  ;;  %s452_s26 = sld [smem:[#allocation2 + $0x4]] }
  0x17   :  { %v702_v39 = vpack.c.bf16 %v61_v36, %v60_v35  ;;  %v475_v44 = vpack.c.bf16 %v63_v41, %v62_v40  ;;  %v439_v49 = vld [vmem:[%s823_s3 + $0x20] sm:$0xff]  ;;  %v441_v53 = vld [vmem:[%s823_s3 + $0x30] sm:$0xff]  ;;  %v447_v54 = vld [vmem:[%s823_s3 + $0x48] sm:$0xff] }
  0x18   :  { %458 = vmatpush1.bf16.msra.mxu0 %v634_v12  ;;  %485 = vmatpush1.bf16.msra.mxu1 %v634_v12  ;;  %v478_v47 = vpack.c.bf16 %v65_v46, %v64_v45  ;;  %v449_v55 = vld [vmem:[%s823_s3 + $0x58] sm:$0xff]  ;;  %v446_v56 = vld [vmem:[%s823_s3 + $0x40] sm:$0xff]  ;;  %v448_v57 = vld [vmem:[%s823_s3 + $0x50] sm:$0xff]  ;;  %s438_s3 = sld [smem:[#allocation2 + $0x2]] }
  0x19   :  { %459 = vmatprep.subr.bf16.mxu0 %v581_v3  ;;  %486 = vmatprep.subr.bf16.mxu1 %v581_v3 }
  0x1c   :  { %461 = vmatpush1.bf16.msra.mxu0 %v654_v19  ;;  %488 = vmatpush1.bf16.msra.mxu1 %v654_v19 }
  0x1d   :  { %462 = vmatprep.subr.bf16.mxu0 %v581_v3  ;;  %489 = vmatprep.subr.bf16.mxu1 %v581_v3 }
  0x20   :  { %464 = vmatpush1.bf16.msra.mxu0 %v666_v24  ;;  %491 = vmatpush1.bf16.msra.mxu1 %v666_v24 }
  0x21   :  { %465 = vmatprep.subr.bf16.mxu0 %v581_v3  ;;  %492 = vmatprep.subr.bf16.mxu1 %v581_v3 }
  0x24   :  { %467 = vmatpush1.bf16.msra.mxu0 %v678_v29  ;;  %494 = vmatpush1.bf16.msra.mxu1 %v678_v29 }
  0x25   :  { %468 = vmatprep.subr.bf16.mxu0 %v581_v3  ;;  %495 = vmatprep.subr.bf16.mxu1 %v581_v3 }
  0x28   :  { %470 = vmatpush1.bf16.msra.mxu0 %v690_v34  ;;  %497 = vmatpush1.bf16.msra.mxu1 %v690_v34 }
  0x29   :  { %471 = vmatprep.subr.bf16.mxu0 %v581_v3  ;;  %498 = vmatprep.subr.bf16.mxu1 %v581_v3 }
  0x2c   :  { %473 = vmatpush1.bf16.msra.mxu0 %v702_v39  ;;  %500 = vmatpush1.bf16.msra.mxu1 %v702_v39 }
  0x2d   :  { %474 = vmatprep.subr.bf16.mxu0 %v581_v3  ;;  %501 = vmatprep.subr.bf16.mxu1 %v581_v3 }
  0x30   :  { %476 = vmatpush1.bf16.msra.mxu0 %v475_v44  ;;  %503 = vmatpush1.bf16.msra.mxu1 %v475_v44 }
  0x31   :  { %477 = vmatprep.subr.bf16.mxu0 %v581_v3  ;;  %504 = vmatprep.subr.bf16.mxu1 %v581_v3 }
  0x34   :  { %479 = vmatpush1.bf16.msra.mxu0 %v478_v47  ;;  %506 = vmatpush1.bf16.msra.mxu1 %v478_v47 }
  0x35   :  { %507 = vmatprep.subr.bf16.mxu0 %v581_v3  ;;  %534 = vmatprep.subr.bf16.mxu1 %v581_v3 }
  0x37   :  { %143 = vmatmul.mubr.f32.vlgmr.msra.gmra.mrb[0].mxu0 %v67_v48  ;;  %261 = vmatmul.mubr.f32.vlgmr.msra.gmra.mrb[0].mxu1 %v439_v49 }
  0x38   :  { %509 = vmatpush1.bf16.msra.mxu0 %v630_v11  ;;  %543 = vmatpush1.bf16.msra.mxu1 %v630_v11 }
  0x39   :  { %437 = vmatprep.mubr.msk.f32.mxu0 %vm71_vm0, %v70_v50  ;;  %444 = vmatprep.mubr.msk.f32.mxu1 %vm71_vm0, %v442_v51 }
  0x3a   :  { %510 = vmatprep.subr.bf16.mxu0 %v581_v3  ;;  %535 = vmatprep.subr.bf16.mxu1 %v581_v3 }
  0x3b   :  { %148 = vmatmul.mubr.f32.gmra.mrb[2].mxu0 %v69_v52  ;;  %266 = vmatmul.mubr.f32.gmra.mrb[2].mxu1 %v441_v53 }
  0x3c   :  { %512 = vmatpush1.bf16.msra.mxu0 %v634_v12  ;;  %544 = vmatpush1.bf16.msra.mxu1 %v634_v12 }
  0x3d   :  { %513 = vmatprep.subr.bf16.mxu0 %v581_v3  ;;  %536 = vmatprep.subr.bf16.mxu1 %v581_v3 }
  0x3e   :  { %450 = vmatprep.mubr.msk.f32.mxu0 %vm71_vm0, %v447_v54  ;;  %451 = vmatprep.mubr.msk.f32.mxu1 %vm71_vm0, %v449_v55 }
  0x40   :  { %515 = vmatpush1.bf16.msra.mxu0 %v654_v19  ;;  %545 = vmatpush1.bf16.msra.mxu1 %v654_v19 }
  0x41   :  { %516 = vmatprep.subr.bf16.mxu0 %v581_v3  ;;  %537 = vmatprep.subr.bf16.mxu1 %v581_v3 }
  0x44   :  { %518 = vmatpush1.bf16.msra.mxu0 %v666_v24  ;;  %546 = vmatpush1.bf16.msra.mxu1 %v666_v24 }
  0x45   :  { %519 = vmatprep.subr.bf16.mxu0 %v581_v3  ;;  %538 = vmatprep.subr.bf16.mxu1 %v581_v3 }
  0x48   :  { %521 = vmatpush1.bf16.msra.mxu0 %v678_v29  ;;  %547 = vmatpush1.bf16.msra.mxu1 %v678_v29 }
  0x49   :  { %522 = vmatprep.subr.bf16.mxu0 %v581_v3  ;;  %539 = vmatprep.subr.bf16.mxu1 %v581_v3 }
  0x4c   :  { %524 = vmatpush1.bf16.msra.mxu0 %v690_v34  ;;  %548 = vmatpush1.bf16.msra.mxu1 %v690_v34 }
  0x4d   :  { %525 = vmatprep.subr.bf16.mxu0 %v581_v3  ;;  %540 = vmatprep.subr.bf16.mxu1 %v581_v3 }
  0x50   :  { %527 = vmatpush1.bf16.msra.mxu0 %v702_v39  ;;  %549 = vmatpush1.bf16.msra.mxu1 %v702_v39 }
  0x51   :  { %528 = vmatprep.subr.bf16.mxu0 %v581_v3  ;;  %541 = vmatprep.subr.bf16.mxu1 %v581_v3 }
  0x54   :  { %530 = vmatpush1.bf16.msra.mxu0 %v475_v44  ;;  %550 = vmatpush1.bf16.msra.mxu1 %v475_v44 }
  0x55   :  { %531 = vmatprep.subr.bf16.mxu0 %v581_v3  ;;  %542 = vmatprep.subr.bf16.mxu1 %v581_v3 }
  0x58   :  { %533 = vmatpush1.bf16.msra.mxu0 %v478_v47  ;;  %551 = vmatpush1.bf16.msra.mxu1 %v478_v47 }
  0x5b   :  { %379 = vmatmul.mubr.f32.vlgmr.msra.gmra.mrb[4].mxu0 %v446_v56  ;;  %384 = vmatmul.mubr.f32.vlgmr.msra.gmra.mrb[4].mxu1 %v448_v57 }
 0x10a   :  { %v144_v58 = vpop.f32.mrb[0].mxu0  ;;  %v262_v59 = vpop.f32.mrb[0].mxu1 }
 0x10b   :  { %v146_v60 = vpop.f32.mrb[1].mxu0  ;;  %v264_v61 = vpop.f32.mrb[1].mxu1  ;;  %v271_v62 = vsel %vm153_vm1, %v262_v59, 0.0  ;;  %v154_v63 = vsel %vm153_vm1, %v144_v58, 0.0 }
 0x10c   :  { %272 = vadd.xlane.f32.xlu1 %v271_v62  ;;  %155 = vadd.xlane.f32.xlu0 %v154_v63 }
 0x10e   :  { %v149_v0 = vpop.f32.mrb[2].mxu0  ;;  %v267_v1 = vpop.f32.mrb[2].mxu1 }
 0x10f   :  { %v274_v2 = vsel %vm153_vm1, %v267_v1, 0.0  ;;  %v157_v3 = vsel %vm153_vm1, %v149_v0, 0.0  ;;  %v151_v4 = vpop.f32.mrb[3].mxu0  ;;  %v269_v5 = vpop.f32.mrb[3].mxu1 }
 0x110   :  { %275 = vadd.xlane.f32.xlu1 %v274_v2  ;;  %158 = vadd.xlane.f32.xlu0 %v157_v3  ;;  %v297_v3 = vstv %s438_s3  ;;  %v181_v5 = vstv %s435_s24 }
 0x12e   :  { %v380_v6 = vpop.f32.mrb[4].mxu0  ;;  %v385_v7 = vpop.f32.mrb[4].mxu1 }
 0x12f   :  { %v382_v8 = vpop.f32.mrb[5].mxu0  ;;  %v387_v9 = vpop.f32.mrb[5].mxu1  ;;  %v392_v10 = vsel %vm153_vm1, %v385_v7, 0.0  ;;  %v389_v11 = vsel %vm153_vm1, %v380_v6, 0.0 }
 0x130   :  { %393 = vadd.xlane.f32.xlu1 %v392_v10  ;;  %390 = vadd.xlane.f32.xlu0 %v389_v11  ;;  %v415_v9 = vstv %s445_s25  ;;  %v422_v10 = vld [vmem:[%s822_s2 + $0x8] sm:$0xff]  ;;  %v423_v11 = vstv %s452_s26 }
 0x199   :  { %v273_v12 = vpop.xlane.xlu1 %272  ;;  %v156_v13 = vpop.xlane.xlu0 %155 }
 0x19a   :  { %v277_v14 = vmul.f32 0.03125, %v273_v12  ;;  %v161_v15 = vmul.f32 0.03125, %v156_v13 }
 0x19c   :  { %v790_v16 = vsub.f32 %v262_v59, %v277_v14  ;;  %v792_v17 = vsub.f32 %v144_v58, %v161_v15  ;;  %v421_v15 = vld [vmem:[%s822_s2] sm:$0xff] }
 0x19d   :  { %v276_v18 = vpop.xlane.xlu1 %275  ;;  %v159_v19 = vpop.xlane.xlu0 %158 }
 0x19e   :  { %v278_v20 = vmul.f32 0.03125, %v276_v18  ;;  %v162_v21 = vmul.f32 0.03125, %v159_v19  ;;  %v165_v22 = vmul.f32 %v792_v17, %v792_v17  ;;  %v281_v26 = vmul.f32 %v790_v16, %v790_v16 }
 0x19f   :  { %v425_v19 = vmul.f32 %v423_v11, %v422_v10 }
 0x1a0   :  { %v280_v23 = vsub.f32 %v267_v1, %v278_v20  ;;  %v164_v24 = vsub.f32 %v149_v0, %v162_v21  ;;  %v167_v25 = vsel %vm153_vm1, %v165_v22, 0.0  ;;  %v283_v29 = vsel %vm153_vm1, %v281_v26, 0.0 }
 0x1a1   :  { %168 = vadd.xlane.f32.xlu0 %v167_v25  ;;  %v424_v22 = vmul.f32 %v423_v11, %v421_v15 }
 0x1a2   :  { %v166_v27 = vmul.f32 %v164_v24, %v164_v24  ;;  %v282_v30 = vmul.f32 %v280_v23, %v280_v23 }
 0x1a4   :  { %v170_v28 = vsel %vm153_vm1, %v166_v27, 0.0  ;;  %v286_v31 = vsel %vm153_vm1, %v282_v30, 0.0 }
 0x1a5   :  { %171 = vadd.xlane.f32.xlu1 %v170_v28  ;;  %284 = vadd.xlane.f32.xlu0 %v283_v29 }
 0x1a9   :  { %287 = vadd.xlane.f32.xlu1 %v286_v31 }
 0x1bd   :  { %v394_v32 = vpop.xlane.xlu1 %393  ;;  %v391_v33 = vpop.xlane.xlu0 %390 }
 0x1be   :  { %v396_v34 = vmul.f32 0.03125, %v394_v32  ;;  %v395_v35 = vmul.f32 0.03125, %v391_v33 }
 0x1c0   :  { %v398_v36 = vsub.f32 %v385_v7, %v396_v34  ;;  %v397_v37 = vsub.f32 %v380_v6, %v395_v35 }
 0x1c2   :  { %v400_v38 = vmul.f32 %v398_v36, %v398_v36  ;;  %v399_v39 = vmul.f32 %v397_v37, %v397_v37 }
 0x1c4   :  { %v404_v40 = vsel %vm153_vm1, %v400_v38, 0.0  ;;  %v401_v41 = vsel %vm153_vm1, %v399_v39, 0.0 }
 0x1c5   :  { %405 = vadd.xlane.f32.xlu1 %v404_v40  ;;  %402 = vadd.xlane.f32.xlu0 %v401_v41 }
 0x22e   :  { %v169_v43 = vpop.xlane.xlu0 %168 }
 0x22f   :  { %v173_v49 = vmul.f32 0.03125, %v169_v43 }
 0x231   :  { %v175_v53 = vadd.f32 1e-05, %v173_v49 }
 0x232   :  { %v172_v42 = vpop.xlane.xlu1 %171  ;;  %v285_v45 = vpop.xlane.xlu0 %284 }
 0x233   :  { %v289_v47 = vmul.f32 0.03125, %v285_v45  ;;  %v174_v48 = vmul.f32 0.03125, %v172_v42 }
 0x235   :  { %v291_v51 = vadd.f32 1e-05, %v289_v47  ;;  %v176_v52 = vadd.f32 1e-05, %v174_v48 }
 0x236   :  { %v288_v44 = vpop.xlane.xlu1 %287 }
 0x237   :  { %v290_v46 = vmul.f32 0.03125, %v288_v44 }
 0x239   :  { %v292_v50 = vadd.f32 1e-05, %v290_v46 }
 0x23b   :  { %554 = vrsqrt.f32 %v292_v50 }
 0x23c   :  { %556 = vrsqrt.f32 %v291_v51 }
 0x23d   :  { %558 = vrsqrt.f32 %v176_v52 }
 0x23e   :  { %560 = vrsqrt.f32 %v175_v53 }
 0x245   :  { %v555_v60 = vpop.eup %554 }
 0x246   :  { %v557_v61 = vpop.eup %556  ;;  %v296_v0 = vmul.f32 %v555_v60, %v280_v23 }
 0x247   :  { %v559_v62 = vpop.eup %558  ;;  %v295_v1 = vmul.f32 %v557_v61, %v790_v16 }
 0x248   :  { %v561_v63 = vpop.eup %560  ;;  %v180_v2 = vmul.f32 %v559_v62, %v164_v24  ;;  %v299_v6 = vmul.f32 %v297_v3, %v296_v0 }
 0x249   :  { %v179_v4 = vmul.f32 %v561_v63, %v792_v17  ;;  %v298_v8 = vmul.f32 %v297_v3, %v295_v1 }
 0x24a   :  { %v183_v13 = vmul.f32 %v181_v5, %v180_v2 }
 0x24b   :  { %v182_v16 = vmul.f32 %v181_v5, %v179_v4 }
 0x24c   :  { %v301_v17 = vadd.f32 %v299_v6, %v183_v13 }
 0x24d   :  { %v300_v21 = vadd.f32 %v298_v8, %v182_v16 }
 0x252   :  { %v406_v54 = vpop.xlane.xlu1 %405  ;;  %v403_v55 = vpop.xlane.xlu0 %402 }
 0x253   :  { %v408_v56 = vmul.f32 0.03125, %v406_v54  ;;  %v407_v57 = vmul.f32 0.03125, %v403_v55 }
 0x255   :  { %v410_v58 = vadd.f32 1e-05, %v408_v56  ;;  %v409_v59 = vadd.f32 1e-05, %v407_v57 }
 0x257   :  { %562 = vrsqrt.f32 %v410_v58 }
 0x258   :  { %564 = vrsqrt.f32 %v409_v59 }
 0x261   :  { %v563_v7 = vpop.eup %562 }
 0x262   :  { %v565_v12 = vpop.eup %564  ;;  %v414_v14 = vmul.f32 %v563_v7, %v398_v36 }
 0x263   :  { %v413_v18 = vmul.f32 %v565_v12, %v397_v37 }
 0x264   :  { %v417_v20 = vmul.f32 %v415_v9, %v414_v14 }
 0x265   :  { %v416_v23 = vmul.f32 %v415_v9, %v413_v18 }
 0x266   :  { %v419_v24 = vadd.f32 %v417_v20, %v301_v17 }
 0x267   :  { %v418_v25 = vadd.f32 %v416_v23, %v300_v21 }
 0x268   :  { %v427_v26 = vadd.f32 %v425_v19, %v419_v24 }
 0x269   :  { %v426_v27 = vadd.f32 %v424_v22, %v418_v25 }
 0x26a   :  { %429 = vst.msk [vmem:[%s824_s4 + $0x8] sm:$0xff] %vm153_vm1, %v427_v26 }
 0x26b   :  { %428 = vst.msk [vmem:[%s824_s4] sm:$0xff] %vm153_vm1, %v426_v27 }
 0x26c   :  { %434 = vsyncpa [#allocation3], 1 }

// kernel: _lambda_.45
= control target key start
LH: loop header
LB: loop body
LE: loop exit
PB: predicated region body
PF: predicated region fallthrough
CT: control target
= control target key end

     0   :  { %vm18_vm0 = vcmask 261120   ;;  %v151_v8 = vmov 0   ;;  %s237_s0 = inlined_call_operand.vmem [shape: f32[32,32], index: 0, kind: input, shape index: {}]   ;;  %s238_s1 = inlined_call_operand.vmem [shape: f32[32,1], index: 1, kind: input, shape index: {}]   ;;  %s239_s2 = inlined_call_operand.vmem [shape: f32[32,1], index: 2, kind: input, shape index: {}]   ;;  %s240_s3 = inlined_call_operand.vmem [shape: f32[32,32], index: 3, kind: output, shape index: {}]  }
   0x1   :  { %v14_v0 = vld [vmem:[%s237_s0] sm:$0xff]  ;;  %v16_v1 = vld [vmem:[%s237_s0 + $0x10] sm:$0xff]  ;;  %v15_v2 = vld [vmem:[%s237_s0 + $0x8] sm:$0xff]  ;;  %142 = vset.pattern.permute.xlu1 %v151_v8  ;;  %141 = vset.pattern.permute.xlu0 %v151_v8 }
   0x2   :  { %v19_v3 = vsel %vm18_vm0, %v14_v0, 0.0  ;;  %v25_v4 = vsel %vm18_vm0, %v16_v1, 0.0  ;;  %v17_v5 = vld [vmem:[%s237_s0 + $0x18] sm:$0xff]  ;;  %v22_v6 = vsel %vm18_vm0, %v15_v2, 0.0  ;;  %v73_v24 = vld [vmem:[%s238_s1 + $0x8] sm:$0xff]  ;;  %v74_v25 = vld [vmem:[%s238_s1 + $0x10] sm:$0xff] }
   0x3   :  { %20 = vadd.xlane.f32.xlu0 %v19_v3  ;;  %26 = vadd.xlane.f32.xlu1 %v25_v4  ;;  %v28_v7 = vsel %vm18_vm0, %v17_v5, 0.0  ;;  %v72_v26 = vld [vmem:[%s238_s1] sm:$0xff]  ;;  %v75_v27 = vld [vmem:[%s238_s1 + $0x18] sm:$0xff]  ;;  %v101_v29 = vld [vmem:[%s239_s2 + $0x8] sm:$0xff] }
   0x4   :  { %v100_v28 = vld [vmem:[%s239_s2] sm:$0xff]  ;;  %v102_v30 = vld [vmem:[%s239_s2 + $0x10] sm:$0xff]  ;;  %v103_v36 = vld [vmem:[%s239_s2 + $0x18] sm:$0xff] }
   0x7   :  { %23 = vadd.xlane.f32.xlu0 %v22_v6  ;;  %29 = vadd.xlane.f32.xlu1 %v28_v7 }
  0x90   :  { %v21_v9 = vpop.xlane.xlu0 %20  ;;  %v27_v10 = vpop.xlane.xlu1 %26 }
  0x91   :  { %v32_v11 = vmul.f32 0.03125, %v21_v9  ;;  %v34_v12 = vmul.f32 0.03125, %v27_v10 }
  0x93   :  { %v36_v13 = vsub.f32 %v14_v0, %v32_v11  ;;  %v188_v14 = vsub.f32 %v16_v1, %v34_v12 }
  0x94   :  { %v24_v15 = vpop.xlane.xlu0 %23  ;;  %v30_v31 = vpop.xlane.xlu1 %29 }
  0x95   :  { %v33_v16 = vmul.f32 0.03125, %v24_v15  ;;  %v40_v17 = vmul.f32 %v36_v13, %v36_v13  ;;  %v42_v18 = vmul.f32 %v188_v14, %v188_v14  ;;  %v35_v32 = vmul.f32 0.03125, %v30_v31 }
  0x97   :  { %v37_v19 = vsub.f32 %v15_v2, %v33_v16  ;;  %v44_v20 = vsel %vm18_vm0, %v40_v17, 0.0  ;;  %v50_v21 = vsel %vm18_vm0, %v42_v18, 0.0  ;;  %v39_v33 = vsub.f32 %v17_v5, %v35_v32 }
  0x98   :  { %45 = vadd.xlane.f32.xlu0 %v44_v20 }
  0x99   :  { %v41_v22 = vmul.f32 %v37_v19, %v37_v19  ;;  %v43_v34 = vmul.f32 %v39_v33, %v39_v33 }
  0x9b   :  { %v47_v23 = vsel %vm18_vm0, %v41_v22, 0.0  ;;  %v53_v35 = vsel %vm18_vm0, %v43_v34, 0.0 }
  0x9c   :  { %51 = vadd.xlane.f32.xlu0 %v50_v21  ;;  %48 = vadd.xlane.f32.xlu1 %v47_v23 }
  0xad   :  { %83 = vperm.xlu1 %142, %v73_v24  }
  0xb1   :  { %88 = vperm.xlu1 %142, %v74_v25  }
  0xb2   :  { %78 = vperm.xlu0 %141, %v72_v26  }
  0xb5   :  { %93 = vperm.xlu1 %142, %v75_v27  }
  0xb9   :  { %106 = vperm.xlu1 %142, %v100_v28  }
  0xbd   :  { %111 = vperm.xlu1 %142, %v101_v29  }
  0xc1   :  { %116 = vperm.xlu1 %142, %v102_v30  }
  0xe5   :  { %54 = vadd.xlane.f32.xlu1 %v53_v35 }
  0xf6   :  { %121 = vperm.xlu1 %142, %v103_v36  }
 0x125   :  { %v46_v37 = vpop.xlane.xlu0 %45 }
 0x126   :  { %v56_v38 = vmul.f32 0.03125, %v46_v37 }
 0x128   :  { %v60_v39 = vadd.f32 1e-05, %v56_v38 }
 0x129   :  { %v49_v40 = vpop.xlane.xlu1 %48  ;;  %v52_v41 = vpop.xlane.xlu0 %51 }
 0x12a   :  { %143 = vrsqrt.f32 %v60_v39  ;;  %v57_v42 = vmul.f32 0.03125, %v49_v40  ;;  %v58_v43 = vmul.f32 0.03125, %v52_v41 }
 0x12c   :  { %v61_v44 = vadd.f32 1e-05, %v57_v42  ;;  %v62_v45 = vadd.f32 1e-05, %v58_v43 }
 0x12d   :  { %v84_v46 = vpop.permute.xlu1 %83 }
 0x12e   :  { %145 = vrsqrt.f32 %v61_v44 }
 0x12f   :  { %147 = vrsqrt.f32 %v62_v45 }
 0x131   :  { %v89_v47 = vpop.permute.xlu1 %88  ;;  %v79_v49 = vpop.permute.xlu0 %78 }
 0x134   :  { %v144_v48 = vpop.eup %143 }
 0x135   :  { %v94_v50 = vpop.permute.xlu1 %93  ;;  %v68_v51 = vmul.f32 %v144_v48, %v36_v13 }
 0x137   :  { %v96_v52 = vmul.f32 %v79_v49, %v68_v51 }
 0x138   :  { %v146_v53 = vpop.eup %145 }
 0x139   :  { %v148_v54 = vpop.eup %147  ;;  %v69_v55 = vmul.f32 %v146_v53, %v37_v19  ;;  %v107_v56 = vpop.permute.xlu1 %106 }
 0x13a   :  { %v124_v57 = vadd.f32 %v107_v56, %v96_v52  ;;  %v70_v59 = vmul.f32 %v148_v54, %v188_v14 }
 0x13b   :  { %v97_v58 = vmul.f32 %v84_v46, %v69_v55 }
 0x13c   :  { %v128_v60 = vmax.f32 %v124_v57, 0.0  ;;  %v98_v63 = vmul.f32 %v89_v47, %v70_v59 }
 0x13d   :  { %v112_v61 = vpop.permute.xlu1 %111 }
 0x13e   :  { %132 = vst.msk [vmem:[%s240_s3] sm:$0xff] %vm18_vm0, %v128_v60  ;;  %v125_v62 = vadd.f32 %v112_v61, %v97_v58 }
 0x140   :  { %v129_v0 = vmax.f32 %v125_v62, 0.0 }
 0x141   :  { %v117_v1 = vpop.permute.xlu1 %116 }
 0x142   :  { %133 = vst.msk [vmem:[%s240_s3 + $0x8] sm:$0xff] %vm18_vm0, %v129_v0  ;;  %v126_v2 = vadd.f32 %v117_v1, %v98_v63 }
 0x144   :  { %v130_v3 = vmax.f32 %v126_v2, 0.0 }
 0x146   :  { %134 = vst.msk [vmem:[%s240_s3 + $0x10] sm:$0xff] %vm18_vm0, %v130_v3 }
 0x172   :  { %v55_v4 = vpop.xlane.xlu1 %54 }
 0x173   :  { %v59_v5 = vmul.f32 0.03125, %v55_v4 }
 0x175   :  { %v63_v6 = vadd.f32 1e-05, %v59_v5 }
 0x176   :  { %v122_v10 = vpop.permute.xlu1 %121 }
 0x177   :  { %149 = vrsqrt.f32 %v63_v6 }
 0x181   :  { %v150_v7 = vpop.eup %149 }
 0x182   :  { %v71_v8 = vmul.f32 %v150_v7, %v39_v33 }
 0x184   :  { %v99_v9 = vmul.f32 %v94_v50, %v71_v8 }
 0x186   :  { %v127_v11 = vadd.f32 %v122_v10, %v99_v9 }
 0x188   :  { %v131_v12 = vmax.f32 %v127_v11, 0.0 }
 0x18a   :  { %135 = vst.msk [vmem:[%s240_s3 + $0x18] sm:$0xff] %vm18_vm0, %v131_v12 }

// kernel: _lambda_.44
= control target key start
LH: loop header
LB: loop body
LE: loop exit
PB: predicated region body
PF: predicated region fallthrough
CT: control target
= control target key end

     0   :  { %10 = vsyncpa [#allocation3], 0  ;;  %s581_s0 = inlined_call_operand.vmem [shape: f32[5], index: 0, kind: input, shape index: {}]   ;;  %s582_s1 = inlined_call_operand.vmem [shape: f32[144,32], index: 1, kind: input, shape index: {}]   ;;  %s583_s2 = inlined_call_operand.vmem [shape: f32[16,32], index: 2, kind: input, shape index: {}]   ;;  %s584_s3 = inlined_call_operand.vmem [shape: f32[2,16,144], index: 3, kind: input, shape index: {}]   ;;  %s585_s4 = inlined_call_operand.vmem [shape: f32[16,32], index: 4, kind: input, shape index: {}]   ;;  %s586_s5 = inlined_call_operand.vmem [shape: f32[16,32], index: 5, kind: output, shape index: {}]  }
   0x1   :  { %s17_s20 = sshll.u32 %s581_s0, 4  ;;  %s18_s20 = int_to_ptr.vmem [resolvable:$true] %s17_s20 }
   0x2   :  { %s404_s21 = scalar_lea.vmem %s18_s20, 16  ;;  %p409_p1 = scmp.lt.s32.totalorder %s18_s20, %s18_s20 }
   0x3   :  { %p405_p0 = scmp.ne.s32.totalorder %s18_s20, %s404_s21  ;;  %p410_p2 = scmp.lt.s32.totalorder %s404_s21, %s404_s21 }
   0x5   :  { %p411_p3 = por %p410_p2, %p409_p1 }
   0x7   :  { %p412_p4 = pnand %p411_p3, %p405_p0 }
   0x9   :  { %415 = shalt.err (!%p412_p4)
}
   0xa   :  { %s418_s22 = smov [#allocation2]  }
   0xb   :  { %20 = dma.vmem_to_smem %s18_s20, 16, %s418_s22, [#allocation3]  }
   0xc   :  { %416 = dma.done.wait [#allocation3], 16  }
   0xd   :  { %417 = vsyncadd [#allocation3], 4294967280 }
   0xe   :  { %32 = sfence }
   0xf   :  { %v33_v0 = vld [vmem:[%s582_s1] sm:$0xff]  ;;  %v34_v1 = vld [vmem:[%s582_s1 + $0x8] sm:$0xff]  ;;  %v35_v2 = vld [vmem:[%s582_s1 + $0x10] sm:$0xff]  ;;  %v419_v3 = vmov 0.0|0.0   ;;  %vm74_vm0 = vcmask 130048   ;;  %vm156_vm1 = vcmask 261120  }
  0x10   :  { %340 = vmatprep.subr.bf16.mxu0 %v419_v3  ;;  %367 = vmatprep.subr.bf16.mxu1 %v419_v3  ;;  %v51_v4 = vmax.f32 %v33_v0, 0.0  ;;  %v52_v5 = vmax.f32 %v34_v1, 0.0  ;;  %v36_v6 = vld [vmem:[%s582_s1 + $0x18] sm:$0xff]  ;;  %v53_v7 = vmax.f32 %v35_v2, 0.0  ;;  %v37_v9 = vld [vmem:[%s582_s1 + $0x20] sm:$0xff]  ;;  %v38_v10 = vld [vmem:[%s582_s1 + $0x28] sm:$0xff] }
  0x11   :  { %v54_v8 = vmax.f32 %v36_v6, 0.0  ;;  %v55_v13 = vmax.f32 %v37_v9, 0.0  ;;  %v56_v14 = vmax.f32 %v38_v10, 0.0  ;;  %v39_v15 = vld [vmem:[%s582_s1 + $0x30] sm:$0xff]  ;;  %v40_v16 = vld [vmem:[%s582_s1 + $0x38] sm:$0xff]  ;;  %v71_v17 = vld [vmem:[%s584_s3 + $0x8] sm:$0xff] }
  0x12   :  { %v341_v11 = vpack.c.bf16 %v52_v5, %v51_v4  ;;  %v333_v18 = vld [vmem:[%s584_s3 + $0x28] sm:$0xff]  ;;  %329 = vmatprep.mubr.msk.f32.mxu0 %vm74_vm0, %v71_v17  ;;  %v57_v20 = vmax.f32 %v39_v15, 0.0  ;;  %v58_v21 = vmax.f32 %v40_v16, 0.0  ;;  %v41_v22 = vld [vmem:[%s582_s1 + $0x40] sm:$0xff]  ;;  %v43_v27 = vld [vmem:[%s582_s1 + $0x50] sm:$0xff]  ;;  %s331_s22 = sld [smem:[#allocation2 + $0x2]] }
  0x13   :  { %v344_v12 = vpack.c.bf16 %v54_v8, %v53_v7  ;;  %336 = vmatprep.mubr.msk.f32.mxu1 %vm74_vm0, %v333_v18  ;;  %v347_v19 = vpack.c.bf16 %v56_v14, %v55_v13  ;;  %v42_v23 = vld [vmem:[%s582_s1 + $0x48] sm:$0xff]  ;;  %v59_v25 = vmax.f32 %v41_v22, 0.0  ;;  %v44_v28 = vld [vmem:[%s582_s1 + $0x58] sm:$0xff]  ;;  %v61_v30 = vmax.f32 %v43_v27, 0.0  ;;  %v45_v32 = vld [vmem:[%s582_s1 + $0x60] sm:$0xff]  ;;  %s338_s23 = sld [smem:[#allocation2 + $0x1]] }
  0x14   :  { %342 = vmatpush1.bf16.msra.mxu0 %v341_v11  ;;  %369 = vmatpush1.bf16.msra.mxu1 %v341_v11  ;;  %v350_v24 = vpack.c.bf16 %v58_v21, %v57_v20  ;;  %v60_v26 = vmax.f32 %v42_v23, 0.0  ;;  %v62_v31 = vmax.f32 %v44_v28, 0.0  ;;  %v46_v33 = vld [vmem:[%s582_s1 + $0x68] sm:$0xff]  ;;  %v63_v35 = vmax.f32 %v45_v32, 0.0  ;;  %v47_v37 = vld [vmem:[%s582_s1 + $0x70] sm:$0xff]  ;;  %v48_v38 = vld [vmem:[%s582_s1 + $0x78] sm:$0xff] }
  0x15   :  { %343 = vmatprep.subr.bf16.mxu0 %v419_v3  ;;  %370 = vmatprep.subr.bf16.mxu1 %v419_v3  ;;  %v64_v36 = vmax.f32 %v46_v33, 0.0  ;;  %v65_v40 = vmax.f32 %v47_v37, 0.0  ;;  %v66_v41 = vmax.f32 %v48_v38, 0.0  ;;  %v49_v42 = vld [vmem:[%s582_s1 + $0x80] sm:$0xff]  ;;  %v50_v43 = vld [vmem:[%s582_s1 + $0x88] sm:$0xff]  ;;  %v73_v50 = vld [vmem:[%s584_s3 + $0x18] sm:$0xff] }
  0x16   :  { %v353_v29 = vpack.c.bf16 %v60_v26, %v59_v25  ;;  %v356_v34 = vpack.c.bf16 %v62_v31, %v61_v30  ;;  %v67_v45 = vmax.f32 %v49_v42, 0.0  ;;  %v68_v46 = vmax.f32 %v50_v43, 0.0  ;;  %v70_v48 = vld [vmem:[%s584_s3] sm:$0xff]  ;;  %v335_v51 = vld [vmem:[%s584_s3 + $0x38] sm:$0xff]  ;;  %v72_v52 = vld [vmem:[%s584_s3 + $0x10] sm:$0xff]  ;;  %s339_s24 = sld [smem:[#allocation2 + $0x4]] }
  0x17   :  { %v359_v39 = vpack.c.bf16 %v64_v36, %v63_v35  ;;  %v362_v44 = vpack.c.bf16 %v66_v41, %v65_v40  ;;  %v332_v49 = vld [vmem:[%s584_s3 + $0x20] sm:$0xff]  ;;  %v334_v53 = vld [vmem:[%s584_s3 + $0x30] sm:$0xff]  ;;  %s328_s3 = sld [smem:[#allocation2 + $0x3]] }
  0x18   :  { %345 = vmatpush1.bf16.msra.mxu0 %v344_v12  ;;  %372 = vmatpush1.bf16.msra.mxu1 %v344_v12  ;;  %v365_v47 = vpack.c.bf16 %v68_v46, %v67_v45  ;;  %v306_v40 = vld [vmem:[%s585_s4] sm:$0xff] }
  0x19   :  { %346 = vmatprep.subr.bf16.mxu0 %v419_v3  ;;  %373 = vmatprep.subr.bf16.mxu1 %v419_v3  ;;  %v308_v41 = vstv %s338_s23 }
  0x1c   :  { %348 = vmatpush1.bf16.msra.mxu0 %v347_v19  ;;  %375 = vmatpush1.bf16.msra.mxu1 %v347_v19  ;;  %v316_v45 = vstv %s339_s24 }
  0x1d   :  { %349 = vmatprep.subr.bf16.mxu0 %v419_v3  ;;  %376 = vmatprep.subr.bf16.mxu1 %v419_v3  ;;  %v184_v38 = vstv %s328_s3 }
  0x20   :  { %351 = vmatpush1.bf16.msra.mxu0 %v350_v24  ;;  %378 = vmatpush1.bf16.msra.mxu1 %v350_v24 }
  0x21   :  { %352 = vmatprep.subr.bf16.mxu0 %v419_v3  ;;  %379 = vmatprep.subr.bf16.mxu1 %v419_v3 }
  0x24   :  { %354 = vmatpush1.bf16.msra.mxu0 %v353_v29  ;;  %381 = vmatpush1.bf16.msra.mxu1 %v353_v29 }
  0x25   :  { %355 = vmatprep.subr.bf16.mxu0 %v419_v3  ;;  %382 = vmatprep.subr.bf16.mxu1 %v419_v3 }
  0x28   :  { %357 = vmatpush1.bf16.msra.mxu0 %v356_v34  ;;  %384 = vmatpush1.bf16.msra.mxu1 %v356_v34 }
  0x29   :  { %358 = vmatprep.subr.bf16.mxu0 %v419_v3  ;;  %385 = vmatprep.subr.bf16.mxu1 %v419_v3 }
  0x2c   :  { %360 = vmatpush1.bf16.msra.mxu0 %v359_v39  ;;  %387 = vmatpush1.bf16.msra.mxu1 %v359_v39  ;;  %v300_v39 = vstv %s331_s22 }
  0x2d   :  { %361 = vmatprep.subr.bf16.mxu0 %v419_v3  ;;  %388 = vmatprep.subr.bf16.mxu1 %v419_v3 }
  0x30   :  { %363 = vmatpush1.bf16.msra.mxu0 %v362_v44  ;;  %390 = vmatpush1.bf16.msra.mxu1 %v362_v44  ;;  %v314_v44 = vld [vmem:[%s583_s2] sm:$0xff] }
  0x31   :  { %364 = vmatprep.subr.bf16.mxu0 %v419_v3  ;;  %391 = vmatprep.subr.bf16.mxu1 %v419_v3 }
  0x34   :  { %366 = vmatpush1.bf16.msra.mxu0 %v365_v47  ;;  %393 = vmatpush1.bf16.msra.mxu1 %v365_v47 }
  0x37   :  { %146 = vmatmul.mubr.f32.vlgmr.msra.gmra.mrb[0].mxu0 %v70_v48  ;;  %264 = vmatmul.mubr.f32.vlgmr.msra.gmra.mrb[0].mxu1 %v332_v49  ;;  %v309_v48 = vmul.f32 %v308_v41, %v306_v40 }
  0x38   :  { %330 = vmatprep.mubr.msk.f32.mxu0 %vm74_vm0, %v73_v50  ;;  %337 = vmatprep.mubr.msk.f32.mxu1 %vm74_vm0, %v335_v51  ;;  %v307_v50 = vld [vmem:[%s585_s4 + $0x8] sm:$0xff] }
  0x3b   :  { %151 = vmatmul.mubr.f32.gmra.mrb[2].mxu0 %v72_v52  ;;  %269 = vmatmul.mubr.f32.gmra.mrb[2].mxu1 %v334_v53  ;;  %v317_v52 = vmul.f32 %v316_v45, %v314_v44 }
 0x10a   :  { %v147_v54 = vpop.f32.mrb[0].mxu0  ;;  %v265_v55 = vpop.f32.mrb[0].mxu1 }
 0x10b   :  { %v149_v56 = vpop.f32.mrb[1].mxu0  ;;  %v274_v57 = vsel %vm156_vm1, %v265_v55, 0.0  ;;  %v157_v58 = vsel %vm156_vm1, %v147_v54, 0.0  ;;  %v267_v59 = vpop.f32.mrb[1].mxu1 }
 0x10c   :  { %275 = vadd.xlane.f32.xlu1 %v274_v57  ;;  %158 = vadd.xlane.f32.xlu0 %v157_v58  ;;  %v310_v56 = vmul.f32 %v308_v41, %v307_v50 }
 0x10e   :  { %v152_v60 = vpop.f32.mrb[2].mxu0  ;;  %v270_v61 = vpop.f32.mrb[2].mxu1 }
 0x10f   :  { %v154_v62 = vpop.f32.mrb[3].mxu0  ;;  %v277_v63 = vsel %vm156_vm1, %v270_v61, 0.0  ;;  %v160_v0 = vsel %vm156_vm1, %v152_v60, 0.0  ;;  %v272_v1 = vpop.f32.mrb[3].mxu1 }
 0x110   :  { %278 = vadd.xlane.f32.xlu1 %v277_v63  ;;  %161 = vadd.xlane.f32.xlu0 %v160_v0 }
 0x199   :  { %v276_v2 = vpop.xlane.xlu1 %275  ;;  %v159_v3 = vpop.xlane.xlu0 %158 }
 0x19a   :  { %v280_v4 = vmul.f32 0.03125, %v276_v2  ;;  %v164_v5 = vmul.f32 0.03125, %v159_v3 }
 0x19c   :  { %v282_v6 = vsub.f32 %v265_v55, %v280_v4  ;;  %v166_v7 = vsub.f32 %v147_v54, %v164_v5  ;;  %v315_v54 = vld [vmem:[%s583_s2 + $0x8] sm:$0xff] }
 0x19d   :  { %v279_v8 = vpop.xlane.xlu1 %278  ;;  %v162_v9 = vpop.xlane.xlu0 %161  ;;  %v318_v59 = vmul.f32 %v316_v45, %v315_v54 }
 0x19e   :  { %v281_v10 = vmul.f32 0.03125, %v279_v8  ;;  %v165_v11 = vmul.f32 0.03125, %v162_v9  ;;  %v168_v12 = vmul.f32 %v166_v7, %v166_v7  ;;  %v284_v16 = vmul.f32 %v282_v6, %v282_v6 }
 0x1a0   :  { %v283_v13 = vsub.f32 %v270_v61, %v281_v10  ;;  %v167_v14 = vsub.f32 %v152_v60, %v165_v11  ;;  %v170_v15 = vsel %vm156_vm1, %v168_v12, 0.0  ;;  %v286_v18 = vsel %vm156_vm1, %v284_v16, 0.0 }
 0x1a1   :  { %171 = vadd.xlane.f32.xlu0 %v170_v15 }
 0x1a2   :  { %v169_v17 = vmul.f32 %v167_v14, %v167_v14  ;;  %v285_v20 = vmul.f32 %v283_v13, %v283_v13 }
 0x1a4   :  { %v173_v19 = vsel %vm156_vm1, %v169_v17, 0.0  ;;  %v289_v21 = vsel %vm156_vm1, %v285_v20, 0.0 }
 0x1a5   :  { %287 = vadd.xlane.f32.xlu0 %v286_v18  ;;  %174 = vadd.xlane.f32.xlu1 %v173_v19 }
 0x1a9   :  { %290 = vadd.xlane.f32.xlu1 %v289_v21 }
 0x22e   :  { %v172_v22 = vpop.xlane.xlu0 %171 }
 0x22f   :  { %v176_v23 = vmul.f32 0.03125, %v172_v22 }
 0x231   :  { %v178_v24 = vadd.f32 1e-05, %v176_v23 }
 0x232   :  { %v175_v25 = vpop.xlane.xlu1 %174  ;;  %v288_v26 = vpop.xlane.xlu0 %287 }
 0x233   :  { %v177_v27 = vmul.f32 0.03125, %v175_v25  ;;  %v292_v28 = vmul.f32 0.03125, %v288_v26  ;;  %396 = vrsqrt.f32 %v178_v24 }
 0x235   :  { %v179_v29 = vadd.f32 1e-05, %v177_v27  ;;  %v294_v30 = vadd.f32 1e-05, %v292_v28 }
 0x236   :  { %v291_v31 = vpop.xlane.xlu1 %290 }
 0x237   :  { %398 = vrsqrt.f32 %v179_v29  ;;  %v293_v32 = vmul.f32 0.03125, %v291_v31 }
 0x238   :  { %400 = vrsqrt.f32 %v294_v30 }
 0x239   :  { %v295_v33 = vadd.f32 1e-05, %v293_v32 }
 0x23b   :  { %402 = vrsqrt.f32 %v295_v33 }
 0x23d   :  { %v397_v34 = vpop.eup %396 }
 0x23e   :  { %v182_v36 = vmul.f32 %v397_v34, %v166_v7 }
 0x240   :  { %v185_v47 = vmul.f32 %v184_v38, %v182_v36 }
 0x241   :  { %v399_v35 = vpop.eup %398 }
 0x242   :  { %v401_v37 = vpop.eup %400  ;;  %v183_v43 = vmul.f32 %v399_v35, %v167_v14 }
 0x243   :  { %v298_v42 = vmul.f32 %v401_v37, %v282_v6 }
 0x244   :  { %v186_v55 = vmul.f32 %v184_v38, %v183_v43 }
 0x245   :  { %v403_v46 = vpop.eup %402  ;;  %v301_v49 = vmul.f32 %v300_v39, %v298_v42 }
 0x246   :  { %v299_v51 = vmul.f32 %v403_v46, %v283_v13 }
 0x247   :  { %v303_v53 = vadd.f32 %v301_v49, %v185_v47 }
 0x248   :  { %v302_v57 = vmul.f32 %v300_v39, %v299_v51 }
 0x249   :  { %v311_v58 = vadd.f32 %v309_v48, %v303_v53 }
 0x24a   :  { %v304_v60 = vadd.f32 %v302_v57, %v186_v55 }
 0x24b   :  { %v319_v61 = vadd.f32 %v317_v52, %v311_v58 }
 0x24c   :  { %v312_v62 = vadd.f32 %v310_v56, %v304_v60 }
 0x24d   :  { %321 = vst.msk [vmem:[%s586_s5] sm:$0xff] %vm156_vm1, %v319_v61 }
 0x24e   :  { %v320_v63 = vadd.f32 %v318_v59, %v312_v62 }
 0x250   :  { %322 = vst.msk [vmem:[%s586_s5 + $0x8] sm:$0xff] %vm156_vm1, %v320_v63 }
 0x251   :  { %327 = vsyncpa [#allocation3], 1 }

</bundles_post_ra>
